<compile_context>
chip_gen: v7x
topology: tpu7x:2x2x1
jax: 0.10.0
libtpu: 0.0.40
codegen_flags: <defaults>
</compile_context>

<pallas_src>
import jax
import jax.numpy as jnp
from jax import lax
from jax.experimental import pallas as pl
from jax.experimental.pallas import tpu as pltpu

INPUT_DIM = 6
IN_PAD = 8          # input features padded to one sublane
D_MODEL = 128
N_LAYERS = 2
D_FF = 2048
FF_CHUNK = 512      # FFN processed in 4 chunks of 512 hidden columns
N_CHUNKS = D_FF // FF_CHUNK
LN_EPS = 1e-5

# 48 MiB: below v7x's 64 MiB/TC physical VMEM, well above what TB=512 needs,
# and an explicit raise over v5e's 16 MiB scoped default.
_VMEM_LIMIT_BYTES = 48 * 1024 * 1024

# Rows of the packed (NV, 128) f32 vector slab.
_ROW_B_IN = 0
_ROW_W_HEAD = 1     # lnf_gamma * W_fc  (folded final LayerNorm affine + head)
_ROWS_PER_LAYER = 6  # [b_att, ln1_g, ln1_b, b2, ln2_g, ln2_b]
_NV = 2 + _ROWS_PER_LAYER * N_LAYERS
_NV_PAD = ((_NV + 7) // 8) * 8


def _round_up(a, m):
    return ((a + m - 1) // m) * m


def _layer_norm(x, g, b):
    mu = jnp.mean(x, axis=-1, keepdims=True)
    var = jnp.mean(jnp.square(x - mu), axis=-1, keepdims=True)
    return (x - mu) * lax.rsqrt(var + LN_EPS) * g + b


def transformer_kernel(x_ref, w_in_ref, vecs_ref, w_att_ref,
                       w1_ref, b1_ref, w2_ref, b_head_ref, out_ref):
    def vrow(i):                      # (1, 128) f32 row of the packed slab
        return vecs_ref[i:i + 1, :]

    # input_proj: (TB, 8) @ (8, 128) f32 (padded feature rows of w_in are 0).
    h = jnp.dot(x_ref[...], w_in_ref[...],
                preferred_element_type=jnp.float32) + vrow(_ROW_B_IN)

    for l in range(N_LAYERS):         # unrolled at trace time (2 layers)
        base = 2 + _ROWS_PER_LAYER * l

        # --- self-attention block (seq_len == 1 -> softmax == 1, fused) ---
        hb = h.astype(jnp.bfloat16)
        sa = jnp.dot(hb, w_att_ref[l],
                     preferred_element_type=jnp.float32) + vrow(base + 0)
        h = _layer_norm(h + sa, vrow(base + 1), vrow(base + 2))   # post-LN

        # --- feed-forward: Linear(128,2048) -> ReLU -> Linear(2048,128) ---
        # Chunked over D_FF so the widest live tensor is (TB, FF_CHUNK)
        # instead of (TB, 2048); second matmul accumulated in f32.
        hb = h.astype(jnp.bfloat16)
        ff = None
        for c in range(N_CHUNKS):     # unrolled at trace time (4 chunks)
            f = jnp.dot(hb, w1_ref[l, c],
                        preferred_element_type=jnp.float32) + b1_ref[l, c]
            f = jnp.maximum(f, 0.0).astype(jnp.bfloat16)
            p = jnp.dot(f, w2_ref[l, c], preferred_element_type=jnp.float32)
            ff = p if ff is None else ff + p
        h = _layer_norm(h + ff + vrow(base + 3), vrow(base + 4), vrow(base + 5))

    # mean over seq dim of length 1 is an identity.
    # Final LayerNorm affine + Linear(128,1) folded: VPU mul + lane reduce
    # (kept in exact f32 — this is the head output).
    mu = jnp.mean(h, axis=-1, keepdims=True)
    var = jnp.mean(jnp.square(h - mu), axis=-1, keepdims=True)
    h_ln = (h - mu) * lax.rsqrt(var + LN_EPS)
    out_ref[...] = (jnp.sum(h_ln * vrow(_ROW_W_HEAD), axis=-1, keepdims=True)
                    + b_head_ref[0])


def small_transformer_forward(x, kernel_params, *, tb=None):
    """x: (B, INPUT_DIM) float32 -> (B,) float32."""
    (w_in_p, vecs, w_att, w1, b1, w2, b_head) = kernel_params
    B = x.shape[0]

    if tb is None:
        tb = min(512, _round_up(max(B, 1), 8))
        if B > 256:
            # Keep at least 2 batch tiles so the "parallel" grid axis can be
            # sharded across the two TensorCores on v7x (harmless on v5e/v6e).
            tb = min(tb, _round_up((B + 1) // 2, 256))
    assert tb % 8 == 0
    n_tiles = (B + tb - 1) // tb
    b_pad = n_tiles * tb

    # Pad the tiny feature dim 6 -> 8 (one sublane) and the batch up to a
    # multiple of the batch tile. Padded rows/cols are zero; padded w_in
    # rows are zero, so the result for the real rows is unchanged, and the
    # padded output rows are discarded below.
    x_p = jnp.zeros((b_pad, IN_PAD), jnp.float32)
    x_p = x_p.at[:B, :INPUT_DIM].set(x.astype(jnp.float32))

    out = pl.pallas_call(
        transformer_kernel,
        out_shape=jax.ShapeDtypeStruct((b_pad, 1), jnp.float32),
        grid=(n_tiles,),
        in_specs=[
            pl.BlockSpec((tb, IN_PAD), lambda i: (i, 0)),                   # x
            pl.BlockSpec((IN_PAD, D_MODEL), lambda i: (0, 0)),              # w_in
            pl.BlockSpec((_NV_PAD, D_MODEL), lambda i: (0, 0)),             # bias/LN slab
            pl.BlockSpec((N_LAYERS, D_MODEL, D_MODEL),
                         lambda i: (0, 0, 0)),                              # w_att (bf16)
            pl.BlockSpec((N_LAYERS, N_CHUNKS, D_MODEL, FF_CHUNK),
                         lambda i: (0, 0, 0, 0)),                           # w1 (bf16, chunked)
            pl.BlockSpec((N_LAYERS, N_CHUNKS, 1, FF_CHUNK),
                         lambda i: (0, 0, 0, 0)),                           # b1 (f32, chunked)
            pl.BlockSpec((N_LAYERS, N_CHUNKS, FF_CHUNK, D_MODEL),
                         lambda i: (0, 0, 0, 0)),                           # w2 (bf16, chunked)
            pl.BlockSpec(memory_space=pltpu.MemorySpace.SMEM),              # b_head scalar
        ],
        out_specs=pl.BlockSpec((tb, 1), lambda i: (i, 0)),
        compiler_params=pltpu.CompilerParams(
            dimension_semantics=("parallel",),
            vmem_limit_bytes=_VMEM_LIMIT_BYTES),
    )(x_p, w_in_p, vecs, w_att, w1, b1, w2, b_head)
    return out[:B, 0]


def init_params(key):
    """Deterministic synthetic parameters, stored as [in_features, out_features]."""
    ks = jax.random.split(key, 18)

    def rnd(k, shape, scale=0.05):
        return (scale * jax.random.normal(k, shape)).astype(jnp.float32)

    w_in = rnd(ks[0], (INPUT_DIM, D_MODEL))
    b_in = rnd(ks[1], (D_MODEL,))
    wv = rnd(ks[2], (N_LAYERS, D_MODEL, D_MODEL))
    bv = rnd(ks[3], (N_LAYERS, D_MODEL))
    wo = rnd(ks[4], (N_LAYERS, D_MODEL, D_MODEL))
    bo = rnd(ks[5], (N_LAYERS, D_MODEL))
    w1 = rnd(ks[6], (N_LAYERS, D_MODEL, D_FF))
    b1 = rnd(ks[7], (N_LAYERS, D_FF))
    w2 = rnd(ks[8], (N_LAYERS, D_FF, D_MODEL))
    b2 = rnd(ks[9], (N_LAYERS, D_MODEL))
    ln1g = 1.0 + rnd(ks[10], (N_LAYERS, D_MODEL))
    ln1b = rnd(ks[11], (N_LAYERS, D_MODEL))
    ln2g = 1.0 + rnd(ks[12], (N_LAYERS, D_MODEL))
    ln2b = rnd(ks[13], (N_LAYERS, D_MODEL))
    lnfg = 1.0 + rnd(ks[14], (D_MODEL,))
    lnfb = rnd(ks[15], (D_MODEL,))
    wfc = rnd(ks[16], (D_MODEL, 1))
    bfc = rnd(ks[17], (1,))

    return (w_in, b_in, wv, bv, wo, bo, ln1g, ln1b,
            w1, b1, w2, b2, ln2g, ln2b, lnfg, lnfb, wfc, bfc)


def prepare_params(params):
    """Fuse / pack / cast the raw parameters into the kernel-side layout."""
    (w_in, b_in, wv, bv, wo, bo, ln1g, ln1b,
     w1, b1, w2, b2, ln2g, ln2b, lnfg, lnfb, wfc, bfc) = params

    w_in_p = jnp.zeros((IN_PAD, D_MODEL), jnp.float32).at[:INPUT_DIM].set(w_in)

    # Attention fusion (exact because seq_len == 1 -> softmax == 1):
    #   sa = h @ (Wv @ Wo) + (bv @ Wo + bo)
    w_att = jnp.einsum('lij,ljk->lik', wv, wo).astype(jnp.bfloat16)
    b_att = jnp.einsum('lj,ljk->lk', bv, wo) + bo                  # (L, 128)

    # Fold final LayerNorm affine + fc head:
    #   out = h_ln @ (lnfg * wfc) + (lnfb @ wfc + bfc)
    w_head = lnfg * wfc[:, 0]                                      # (128,)
    b_head = (jnp.dot(lnfb, wfc[:, 0]) + bfc[0]).reshape(1).astype(jnp.float32)

    rows = [b_in, w_head]
    for l in range(N_LAYERS):
        rows += [b_att[l], ln1g[l], ln1b[l], b2[l], ln2g[l], ln2b[l]]
    vecs = jnp.zeros((_NV_PAD, D_MODEL), jnp.float32)
    vecs = vecs.at[:_NV].set(jnp.stack(rows).astype(jnp.float32))

    # Chunk the FFN weights along D_FF (column blocks of W1 / row blocks of W2)
    # so the kernel never materializes a (TB, 2048) intermediate.
    w1_c = (w1.reshape(N_LAYERS, D_MODEL, N_CHUNKS, FF_CHUNK)
              .transpose(0, 2, 1, 3).astype(jnp.bfloat16))          # (L, NC, 128, CH)
    b1_c = b1.reshape(N_LAYERS, N_CHUNKS, 1, FF_CHUNK).astype(jnp.float32)
    w2_c = w2.reshape(N_LAYERS, N_CHUNKS, FF_CHUNK, D_MODEL).astype(jnp.bfloat16)

    return (w_in_p, vecs, w_att, w1_c, b1_c, w2_c, b_head)


def reference_forward(x, params, mixed_precision=False):
    """Pure-JAX reference of the PyTorch math.

    mixed_precision=False : exact f32 PyTorch semantics.
    mixed_precision=True  : same bf16 weight / activation casts as the kernel
                            (for a tight numerical check of the kernel itself).
    """
    (w_in, b_in, wv, bv, wo, bo, ln1g, ln1b,
     w1, b1, w2, b2, ln2g, ln2b, lnfg, lnfb, wfc, bfc) = params

    def ln(t, g, b):
        mu = t.mean(-1, keepdims=True)
        var = ((t - mu) ** 2).mean(-1, keepdims=True)
        return (t - mu) / jnp.sqrt(var + LN_EPS) * g + b

    def mm(a, w):
        if mixed_precision:
            a = a.astype(jnp.bfloat16)
            w = w.astype(jnp.bfloat16)
        return jnp.dot(a, w, preferred_element_type=jnp.float32)

    h = x @ w_in + b_in
    for l in range(N_LAYERS):
        if mixed_precision:
            sa = mm(h, wv[l] @ wo[l]) + (bv[l] @ wo[l] + bo[l])
        else:
            sa = (h @ wv[l] + bv[l]) @ wo[l] + bo[l]
        h = ln(h + sa, ln1g[l], ln1b[l])
        ff = jnp.maximum(mm(h, w1[l]) + b1[l], 0.0)
        ff = mm(ff, w2[l]) + b2[l]
        h = ln(h + ff, ln2g[l], ln2b[l])
    h = ln(h, lnfg, lnfb)
    return (h @ wfc)[:, 0] + bfc[0]


if __name__ == "__main__":
    key = jax.random.PRNGKey(0)
    kx, kx2, kx3, kp = jax.random.split(key, 4)
    params = init_params(kp)
    kparams = prepare_params(params)

    fwd = jax.jit(small_transformer_forward, static_argnames=("tb",))

    def check(x, out):
        ref_mixed = reference_forward(x, params, mixed_precision=True)
        ref_f32 = reference_forward(x, params, mixed_precision=False)
        assert out.shape == (x.shape[0],)
        assert jnp.allclose(out, ref_mixed, rtol=2e-3, atol=2e-3), \
            float(jnp.max(jnp.abs(out - ref_mixed)))
        assert jnp.allclose(out, ref_f32, rtol=5e-2, atol=5e-2), \
            float(jnp.max(jnp.abs(out - ref_f32)))

    # Small single-tile check.
    B = 8
    x = jax.random.normal(kx, (B, INPUT_DIM), dtype=jnp.float32)
    out = jax.block_until_ready(fwd(x, kparams))
    check(x, out)

    # Multi-tile check with an explicit tile, exercising tail padding.
    B2 = 200
    x2 = jax.random.normal(kx2, (B2, INPUT_DIM), dtype=jnp.float32)
    out2 = jax.block_until_ready(fwd(x2, kparams, tb=128))
    check(x2, out2)

    # Default-tile multi-tile check (TB=512, >=2 tiles, tail padding).
    B3 = 777
    x3 = jax.random.normal(kx3, (B3, INPUT_DIM), dtype=jnp.float32)
    out3 = jax.block_until_ready(fwd(x3, kparams))
    check(x3, out3)

    print("KERNEL_OK")
</pallas_src>

<mosaic_0001>
module attributes {stable_mosaic.version = 11 : i64} {
  func.func @transformer_kernel(%arg0: i32, %arg1: memref<8x8xf32, #tpu.memory_space<vmem>>, %arg2: memref<8x128xf32, #tpu.memory_space<vmem>>, %arg3: memref<16x128xf32, #tpu.memory_space<vmem>>, %arg4: memref<2x128x128xbf16, #tpu.memory_space<vmem>>, %arg5: memref<2x4x128x512xbf16, #tpu.memory_space<vmem>>, %arg6: memref<2x4x1x512xf32, #tpu.memory_space<vmem>>, %arg7: memref<2x4x512x128xbf16, #tpu.memory_space<vmem>>, %arg8: memref<1xf32, #tpu.memory_space<smem>>, %arg9: memref<8x1xf32, #tpu.memory_space<vmem>>) attributes {dimension_semantics = [#tpu.dimension_semantics<parallel>], iteration_bounds = array<i64: 1>, scalar_prefetch = 0 : i64, scratch_operands = 0 : i64, tpu.core_type = #tpu.core_type<tc>, window_params = [{transform_indices = @transform_0, window_bounds = array<i64: 8, 8>}, {pipeline_mode = #tpu.pipeline_mode<synchronous>, transform_indices = @transform_1, window_bounds = array<i64: 8, 128>}, {pipeline_mode = #tpu.pipeline_mode<synchronous>, transform_indices = @transform_2, window_bounds = array<i64: 16, 128>}, {pipeline_mode = #tpu.pipeline_mode<synchronous>, transform_indices = @transform_3, window_bounds = array<i64: 2, 128, 128>}, {pipeline_mode = #tpu.pipeline_mode<synchronous>, transform_indices = @transform_4, window_bounds = array<i64: 2, 4, 128, 512>}, {pipeline_mode = #tpu.pipeline_mode<synchronous>, transform_indices = @transform_5, window_bounds = array<i64: 2, 4, 1, 512>}, {pipeline_mode = #tpu.pipeline_mode<synchronous>, transform_indices = @transform_6, window_bounds = array<i64: 2, 4, 512, 128>}, {transform_indices = @transform_7, window_bounds = array<i64: 1>}, {transform_indices = @transform_8, window_bounds = array<i64: 8, 1>}]} {
    %c0 = arith.constant 0 : index
    %c0_0 = arith.constant 0 : index
    %0 = vector.load %arg1[%c0, %c0_0] : memref<8x8xf32, #tpu.memory_space<vmem>>, vector<8x8xf32>
    %c0_1 = arith.constant 0 : index
    %c0_2 = arith.constant 0 : index
    %1 = vector.load %arg2[%c0_1, %c0_2] : memref<8x128xf32, #tpu.memory_space<vmem>>, vector<8x128xf32>
    %cst = arith.constant dense<0.000000e+00> : vector<8x128xf32>
    %2 = tpu.matmul %0, %1, %cst {dimension_numbers = #tpu.dot_dimension_numbers<[1], [0], [0], [1], [0, 0, 1, 1], [], []>} : vector<8x8xf32>, vector<8x128xf32>, vector<8x128xf32> -> vector<8x128xf32>
    %c0_3 = arith.constant 0 : index
    %c0_4 = arith.constant 0 : index
    %3 = vector.load %arg3[%c0_3, %c0_4] : memref<16x128xf32, #tpu.memory_space<vmem>>, vector<1x128xf32>
    %4 = vector.broadcast %3 : vector<1x128xf32> to vector<8x128xf32>
    %5 = arith.addf %2, %4 : vector<8x128xf32>
    %6 = arith.truncf %5 : vector<8x128xf32> to vector<8x128xbf16>
    %c0_5 = arith.constant 0 : index
    %c0_6 = arith.constant 0 : index
    %c0_7 = arith.constant 0 : index
    %7 = vector.load %arg4[%c0_5, %c0_6, %c0_7] : memref<2x128x128xbf16, #tpu.memory_space<vmem>>, vector<1x128x128xbf16>
    %8 = vector.shape_cast %7 : vector<1x128x128xbf16> to vector<128x128xbf16>
    %cst_8 = arith.constant dense<0.000000e+00> : vector<8x128xf32>
    %9 = tpu.matmul %6, %8, %cst_8 {dimension_numbers = #tpu.dot_dimension_numbers<[1], [0], [0], [1], [0, 0, 1, 1], [], []>} : vector<8x128xbf16>, vector<128x128xbf16>, vector<8x128xf32> -> vector<8x128xf32>
    %c2 = arith.constant 2 : index
    %c0_9 = arith.constant 0 : index
    %10 = vector.load %arg3[%c2, %c0_9] : memref<16x128xf32, #tpu.memory_space<vmem>>, vector<1x128xf32>
    %11 = vector.broadcast %10 : vector<1x128xf32> to vector<8x128xf32>
    %12 = arith.addf %9, %11 : vector<8x128xf32>
    %13 = arith.addf %5, %12 : vector<8x128xf32>
    %c3 = arith.constant 3 : index
    %c0_10 = arith.constant 0 : index
    %14 = vector.load %arg3[%c3, %c0_10] : memref<16x128xf32, #tpu.memory_space<vmem>>, vector<1x128xf32>
    %c4 = arith.constant 4 : index
    %c0_11 = arith.constant 0 : index
    %15 = vector.load %arg3[%c4, %c0_11] : memref<16x128xf32, #tpu.memory_space<vmem>>, vector<1x128xf32>
    %cst_12 = arith.constant dense<0.000000e+00> : vector<8xf32>
    %16 = vector.multi_reduction <add>, %13, %cst_12 [1] : vector<8x128xf32> to vector<8xf32>
    %17 = vector.shape_cast %16 : vector<8xf32> to vector<8x1xf32>
    %cst_13 = arith.constant 1.280000e+02 : f32
    %18 = vector.broadcast %cst_13 : f32 to vector<8x1xf32>
    %19 = arith.divf %17, %18 : vector<8x1xf32>
    %20 = vector.broadcast %19 : vector<8x1xf32> to vector<8x128xf32>
    %21 = arith.subf %13, %20 : vector<8x128xf32>
    %22 = arith.mulf %21, %21 : vector<8x128xf32>
    %cst_14 = arith.constant dense<0.000000e+00> : vector<8xf32>
    %23 = vector.multi_reduction <add>, %22, %cst_14 [1] : vector<8x128xf32> to vector<8xf32>
    %24 = vector.shape_cast %23 : vector<8xf32> to vector<8x1xf32>
    %cst_15 = arith.constant 1.280000e+02 : f32
    %25 = vector.broadcast %cst_15 : f32 to vector<8x1xf32>
    %26 = arith.divf %24, %25 : vector<8x1xf32>
    %27 = vector.broadcast %19 : vector<8x1xf32> to vector<8x128xf32>
    %28 = arith.subf %13, %27 : vector<8x128xf32>
    %cst_16 = arith.constant 9.99999974E-6 : f32
    %29 = vector.broadcast %cst_16 : f32 to vector<8x1xf32>
    %30 = arith.addf %26, %29 : vector<8x1xf32>
    %31 = math.rsqrt %30 : vector<8x1xf32>
    %32 = vector.broadcast %31 : vector<8x1xf32> to vector<8x128xf32>
    %33 = arith.mulf %28, %32 : vector<8x128xf32>
    %34 = vector.broadcast %14 : vector<1x128xf32> to vector<8x128xf32>
    %35 = arith.mulf %33, %34 : vector<8x128xf32>
    %36 = vector.broadcast %15 : vector<1x128xf32> to vector<8x128xf32>
    %37 = arith.addf %35, %36 : vector<8x128xf32>
    %38 = arith.truncf %37 : vector<8x128xf32> to vector<8x128xbf16>
    %c0_17 = arith.constant 0 : index
    %c0_18 = arith.constant 0 : index
    %c0_19 = arith.constant 0 : index
    %c0_20 = arith.constant 0 : index
    %39 = vector.load %arg5[%c0_17, %c0_18, %c0_19, %c0_20] : memref<2x4x128x512xbf16, #tpu.memory_space<vmem>>, vector<1x1x128x512xbf16>
    %40 = vector.shape_cast %39 : vector<1x1x128x512xbf16> to vector<128x512xbf16>
    %cst_21 = arith.constant dense<0.000000e+00> : vector<8x512xf32>
    %41 = tpu.matmul %38, %40, %cst_21 {dimension_numbers = #tpu.dot_dimension_numbers<[1], [0], [0], [1], [0, 0, 1, 1], [], []>} : vector<8x128xbf16>, vector<128x512xbf16>, vector<8x512xf32> -> vector<8x512xf32>
    %c0_22 = arith.constant 0 : index
    %c0_23 = arith.constant 0 : index
    %c0_24 = arith.constant 0 : index
    %c0_25 = arith.constant 0 : index
    %42 = vector.load %arg6[%c0_22, %c0_23, %c0_24, %c0_25] : memref<2x4x1x512xf32, #tpu.memory_space<vmem>>, vector<1x1x1x512xf32>
    %43 = vector.shape_cast %42 : vector<1x1x1x512xf32> to vector<1x512xf32>
    %44 = vector.broadcast %43 : vector<1x512xf32> to vector<8x512xf32>
    %45 = arith.addf %41, %44 : vector<8x512xf32>
    %cst_26 = arith.constant 0.000000e+00 : f32
    %46 = vector.broadcast %cst_26 : f32 to vector<8x512xf32>
    %47 = arith.maximumf %45, %46 : vector<8x512xf32>
    %48 = arith.truncf %47 : vector<8x512xf32> to vector<8x512xbf16>
    %c0_27 = arith.constant 0 : index
    %c0_28 = arith.constant 0 : index
    %c0_29 = arith.constant 0 : index
    %c0_30 = arith.constant 0 : index
    %49 = vector.load %arg7[%c0_27, %c0_28, %c0_29, %c0_30] : memref<2x4x512x128xbf16, #tpu.memory_space<vmem>>, vector<1x1x512x128xbf16>
    %50 = vector.shape_cast %49 : vector<1x1x512x128xbf16> to vector<512x128xbf16>
    %cst_31 = arith.constant dense<0.000000e+00> : vector<8x128xf32>
    %51 = tpu.matmul %48, %50, %cst_31 {dimension_numbers = #tpu.dot_dimension_numbers<[1], [0], [0], [1], [0, 0, 1, 1], [], []>} : vector<8x512xbf16>, vector<512x128xbf16>, vector<8x128xf32> -> vector<8x128xf32>
    %c0_32 = arith.constant 0 : index
    %c1 = arith.constant 1 : index
    %c0_33 = arith.constant 0 : index
    %c0_34 = arith.constant 0 : index
    %52 = vector.load %arg5[%c0_32, %c1, %c0_33, %c0_34] : memref<2x4x128x512xbf16, #tpu.memory_space<vmem>>, vector<1x1x128x512xbf16>
    %53 = vector.shape_cast %52 : vector<1x1x128x512xbf16> to vector<128x512xbf16>
    %cst_35 = arith.constant dense<0.000000e+00> : vector<8x512xf32>
    %54 = tpu.matmul %38, %53, %cst_35 {dimension_numbers = #tpu.dot_dimension_numbers<[1], [0], [0], [1], [0, 0, 1, 1], [], []>} : vector<8x128xbf16>, vector<128x512xbf16>, vector<8x512xf32> -> vector<8x512xf32>
    %c0_36 = arith.constant 0 : index
    %c1_37 = arith.constant 1 : index
    %c0_38 = arith.constant 0 : index
    %c0_39 = arith.constant 0 : index
    %55 = vector.load %arg6[%c0_36, %c1_37, %c0_38, %c0_39] : memref<2x4x1x512xf32, #tpu.memory_space<vmem>>, vector<1x1x1x512xf32>
    %56 = vector.shape_cast %55 : vector<1x1x1x512xf32> to vector<1x512xf32>
    %57 = vector.broadcast %56 : vector<1x512xf32> to vector<8x512xf32>
    %58 = arith.addf %54, %57 : vector<8x512xf32>
    %cst_40 = arith.constant 0.000000e+00 : f32
    %59 = vector.broadcast %cst_40 : f32 to vector<8x512xf32>
    %60 = arith.maximumf %58, %59 : vector<8x512xf32>
    %61 = arith.truncf %60 : vector<8x512xf32> to vector<8x512xbf16>
    %c0_41 = arith.constant 0 : index
    %c1_42 = arith.constant 1 : index
    %c0_43 = arith.constant 0 : index
    %c0_44 = arith.constant 0 : index
    %62 = vector.load %arg7[%c0_41, %c1_42, %c0_43, %c0_44] : memref<2x4x512x128xbf16, #tpu.memory_space<vmem>>, vector<1x1x512x128xbf16>
    %63 = vector.shape_cast %62 : vector<1x1x512x128xbf16> to vector<512x128xbf16>
    %cst_45 = arith.constant dense<0.000000e+00> : vector<8x128xf32>
    %64 = tpu.matmul %61, %63, %cst_45 {dimension_numbers = #tpu.dot_dimension_numbers<[1], [0], [0], [1], [0, 0, 1, 1], [], []>} : vector<8x512xbf16>, vector<512x128xbf16>, vector<8x128xf32> -> vector<8x128xf32>
    %65 = arith.addf %51, %64 : vector<8x128xf32>
    %c0_46 = arith.constant 0 : index
    %c2_47 = arith.constant 2 : index
    %c0_48 = arith.constant 0 : index
    %c0_49 = arith.constant 0 : index
    %66 = vector.load %arg5[%c0_46, %c2_47, %c0_48, %c0_49] : memref<2x4x128x512xbf16, #tpu.memory_space<vmem>>, vector<1x1x128x512xbf16>
    %67 = vector.shape_cast %66 : vector<1x1x128x512xbf16> to vector<128x512xbf16>
    %cst_50 = arith.constant dense<0.000000e+00> : vector<8x512xf32>
    %68 = tpu.matmul %38, %67, %cst_50 {dimension_numbers = #tpu.dot_dimension_numbers<[1], [0], [0], [1], [0, 0, 1, 1], [], []>} : vector<8x128xbf16>, vector<128x512xbf16>, vector<8x512xf32> -> vector<8x512xf32>
    %c0_51 = arith.constant 0 : index
    %c2_52 = arith.constant 2 : index
    %c0_53 = arith.constant 0 : index
    %c0_54 = arith.constant 0 : index
    %69 = vector.load %arg6[%c0_51, %c2_52, %c0_53, %c0_54] : memref<2x4x1x512xf32, #tpu.memory_space<vmem>>, vector<1x1x1x512xf32>
    %70 = vector.shape_cast %69 : vector<1x1x1x512xf32> to vector<1x512xf32>
    %71 = vector.broadcast %70 : vector<1x512xf32> to vector<8x512xf32>
    %72 = arith.addf %68, %71 : vector<8x512xf32>
    %cst_55 = arith.constant 0.000000e+00 : f32
    %73 = vector.broadcast %cst_55 : f32 to vector<8x512xf32>
    %74 = arith.maximumf %72, %73 : vector<8x512xf32>
    %75 = arith.truncf %74 : vector<8x512xf32> to vector<8x512xbf16>
    %c0_56 = arith.constant 0 : index
    %c2_57 = arith.constant 2 : index
    %c0_58 = arith.constant 0 : index
    %c0_59 = arith.constant 0 : index
    %76 = vector.load %arg7[%c0_56, %c2_57, %c0_58, %c0_59] : memref<2x4x512x128xbf16, #tpu.memory_space<vmem>>, vector<1x1x512x128xbf16>
    %77 = vector.shape_cast %76 : vector<1x1x512x128xbf16> to vector<512x128xbf16>
    %cst_60 = arith.constant dense<0.000000e+00> : vector<8x128xf32>
    %78 = tpu.matmul %75, %77, %cst_60 {dimension_numbers = #tpu.dot_dimension_numbers<[1], [0], [0], [1], [0, 0, 1, 1], [], []>} : vector<8x512xbf16>, vector<512x128xbf16>, vector<8x128xf32> -> vector<8x128xf32>
    %79 = arith.addf %65, %78 : vector<8x128xf32>
    %c0_61 = arith.constant 0 : index
    %c3_62 = arith.constant 3 : index
    %c0_63 = arith.constant 0 : index
    %c0_64 = arith.constant 0 : index
    %80 = vector.load %arg5[%c0_61, %c3_62, %c0_63, %c0_64] : memref<2x4x128x512xbf16, #tpu.memory_space<vmem>>, vector<1x1x128x512xbf16>
    %81 = vector.shape_cast %80 : vector<1x1x128x512xbf16> to vector<128x512xbf16>
    %cst_65 = arith.constant dense<0.000000e+00> : vector<8x512xf32>
    %82 = tpu.matmul %38, %81, %cst_65 {dimension_numbers = #tpu.dot_dimension_numbers<[1], [0], [0], [1], [0, 0, 1, 1], [], []>} : vector<8x128xbf16>, vector<128x512xbf16>, vector<8x512xf32> -> vector<8x512xf32>
    %c0_66 = arith.constant 0 : index
    %c3_67 = arith.constant 3 : index
    %c0_68 = arith.constant 0 : index
    %c0_69 = arith.constant 0 : index
    %83 = vector.load %arg6[%c0_66, %c3_67, %c0_68, %c0_69] : memref<2x4x1x512xf32, #tpu.memory_space<vmem>>, vector<1x1x1x512xf32>
    %84 = vector.shape_cast %83 : vector<1x1x1x512xf32> to vector<1x512xf32>
    %85 = vector.broadcast %84 : vector<1x512xf32> to vector<8x512xf32>
    %86 = arith.addf %82, %85 : vector<8x512xf32>
    %cst_70 = arith.constant 0.000000e+00 : f32
    %87 = vector.broadcast %cst_70 : f32 to vector<8x512xf32>
    %88 = arith.maximumf %86, %87 : vector<8x512xf32>
    %89 = arith.truncf %88 : vector<8x512xf32> to vector<8x512xbf16>
    %c0_71 = arith.constant 0 : index
    %c3_72 = arith.constant 3 : index
    %c0_73 = arith.constant 0 : index
    %c0_74 = arith.constant 0 : index
    %90 = vector.load %arg7[%c0_71, %c3_72, %c0_73, %c0_74] : memref<2x4x512x128xbf16, #tpu.memory_space<vmem>>, vector<1x1x512x128xbf16>
    %91 = vector.shape_cast %90 : vector<1x1x512x128xbf16> to vector<512x128xbf16>
    %cst_75 = arith.constant dense<0.000000e+00> : vector<8x128xf32>
    %92 = tpu.matmul %89, %91, %cst_75 {dimension_numbers = #tpu.dot_dimension_numbers<[1], [0], [0], [1], [0, 0, 1, 1], [], []>} : vector<8x512xbf16>, vector<512x128xbf16>, vector<8x128xf32> -> vector<8x128xf32>
    %93 = arith.addf %79, %92 : vector<8x128xf32>
    %94 = arith.addf %37, %93 : vector<8x128xf32>
    %c5 = arith.constant 5 : index
    %c0_76 = arith.constant 0 : index
    %95 = vector.load %arg3[%c5, %c0_76] : memref<16x128xf32, #tpu.memory_space<vmem>>, vector<1x128xf32>
    %96 = vector.broadcast %95 : vector<1x128xf32> to vector<8x128xf32>
    %97 = arith.addf %94, %96 : vector<8x128xf32>
    %c6 = arith.constant 6 : index
    %c0_77 = arith.constant 0 : index
    %98 = vector.load %arg3[%c6, %c0_77] : memref<16x128xf32, #tpu.memory_space<vmem>>, vector<1x128xf32>
    %c7 = arith.constant 7 : index
    %c0_78 = arith.constant 0 : index
    %99 = vector.load %arg3[%c7, %c0_78] : memref<16x128xf32, #tpu.memory_space<vmem>>, vector<1x128xf32>
    %cst_79 = arith.constant dense<0.000000e+00> : vector<8xf32>
    %100 = vector.multi_reduction <add>, %97, %cst_79 [1] : vector<8x128xf32> to vector<8xf32>
    %101 = vector.shape_cast %100 : vector<8xf32> to vector<8x1xf32>
    %cst_80 = arith.constant 1.280000e+02 : f32
    %102 = vector.broadcast %cst_80 : f32 to vector<8x1xf32>
    %103 = arith.divf %101, %102 : vector<8x1xf32>
    %104 = vector.broadcast %103 : vector<8x1xf32> to vector<8x128xf32>
    %105 = arith.subf %97, %104 : vector<8x128xf32>
    %106 = arith.mulf %105, %105 : vector<8x128xf32>
    %cst_81 = arith.constant dense<0.000000e+00> : vector<8xf32>
    %107 = vector.multi_reduction <add>, %106, %cst_81 [1] : vector<8x128xf32> to vector<8xf32>
    %108 = vector.shape_cast %107 : vector<8xf32> to vector<8x1xf32>
    %cst_82 = arith.constant 1.280000e+02 : f32
    %109 = vector.broadcast %cst_82 : f32 to vector<8x1xf32>
    %110 = arith.divf %108, %109 : vector<8x1xf32>
    %111 = vector.broadcast %103 : vector<8x1xf32> to vector<8x128xf32>
    %112 = arith.subf %97, %111 : vector<8x128xf32>
    %cst_83 = arith.constant 9.99999974E-6 : f32
    %113 = vector.broadcast %cst_83 : f32 to vector<8x1xf32>
    %114 = arith.addf %110, %113 : vector<8x1xf32>
    %115 = math.rsqrt %114 : vector<8x1xf32>
    %116 = vector.broadcast %115 : vector<8x1xf32> to vector<8x128xf32>
    %117 = arith.mulf %112, %116 : vector<8x128xf32>
    %118 = vector.broadcast %98 : vector<1x128xf32> to vector<8x128xf32>
    %119 = arith.mulf %117, %118 : vector<8x128xf32>
    %120 = vector.broadcast %99 : vector<1x128xf32> to vector<8x128xf32>
    %121 = arith.addf %119, %120 : vector<8x128xf32>
    %122 = arith.truncf %121 : vector<8x128xf32> to vector<8x128xbf16>
    %c1_84 = arith.constant 1 : index
    %c0_85 = arith.constant 0 : index
    %c0_86 = arith.constant 0 : index
    %123 = vector.load %arg4[%c1_84, %c0_85, %c0_86] : memref<2x128x128xbf16, #tpu.memory_space<vmem>>, vector<1x128x128xbf16>
    %124 = vector.shape_cast %123 : vector<1x128x128xbf16> to vector<128x128xbf16>
    %cst_87 = arith.constant dense<0.000000e+00> : vector<8x128xf32>
    %125 = tpu.matmul %122, %124, %cst_87 {dimension_numbers = #tpu.dot_dimension_numbers<[1], [0], [0], [1], [0, 0, 1, 1], [], []>} : vector<8x128xbf16>, vector<128x128xbf16>, vector<8x128xf32> -> vector<8x128xf32>
    %c8 = arith.constant 8 : index
    %c0_88 = arith.constant 0 : index
    %126 = vector.load %arg3[%c8, %c0_88] : memref<16x128xf32, #tpu.memory_space<vmem>>, vector<1x128xf32>
    %127 = vector.broadcast %126 : vector<1x128xf32> to vector<8x128xf32>
    %128 = arith.addf %125, %127 : vector<8x128xf32>
    %129 = arith.addf %121, %128 : vector<8x128xf32>
    %c9 = arith.constant 9 : index
    %c0_89 = arith.constant 0 : index
    %130 = vector.load %arg3[%c9, %c0_89] : memref<16x128xf32, #tpu.memory_space<vmem>>, vector<1x128xf32>
    %c10 = arith.constant 10 : index
    %c0_90 = arith.constant 0 : index
    %131 = vector.load %arg3[%c10, %c0_90] : memref<16x128xf32, #tpu.memory_space<vmem>>, vector<1x128xf32>
    %cst_91 = arith.constant dense<0.000000e+00> : vector<8xf32>
    %132 = vector.multi_reduction <add>, %129, %cst_91 [1] : vector<8x128xf32> to vector<8xf32>
    %133 = vector.shape_cast %132 : vector<8xf32> to vector<8x1xf32>
    %cst_92 = arith.constant 1.280000e+02 : f32
    %134 = vector.broadcast %cst_92 : f32 to vector<8x1xf32>
    %135 = arith.divf %133, %134 : vector<8x1xf32>
    %136 = vector.broadcast %135 : vector<8x1xf32> to vector<8x128xf32>
    %137 = arith.subf %129, %136 : vector<8x128xf32>
    %138 = arith.mulf %137, %137 : vector<8x128xf32>
    %cst_93 = arith.constant dense<0.000000e+00> : vector<8xf32>
    %139 = vector.multi_reduction <add>, %138, %cst_93 [1] : vector<8x128xf32> to vector<8xf32>
    %140 = vector.shape_cast %139 : vector<8xf32> to vector<8x1xf32>
    %cst_94 = arith.constant 1.280000e+02 : f32
    %141 = vector.broadcast %cst_94 : f32 to vector<8x1xf32>
    %142 = arith.divf %140, %141 : vector<8x1xf32>
    %143 = vector.broadcast %135 : vector<8x1xf32> to vector<8x128xf32>
    %144 = arith.subf %129, %143 : vector<8x128xf32>
    %cst_95 = arith.constant 9.99999974E-6 : f32
    %145 = vector.broadcast %cst_95 : f32 to vector<8x1xf32>
    %146 = arith.addf %142, %145 : vector<8x1xf32>
    %147 = math.rsqrt %146 : vector<8x1xf32>
    %148 = vector.broadcast %147 : vector<8x1xf32> to vector<8x128xf32>
    %149 = arith.mulf %144, %148 : vector<8x128xf32>
    %150 = vector.broadcast %130 : vector<1x128xf32> to vector<8x128xf32>
    %151 = arith.mulf %149, %150 : vector<8x128xf32>
    %152 = vector.broadcast %131 : vector<1x128xf32> to vector<8x128xf32>
    %153 = arith.addf %151, %152 : vector<8x128xf32>
    %154 = arith.truncf %153 : vector<8x128xf32> to vector<8x128xbf16>
    %c1_96 = arith.constant 1 : index
    %c0_97 = arith.constant 0 : index
    %c0_98 = arith.constant 0 : index
    %c0_99 = arith.constant 0 : index
    %155 = vector.load %arg5[%c1_96, %c0_97, %c0_98, %c0_99] : memref<2x4x128x512xbf16, #tpu.memory_space<vmem>>, vector<1x1x128x512xbf16>
    %156 = vector.shape_cast %155 : vector<1x1x128x512xbf16> to vector<128x512xbf16>
    %cst_100 = arith.constant dense<0.000000e+00> : vector<8x512xf32>
    %157 = tpu.matmul %154, %156, %cst_100 {dimension_numbers = #tpu.dot_dimension_numbers<[1], [0], [0], [1], [0, 0, 1, 1], [], []>} : vector<8x128xbf16>, vector<128x512xbf16>, vector<8x512xf32> -> vector<8x512xf32>
    %c1_101 = arith.constant 1 : index
    %c0_102 = arith.constant 0 : index
    %c0_103 = arith.constant 0 : index
    %c0_104 = arith.constant 0 : index
    %158 = vector.load %arg6[%c1_101, %c0_102, %c0_103, %c0_104] : memref<2x4x1x512xf32, #tpu.memory_space<vmem>>, vector<1x1x1x512xf32>
    %159 = vector.shape_cast %158 : vector<1x1x1x512xf32> to vector<1x512xf32>
    %160 = vector.broadcast %159 : vector<1x512xf32> to vector<8x512xf32>
    %161 = arith.addf %157, %160 : vector<8x512xf32>
    %cst_105 = arith.constant 0.000000e+00 : f32
    %162 = vector.broadcast %cst_105 : f32 to vector<8x512xf32>
    %163 = arith.maximumf %161, %162 : vector<8x512xf32>
    %164 = arith.truncf %163 : vector<8x512xf32> to vector<8x512xbf16>
    %c1_106 = arith.constant 1 : index
    %c0_107 = arith.constant 0 : index
    %c0_108 = arith.constant 0 : index
    %c0_109 = arith.constant 0 : index
    %165 = vector.load %arg7[%c1_106, %c0_107, %c0_108, %c0_109] : memref<2x4x512x128xbf16, #tpu.memory_space<vmem>>, vector<1x1x512x128xbf16>
    %166 = vector.shape_cast %165 : vector<1x1x512x128xbf16> to vector<512x128xbf16>
    %cst_110 = arith.constant dense<0.000000e+00> : vector<8x128xf32>
    %167 = tpu.matmul %164, %166, %cst_110 {dimension_numbers = #tpu.dot_dimension_numbers<[1], [0], [0], [1], [0, 0, 1, 1], [], []>} : vector<8x512xbf16>, vector<512x128xbf16>, vector<8x128xf32> -> vector<8x128xf32>
    %c1_111 = arith.constant 1 : index
    %c1_112 = arith.constant 1 : index
    %c0_113 = arith.constant 0 : index
    %c0_114 = arith.constant 0 : index
    %168 = vector.load %arg5[%c1_111, %c1_112, %c0_113, %c0_114] : memref<2x4x128x512xbf16, #tpu.memory_space<vmem>>, vector<1x1x128x512xbf16>
    %169 = vector.shape_cast %168 : vector<1x1x128x512xbf16> to vector<128x512xbf16>
    %cst_115 = arith.constant dense<0.000000e+00> : vector<8x512xf32>
    %170 = tpu.matmul %154, %169, %cst_115 {dimension_numbers = #tpu.dot_dimension_numbers<[1], [0], [0], [1], [0, 0, 1, 1], [], []>} : vector<8x128xbf16>, vector<128x512xbf16>, vector<8x512xf32> -> vector<8x512xf32>
    %c1_116 = arith.constant 1 : index
    %c1_117 = arith.constant 1 : index
    %c0_118 = arith.constant 0 : index
    %c0_119 = arith.constant 0 : index
    %171 = vector.load %arg6[%c1_116, %c1_117, %c0_118, %c0_119] : memref<2x4x1x512xf32, #tpu.memory_space<vmem>>, vector<1x1x1x512xf32>
    %172 = vector.shape_cast %171 : vector<1x1x1x512xf32> to vector<1x512xf32>
    %173 = vector.broadcast %172 : vector<1x512xf32> to vector<8x512xf32>
    %174 = arith.addf %170, %173 : vector<8x512xf32>
    %cst_120 = arith.constant 0.000000e+00 : f32
    %175 = vector.broadcast %cst_120 : f32 to vector<8x512xf32>
    %176 = arith.maximumf %174, %175 : vector<8x512xf32>
    %177 = arith.truncf %176 : vector<8x512xf32> to vector<8x512xbf16>
    %c1_121 = arith.constant 1 : index
    %c1_122 = arith.constant 1 : index
    %c0_123 = arith.constant 0 : index
    %c0_124 = arith.constant 0 : index
    %178 = vector.load %arg7[%c1_121, %c1_122, %c0_123, %c0_124] : memref<2x4x512x128xbf16, #tpu.memory_space<vmem>>, vector<1x1x512x128xbf16>
    %179 = vector.shape_cast %178 : vector<1x1x512x128xbf16> to vector<512x128xbf16>
    %cst_125 = arith.constant dense<0.000000e+00> : vector<8x128xf32>
    %180 = tpu.matmul %177, %179, %cst_125 {dimension_numbers = #tpu.dot_dimension_numbers<[1], [0], [0], [1], [0, 0, 1, 1], [], []>} : vector<8x512xbf16>, vector<512x128xbf16>, vector<8x128xf32> -> vector<8x128xf32>
    %181 = arith.addf %167, %180 : vector<8x128xf32>
    %c1_126 = arith.constant 1 : index
    %c2_127 = arith.constant 2 : index
    %c0_128 = arith.constant 0 : index
    %c0_129 = arith.constant 0 : index
    %182 = vector.load %arg5[%c1_126, %c2_127, %c0_128, %c0_129] : memref<2x4x128x512xbf16, #tpu.memory_space<vmem>>, vector<1x1x128x512xbf16>
    %183 = vector.shape_cast %182 : vector<1x1x128x512xbf16> to vector<128x512xbf16>
    %cst_130 = arith.constant dense<0.000000e+00> : vector<8x512xf32>
    %184 = tpu.matmul %154, %183, %cst_130 {dimension_numbers = #tpu.dot_dimension_numbers<[1], [0], [0], [1], [0, 0, 1, 1], [], []>} : vector<8x128xbf16>, vector<128x512xbf16>, vector<8x512xf32> -> vector<8x512xf32>
    %c1_131 = arith.constant 1 : index
    %c2_132 = arith.constant 2 : index
    %c0_133 = arith.constant 0 : index
    %c0_134 = arith.constant 0 : index
    %185 = vector.load %arg6[%c1_131, %c2_132, %c0_133, %c0_134] : memref<2x4x1x512xf32, #tpu.memory_space<vmem>>, vector<1x1x1x512xf32>
    %186 = vector.shape_cast %185 : vector<1x1x1x512xf32> to vector<1x512xf32>
    %187 = vector.broadcast %186 : vector<1x512xf32> to vector<8x512xf32>
    %188 = arith.addf %184, %187 : vector<8x512xf32>
    %cst_135 = arith.constant 0.000000e+00 : f32
    %189 = vector.broadcast %cst_135 : f32 to vector<8x512xf32>
    %190 = arith.maximumf %188, %189 : vector<8x512xf32>
    %191 = arith.truncf %190 : vector<8x512xf32> to vector<8x512xbf16>
    %c1_136 = arith.constant 1 : index
    %c2_137 = arith.constant 2 : index
    %c0_138 = arith.constant 0 : index
    %c0_139 = arith.constant 0 : index
    %192 = vector.load %arg7[%c1_136, %c2_137, %c0_138, %c0_139] : memref<2x4x512x128xbf16, #tpu.memory_space<vmem>>, vector<1x1x512x128xbf16>
    %193 = vector.shape_cast %192 : vector<1x1x512x128xbf16> to vector<512x128xbf16>
    %cst_140 = arith.constant dense<0.000000e+00> : vector<8x128xf32>
    %194 = tpu.matmul %191, %193, %cst_140 {dimension_numbers = #tpu.dot_dimension_numbers<[1], [0], [0], [1], [0, 0, 1, 1], [], []>} : vector<8x512xbf16>, vector<512x128xbf16>, vector<8x128xf32> -> vector<8x128xf32>
    %195 = arith.addf %181, %194 : vector<8x128xf32>
    %c1_141 = arith.constant 1 : index
    %c3_142 = arith.constant 3 : index
    %c0_143 = arith.constant 0 : index
    %c0_144 = arith.constant 0 : index
    %196 = vector.load %arg5[%c1_141, %c3_142, %c0_143, %c0_144] : memref<2x4x128x512xbf16, #tpu.memory_space<vmem>>, vector<1x1x128x512xbf16>
    %197 = vector.shape_cast %196 : vector<1x1x128x512xbf16> to vector<128x512xbf16>
    %cst_145 = arith.constant dense<0.000000e+00> : vector<8x512xf32>
    %198 = tpu.matmul %154, %197, %cst_145 {dimension_numbers = #tpu.dot_dimension_numbers<[1], [0], [0], [1], [0, 0, 1, 1], [], []>} : vector<8x128xbf16>, vector<128x512xbf16>, vector<8x512xf32> -> vector<8x512xf32>
    %c1_146 = arith.constant 1 : index
    %c3_147 = arith.constant 3 : index
    %c0_148 = arith.constant 0 : index
    %c0_149 = arith.constant 0 : index
    %199 = vector.load %arg6[%c1_146, %c3_147, %c0_148, %c0_149] : memref<2x4x1x512xf32, #tpu.memory_space<vmem>>, vector<1x1x1x512xf32>
    %200 = vector.shape_cast %199 : vector<1x1x1x512xf32> to vector<1x512xf32>
    %201 = vector.broadcast %200 : vector<1x512xf32> to vector<8x512xf32>
    %202 = arith.addf %198, %201 : vector<8x512xf32>
    %cst_150 = arith.constant 0.000000e+00 : f32
    %203 = vector.broadcast %cst_150 : f32 to vector<8x512xf32>
    %204 = arith.maximumf %202, %203 : vector<8x512xf32>
    %205 = arith.truncf %204 : vector<8x512xf32> to vector<8x512xbf16>
    %c1_151 = arith.constant 1 : index
    %c3_152 = arith.constant 3 : index
    %c0_153 = arith.constant 0 : index
    %c0_154 = arith.constant 0 : index
    %206 = vector.load %arg7[%c1_151, %c3_152, %c0_153, %c0_154] : memref<2x4x512x128xbf16, #tpu.memory_space<vmem>>, vector<1x1x512x128xbf16>
    %207 = vector.shape_cast %206 : vector<1x1x512x128xbf16> to vector<512x128xbf16>
    %cst_155 = arith.constant dense<0.000000e+00> : vector<8x128xf32>
    %208 = tpu.matmul %205, %207, %cst_155 {dimension_numbers = #tpu.dot_dimension_numbers<[1], [0], [0], [1], [0, 0, 1, 1], [], []>} : vector<8x512xbf16>, vector<512x128xbf16>, vector<8x128xf32> -> vector<8x128xf32>
    %209 = arith.addf %195, %208 : vector<8x128xf32>
    %210 = arith.addf %153, %209 : vector<8x128xf32>
    %c11 = arith.constant 11 : index
    %c0_156 = arith.constant 0 : index
    %211 = vector.load %arg3[%c11, %c0_156] : memref<16x128xf32, #tpu.memory_space<vmem>>, vector<1x128xf32>
    %212 = vector.broadcast %211 : vector<1x128xf32> to vector<8x128xf32>
    %213 = arith.addf %210, %212 : vector<8x128xf32>
    %c12 = arith.constant 12 : index
    %c0_157 = arith.constant 0 : index
    %214 = vector.load %arg3[%c12, %c0_157] : memref<16x128xf32, #tpu.memory_space<vmem>>, vector<1x128xf32>
    %c13 = arith.constant 13 : index
    %c0_158 = arith.constant 0 : index
    %215 = vector.load %arg3[%c13, %c0_158] : memref<16x128xf32, #tpu.memory_space<vmem>>, vector<1x128xf32>
    %cst_159 = arith.constant dense<0.000000e+00> : vector<8xf32>
    %216 = vector.multi_reduction <add>, %213, %cst_159 [1] : vector<8x128xf32> to vector<8xf32>
    %217 = vector.shape_cast %216 : vector<8xf32> to vector<8x1xf32>
    %cst_160 = arith.constant 1.280000e+02 : f32
    %218 = vector.broadcast %cst_160 : f32 to vector<8x1xf32>
    %219 = arith.divf %217, %218 : vector<8x1xf32>
    %220 = vector.broadcast %219 : vector<8x1xf32> to vector<8x128xf32>
    %221 = arith.subf %213, %220 : vector<8x128xf32>
    %222 = arith.mulf %221, %221 : vector<8x128xf32>
    %cst_161 = arith.constant dense<0.000000e+00> : vector<8xf32>
    %223 = vector.multi_reduction <add>, %222, %cst_161 [1] : vector<8x128xf32> to vector<8xf32>
    %224 = vector.shape_cast %223 : vector<8xf32> to vector<8x1xf32>
    %cst_162 = arith.constant 1.280000e+02 : f32
    %225 = vector.broadcast %cst_162 : f32 to vector<8x1xf32>
    %226 = arith.divf %224, %225 : vector<8x1xf32>
    %227 = vector.broadcast %219 : vector<8x1xf32> to vector<8x128xf32>
    %228 = arith.subf %213, %227 : vector<8x128xf32>
    %cst_163 = arith.constant 9.99999974E-6 : f32
    %229 = vector.broadcast %cst_163 : f32 to vector<8x1xf32>
    %230 = arith.addf %226, %229 : vector<8x1xf32>
    %231 = math.rsqrt %230 : vector<8x1xf32>
    %232 = vector.broadcast %231 : vector<8x1xf32> to vector<8x128xf32>
    %233 = arith.mulf %228, %232 : vector<8x128xf32>
    %234 = vector.broadcast %214 : vector<1x128xf32> to vector<8x128xf32>
    %235 = arith.mulf %233, %234 : vector<8x128xf32>
    %236 = vector.broadcast %215 : vector<1x128xf32> to vector<8x128xf32>
    %237 = arith.addf %235, %236 : vector<8x128xf32>
    %cst_164 = arith.constant dense<0.000000e+00> : vector<8xf32>
    %238 = vector.multi_reduction <add>, %237, %cst_164 [1] : vector<8x128xf32> to vector<8xf32>
    %239 = vector.shape_cast %238 : vector<8xf32> to vector<8x1xf32>
    %cst_165 = arith.constant 1.280000e+02 : f32
    %240 = vector.broadcast %cst_165 : f32 to vector<8x1xf32>
    %241 = arith.divf %239, %240 : vector<8x1xf32>
    %242 = vector.broadcast %241 : vector<8x1xf32> to vector<8x128xf32>
    %243 = arith.subf %237, %242 : vector<8x128xf32>
    %244 = arith.mulf %243, %243 : vector<8x128xf32>
    %cst_166 = arith.constant dense<0.000000e+00> : vector<8xf32>
    %245 = vector.multi_reduction <add>, %244, %cst_166 [1] : vector<8x128xf32> to vector<8xf32>
    %246 = vector.shape_cast %245 : vector<8xf32> to vector<8x1xf32>
    %cst_167 = arith.constant 1.280000e+02 : f32
    %247 = vector.broadcast %cst_167 : f32 to vector<8x1xf32>
    %248 = arith.divf %246, %247 : vector<8x1xf32>
    %249 = vector.broadcast %241 : vector<8x1xf32> to vector<8x128xf32>
    %250 = arith.subf %237, %249 : vector<8x128xf32>
    %cst_168 = arith.constant 9.99999974E-6 : f32
    %251 = vector.broadcast %cst_168 : f32 to vector<8x1xf32>
    %252 = arith.addf %248, %251 : vector<8x1xf32>
    %253 = math.rsqrt %252 : vector<8x1xf32>
    %254 = vector.broadcast %253 : vector<8x1xf32> to vector<8x128xf32>
    %255 = arith.mulf %250, %254 : vector<8x128xf32>
    %c1_169 = arith.constant 1 : index
    %c0_170 = arith.constant 0 : index
    %256 = vector.load %arg3[%c1_169, %c0_170] : memref<16x128xf32, #tpu.memory_space<vmem>>, vector<1x128xf32>
    %257 = vector.broadcast %256 : vector<1x128xf32> to vector<8x128xf32>
    %258 = arith.mulf %255, %257 : vector<8x128xf32>
    %cst_171 = arith.constant dense<0.000000e+00> : vector<8xf32>
    %259 = vector.multi_reduction <add>, %258, %cst_171 [1] : vector<8x128xf32> to vector<8xf32>
    %260 = vector.shape_cast %259 : vector<8xf32> to vector<8x1xf32>
    %c0_172 = arith.constant 0 : index
    %261 = memref.load %arg8[%c0_172] : memref<1xf32, #tpu.memory_space<smem>>
    %262 = vector.broadcast %261 : f32 to vector<8x1xf32>
    %263 = arith.addf %260, %262 : vector<8x1xf32>
    %c0_173 = arith.constant 0 : index
    %c0_174 = arith.constant 0 : index
    %264 = vector.load %arg9[%c0_173, %c0_174] : memref<8x1xf32, #tpu.memory_space<vmem>>, vector<8x1xf32>
    tpu.vector_store %arg9[%c0_173, %c0_174], %263 {strides = array<i32>} : memref<8x1xf32, #tpu.memory_space<vmem>>, vector<8x1xf32>,
    return
  }
  func.func @transform_0(%arg0: i32) -> (i32, i32) {
    %c0_i32 = arith.constant 0 : i32
    %c0_i32_0 = arith.constant 0 : i32
    return %arg0, %c0_i32 : i32, i32
  }
  func.func @transform_1(%arg0: i32) -> (i32, i32) {
    %c0_i32 = arith.constant 0 : i32
    %c0_i32_0 = arith.constant 0 : i32
    %c0_i32_1 = arith.constant 0 : i32
    return %c0_i32, %c0_i32_0 : i32, i32
  }
  func.func @transform_2(%arg0: i32) -> (i32, i32) {
    %c0_i32 = arith.constant 0 : i32
    %c0_i32_0 = arith.constant 0 : i32
    %c0_i32_1 = arith.constant 0 : i32
    return %c0_i32, %c0_i32_0 : i32, i32
  }
  func.func @transform_3(%arg0: i32) -> (i32, i32, i32) {
    %c0_i32 = arith.constant 0 : i32
    %c0_i32_0 = arith.constant 0 : i32
    %c0_i32_1 = arith.constant 0 : i32
    %c0_i32_2 = arith.constant 0 : i32
    return %c0_i32, %c0_i32_0, %c0_i32_1 : i32, i32, i32
  }
  func.func @transform_4(%arg0: i32) -> (i32, i32, i32, i32) {
    %c0_i32 = arith.constant 0 : i32
    %c0_i32_0 = arith.constant 0 : i32
    %c0_i32_1 = arith.constant 0 : i32
    %c0_i32_2 = arith.constant 0 : i32
    %c0_i32_3 = arith.constant 0 : i32
    return %c0_i32, %c0_i32_0, %c0_i32_1, %c0_i32_2 : i32, i32, i32, i32
  }
  func.func @transform_5(%arg0: i32) -> (i32, i32, i32, i32) {
    %c0_i32 = arith.constant 0 : i32
    %c0_i32_0 = arith.constant 0 : i32
    %c0_i32_1 = arith.constant 0 : i32
    %c0_i32_2 = arith.constant 0 : i32
    %c0_i32_3 = arith.constant 0 : i32
    return %c0_i32, %c0_i32_0, %c0_i32_1, %c0_i32_2 : i32, i32, i32, i32
  }
  func.func @transform_6(%arg0: i32) -> (i32, i32, i32, i32) {
    %c0_i32 = arith.constant 0 : i32
    %c0_i32_0 = arith.constant 0 : i32
    %c0_i32_1 = arith.constant 0 : i32
    %c0_i32_2 = arith.constant 0 : i32
    %c0_i32_3 = arith.constant 0 : i32
    return %c0_i32, %c0_i32_0, %c0_i32_1, %c0_i32_2 : i32, i32, i32, i32
  }
  func.func @transform_7(%arg0: i32) -> i32 {
    %c0_i32 = arith.constant 0 : i32
    %c0_i32_0 = arith.constant 0 : i32
    return %c0_i32 : i32
  }
  func.func @transform_8(%arg0: i32) -> (i32, i32) {
    %c0_i32 = arith.constant 0 : i32
    %c0_i32_0 = arith.constant 0 : i32
    return %arg0, %c0_i32 : i32, i32
  }
}

</mosaic_0001>

<bundles_post_ra>
// kernel: small_transformer_forward.1
= control target key start
LH: loop header
LB: loop body
LE: loop exit
PB: predicated region body
PF: predicated region fallthrough
CT: control target
= control target key end

     0   :  { %14 = vsyncpa [#allocation4], 0  ;;  %s7681_s0 = inlined_call_operand.vmem [shape: f32[8,8], index: 0, kind: input, shape index: {}]   ;;  %s7682_s1 = inlined_call_operand.vmem [shape: f32[8,128], index: 1, kind: input, shape index: {}]   ;;  %s7683_s2 = inlined_call_operand.vmem [shape: f32[16,128], index: 2, kind: input, shape index: {}]   ;;  %s7684_s3 = inlined_call_operand.hbm [shape: bf16[2,128,128], index: 3, kind: input, shape index: {}]   ;;  %s7685_s4 = inlined_call_operand.hbm [shape: bf16[2,4,128,512], index: 4, kind: input, shape index: {}]   ;;  %s7686_s5 = inlined_call_operand.vmem [shape: f32[2,4,1,512], index: 5, kind: input, shape index: {}]   ;;  %s7687_s6 = inlined_call_operand.hbm [shape: bf16[2,4,512,128], index: 6, kind: input, shape index: {}]   ;;  %s7688_s7 = inlined_call_operand.<no memory space> [shape: f32[1], index: 7, kind: input, shape index: {}]   ;;  %s7689_s8 = inlined_call_operand.vmem [shape: f32[8,1], index: 8, kind: output, shape index: {}]  }
   0x1   :  { %15 = vsyncpa [#allocation6], 0  ;;  %s7373_s27 = smov [#allocation5]   ;;  %s7303_s9 = scalar_lea.hbm %s7685_s4, 32768 }
   0x2   :  { %s39_s28 = sshll.u32 %s7373_s27, 4  ;;  %p7304_p0 = scmp.ne.s32.totalorder %s7685_s4, %s7303_s9  ;;  %s40_s28 = int_to_ptr.vmem [resolvable:$true] %s39_s28 }
   0x3   :  { %p7307_p1 = scmp.lt.u32.totalorder %s7303_s9, %s7685_s4 }
   0x5   :  { %p7309_p2 = pnand %p7307_p1, %p7304_p0 }
   0x7   :  { %7312 = shalt.err (!%p7309_p2)
}
   0x8   :  { %s7313_s14 = scalar_lea.vmem %s40_s28, 32768  ;;  %p7318_p4 = scmp.lt.s32.totalorder %s40_s28, %s40_s28 }
   0x9   :  { %p7314_p3 = scmp.ne.s32.totalorder %s40_s28, %s7313_s14  ;;  %p7319_p5 = scmp.lt.s32.totalorder %s7313_s14, %s7313_s14 }
   0xb   :  { %p7320_p6 = por %p7319_p5, %p7318_p4 }
   0xd   :  { %p7321_p7 = pnand %p7320_p6, %p7314_p3 }
   0xf   :  { %7324 = shalt.err (!%p7321_p7)
}
  0x10   :  { %s7374_s15 = smov 256   ;;  %s7375_s16 = smov 16  }
  0x11   :  { %45 = dma.hbm_to_vmem [thread:$0]  %s7685_s4, 32768, %s40_s28, [#allocation6], %s7374_s15, %s7374_s15, %s7375_s16  }
  0x12   :  { %s7376_s19 = smov [#allocation3]   ;;  %s7325_s23 = scalar_lea.hbm %s7684_s3, 2048 }
  0x13   :  { %s27_s20 = sshll.u32 %s7376_s19, 4  ;;  %p7326_p8 = scmp.ne.s32.totalorder %s7684_s3, %s7325_s23  ;;  %s28_s20 = int_to_ptr.vmem [resolvable:$true] %s27_s20 }
  0x14   :  { %p7329_p9 = scmp.lt.u32.totalorder %s7325_s23, %s7684_s3 }
  0x16   :  { %p7331_p10 = pnand %p7329_p9, %p7326_p8 }
  0x18   :  { %7334 = shalt.err (!%p7331_p10)
}
  0x19   :  { %s7335_s29 = scalar_lea.vmem %s28_s20, 2048  ;;  %p7340_p12 = scmp.lt.s32.totalorder %s28_s20, %s28_s20 }
  0x1a   :  { %p7336_p11 = scmp.ne.s32.totalorder %s28_s20, %s7335_s29  ;;  %p7341_p13 = scmp.lt.s32.totalorder %s7335_s29, %s7335_s29 }
  0x1c   :  { %p7342_p0 = por %p7341_p13, %p7340_p12 }
  0x1e   :  { %p7343_p1 = pnand %p7342_p0, %p7336_p11 }
  0x20   :  { %7346 = shalt.err (!%p7343_p1)
}
  0x21   :  { %s7377_s4 = smov 64   ;;  %s7378_s28 = smov 4  }
  0x22   :  { %33 = dma.hbm_to_vmem [thread:$0]  %s7684_s3, 2048, %s28_s20, [#allocation4], %s7377_s4, %s7377_s4, %s7378_s28  }
  0x23   :  { %s7379_s10 = smov [#allocation7]   ;;  %s7347_s14 = scalar_lea.hbm %s7687_s6, 32768 }
  0x24   :  { %s53_s11 = sshll.u32 %s7379_s10, 4  ;;  %p7348_p2 = scmp.ne.s32.totalorder %s7687_s6, %s7347_s14  ;;  %s54_s11 = int_to_ptr.vmem [resolvable:$true] %s53_s11 }
  0x25   :  { %p7351_p3 = scmp.lt.u32.totalorder %s7347_s14, %s7687_s6 }
  0x27   :  { %p7353_p4 = pnand %p7351_p3, %p7348_p2 }
  0x29   :  { %7356 = shalt.err (!%p7353_p4)
}
  0x2a   :  { %s7357_s19 = scalar_lea.vmem %s54_s11, 32768  ;;  %p7362_p6 = scmp.lt.s32.totalorder %s54_s11, %s54_s11 }
  0x2b   :  { %p7358_p5 = scmp.ne.s32.totalorder %s54_s11, %s7357_s19  ;;  %p7363_p7 = scmp.lt.s32.totalorder %s7357_s19, %s7357_s19 }
  0x2d   :  { %p7364_p8 = por %p7363_p7, %p7362_p6 }
  0x2f   :  { %p7365_p9 = pnand %p7364_p8, %p7358_p5 }
  0x31   :  { %7368 = shalt.err (!%p7365_p9)
}
  0x32   :  { %59 = dma.hbm_to_vmem [thread:$0]  %s7687_s6, 32768, %s54_s11, [#allocation6], %s7377_s4, %s7377_s4, %s7378_s28  }
  0x33   :  { %7369 = dma.done.wait [#allocation4], 2048  }
  0x34   :  { %7370 = vsyncadd [#allocation4], 4294965248 }
  0x35   :  { %7371 = dma.done.wait [#allocation6], 65536  }
  0x36   :  { %7372 = vsyncadd [#allocation6], 4294901760  ;;  %v7380_v0 = vmov 0.0   ;;  %vm7381_vm0 = vmmov 0   ;;  %vm79_vm1 = vcmask 64512   ;;  %v73_v1 = vld [vmem:[%s7682_s1] sm:$0xff] }
  0x37   :  { %6582 = vmatprep.subr.mxu0 %v7380_v0  ;;  %6584 = vmatprep.mubr.msk.f32.mxu0 %vm7381_vm0, %v7380_v0  ;;  %v72_v2 = vld [vmem:[%s7681_s0] sm:$0xff]  ;;  %v6638_v4 = vld [vmem:[#allocation3 + $0x8] sm:$0xff]   ;;  %v6639_v5 = vld [vmem:[#allocation3 + $0x10] sm:$0xff]   ;;  %v7382_v61 = vmov 0   ;;  %vm5652_vm2 = vcmask 7168  }
  0x38   :  { %6587 = vmatprep.subr.bf16.mxu1 %v7380_v0  ;;  %6603 = vmatprep.mubr.msk.bf16.mxu1 %vm7381_vm0, %v7380_v0  ;;  %v6637_v3 = vld [vmem:[#allocation3] sm:$0xff]   ;;  %v6640_v6 = vld [vmem:[#allocation3 + $0x18] sm:$0xff]   ;;  %v6642_v8 = vld [vmem:[#allocation3 + $0x28] sm:$0xff]  }
  0x39   :  { %6583 = vmatpush3.msra.mxu0 %v73_v1  ;;  %6588 = vmatpush3.bf16.msra.mxu1 %v6637_v3  ;;  %v6641_v7 = vld [vmem:[#allocation3 + $0x20] sm:$0xff]   ;;  %v6643_v9 = vld [vmem:[#allocation3 + $0x30] sm:$0xff]   ;;  %v6644_v10 = vld [vmem:[#allocation3 + $0x38] sm:$0xff]  }
  0x3a   :  { %6585 = vmatmul.mubr.msk.f32.vlgmr.msra.gmra.mrb[0].mxu0 %vm79_vm1, %v72_v2  ;;  %6589 = vmatprep.subr.bf16.mxu1 %v7380_v0  ;;  %v5660_v11 = vld [vmem:[%s7683_s2] ss:$0 sm:$0xff]  ;;  %v5662_v16 = vld [vmem:[%s7683_s2 + $0x2] ss:$0 sm:$0xff]  ;;  %v6647_v24 = vld [vmem:[#allocation5 + $0x4] ss:$16 sps:$4 sm:$0xff]  }
  0x3b   :  { %v6645_v23 = vld [vmem:[#allocation5] ss:$16 sps:$4 sm:$0xff]   ;;  %v6648_v25 = vld [vmem:[#allocation5 + $0x8] ss:$16 sps:$4 sm:$0xff]   ;;  %v6650_v26 = vld [vmem:[#allocation5 + $0xc] ss:$16 sps:$4 sm:$0xff]   ;;  %503 = vmatprep.subr.bf16.mxu0 %v6647_v24  ;;  %535 = vmatprep.mubr.bf16.mxu0 %v7382_v61 }
  0x3c   :  { %v6653_v27 = vld [vmem:[#allocation5 + $0x24] ss:$16 sps:$4 sm:$0xff]   ;;  %v6656_v28 = vld [vmem:[#allocation5 + $0x2c] ss:$16 sps:$4 sm:$0xff]   ;;  %504 = vmatpush1.bf16.msra.mxu0 %v6645_v23  ;;  %v6651_v29 = vld [vmem:[#allocation5 + $0x20] ss:$16 sps:$4 sm:$0xff]  }
  0x3d   :  { %6590 = vmatpush3.bf16.msra.mxu1 %v6638_v4  ;;  %505 = vmatprep.subr.bf16.mxu0 %v6653_v27  ;;  %v6654_v30 = vld [vmem:[#allocation5 + $0x28] ss:$16 sps:$4 sm:$0xff]   ;;  %v6659_v31 = vld [vmem:[#allocation5 + $0x44] ss:$16 sps:$4 sm:$0xff]   ;;  %v6662_v32 = vld [vmem:[#allocation5 + $0x4c] ss:$16 sps:$4 sm:$0xff]  }
  0x3e   :  { %6591 = vmatprep.subr.bf16.mxu1 %v7380_v0  ;;  %v6657_v33 = vld [vmem:[#allocation5 + $0x40] ss:$16 sps:$4 sm:$0xff]   ;;  %v6660_v34 = vld [vmem:[#allocation5 + $0x48] ss:$16 sps:$4 sm:$0xff]   ;;  %v6665_v39 = vld [vmem:[#allocation5 + $0x64] ss:$16 sps:$4 sm:$0xff]  }
  0x3f   :  { %v6668_v40 = vld [vmem:[#allocation5 + $0x6c] ss:$16 sps:$4 sm:$0xff]   ;;  %v6663_v41 = vld [vmem:[#allocation5 + $0x60] ss:$16 sps:$4 sm:$0xff]   ;;  %v6666_v42 = vld [vmem:[#allocation5 + $0x68] ss:$16 sps:$4 sm:$0xff]  }
  0x40   :  { %506 = vmatpush1.bf16.msra.mxu0 %v6651_v29  ;;  %v6671_v43 = vld [vmem:[#allocation5 + $0x84] ss:$16 sps:$4 sm:$0xff]   ;;  %v6674_v44 = vld [vmem:[#allocation5 + $0x8c] ss:$16 sps:$4 sm:$0xff]   ;;  %v6669_v45 = vld [vmem:[#allocation5 + $0x80] ss:$16 sps:$4 sm:$0xff]  }
  0x41   :  { %6592 = vmatpush3.bf16.msra.mxu1 %v6639_v5  ;;  %507 = vmatprep.subr.bf16.mxu0 %v6659_v31  ;;  %v6672_v46 = vld [vmem:[#allocation5 + $0x88] ss:$16 sps:$4 sm:$0xff]   ;;  %v6677_v47 = vld [vmem:[#allocation5 + $0xa4] ss:$16 sps:$4 sm:$0xff]   ;;  %v6680_v48 = vld [vmem:[#allocation5 + $0xac] ss:$16 sps:$4 sm:$0xff]  }
  0x42   :  { %6593 = vmatprep.subr.bf16.mxu1 %v7380_v0  ;;  %v6675_v49 = vld [vmem:[#allocation5 + $0xa0] ss:$16 sps:$4 sm:$0xff]   ;;  %v6678_v50 = vld [vmem:[#allocation5 + $0xa8] ss:$16 sps:$4 sm:$0xff]   ;;  %v6683_v51 = vld [vmem:[#allocation5 + $0xc4] ss:$16 sps:$4 sm:$0xff]  }
  0x43   :  { %v6686_v52 = vld [vmem:[#allocation5 + $0xcc] ss:$16 sps:$4 sm:$0xff]   ;;  %v6681_v53 = vld [vmem:[#allocation5 + $0xc0] ss:$16 sps:$4 sm:$0xff]   ;;  %v6684_v54 = vld [vmem:[#allocation5 + $0xc8] ss:$16 sps:$4 sm:$0xff]  }
  0x44   :  { %508 = vmatpush1.bf16.msra.mxu0 %v6657_v33  ;;  %v6689_v55 = vld [vmem:[#allocation5 + $0xe4] ss:$16 sps:$4 sm:$0xff]   ;;  %v6692_v56 = vld [vmem:[#allocation5 + $0xec] ss:$16 sps:$4 sm:$0xff]   ;;  %v6687_v57 = vld [vmem:[#allocation5 + $0xe0] ss:$16 sps:$4 sm:$0xff]  }
  0x45   :  { %6594 = vmatpush3.bf16.msra.mxu1 %v6640_v6  ;;  %509 = vmatprep.subr.bf16.mxu0 %v6665_v39  ;;  %v6690_v58 = vld [vmem:[#allocation5 + $0xe8] ss:$16 sps:$4 sm:$0xff]   ;;  %v6695_v59 = vld [vmem:[#allocation5 + $0x104] ss:$16 sps:$4 sm:$0xff]   ;;  %v6698_v60 = vld [vmem:[#allocation5 + $0x10c] ss:$16 sps:$4 sm:$0xff]  }
  0x46   :  { %6595 = vmatprep.subr.bf16.mxu1 %v7380_v0  ;;  %v5671_v3 = vld [vmem:[%s7683_s2 + $0x3] ss:$0 sm:$0xff]  ;;  %v5672_v5 = vld [vmem:[%s7683_s2 + $0x4] ss:$0 sm:$0xff]  ;;  %v6722_v24 = vld [vmem:[#allocation5 + $0x18c] ss:$16 sps:$4 sm:$0xff]  }
  0x47   :  { %v6719_v23 = vld [vmem:[#allocation5 + $0x184] ss:$16 sps:$4 sm:$0xff]   ;;  %v6723_v29 = vld [vmem:[#allocation5 + $0x1a0] ss:$16 sps:$4 sm:$0xff]  }
  0x48   :  { %510 = vmatpush1.bf16.msra.mxu0 %v6663_v41  ;;  %v6725_v27 = vld [vmem:[#allocation5 + $0x1a4] ss:$16 sps:$4 sm:$0xff]   ;;  %v6729_v33 = vld [vmem:[#allocation5 + $0x1c0] ss:$16 sps:$4 sm:$0xff]  }
  0x49   :  { %6596 = vmatpush3.bf16.msra.mxu1 %v6641_v7  ;;  %511 = vmatprep.subr.bf16.mxu0 %v6671_v43  ;;  %v6731_v31 = vld [vmem:[#allocation5 + $0x1c4] ss:$16 sps:$4 sm:$0xff]   ;;  %v6745_v43 = vld [vmem:[#allocation7 + $0x148] sm:$0xff]  }
  0x4a   :  { %6597 = vmatprep.subr.bf16.mxu1 %v7380_v0  ;;  %v6741_v39 = vld [vmem:[#allocation7 + $0x140] sm:$0xff]  }
  0x4b   :  { %v6743_v41 = vld [vmem:[#allocation7 + $0x100] sm:$0xff]  }
  0x4c   :  { %512 = vmatpush1.bf16.msra.mxu0 %v6669_v45  ;;  %v6747_v45 = vld [vmem:[#allocation7 + $0x108] sm:$0xff]  }
  0x4d   :  { %6598 = vmatpush3.bf16.msra.mxu1 %v6642_v8  ;;  %513 = vmatprep.subr.bf16.mxu0 %v6677_v47  ;;  %v6693_v8 = vld [vmem:[#allocation5 + $0x100] ss:$16 sps:$4 sm:$0xff]  }
  0x4e   :  { %6599 = vmatprep.subr.bf16.mxu1 %v7380_v0  ;;  %v6749_v47 = vld [vmem:[#allocation7 + $0x150] sm:$0xff]  }
  0x50   :  { %514 = vmatpush1.bf16.msra.mxu0 %v6675_v49  ;;  %v6751_v49 = vld [vmem:[#allocation7 + $0x110] sm:$0xff]  }
  0x51   :  { %6600 = vmatpush3.bf16.msra.mxu1 %v6643_v9  ;;  %515 = vmatprep.subr.bf16.mxu0 %v6683_v51  ;;  %v6696_v9 = vld [vmem:[#allocation5 + $0x108] ss:$16 sps:$4 sm:$0xff]  }
  0x52   :  { %6601 = vmatprep.subr.bf16.mxu1 %v7380_v0  ;;  %v6753_v51 = vld [vmem:[#allocation7 + $0x158] sm:$0xff]  }
  0x54   :  { %516 = vmatpush1.bf16.msra.mxu0 %v6681_v53  ;;  %v6755_v53 = vld [vmem:[#allocation7 + $0x118] sm:$0xff]  }
  0x55   :  { %6602 = vmatpush3.bf16.msra.mxu1 %v6644_v10  ;;  %517 = vmatprep.subr.bf16.mxu0 %v6689_v55  ;;  %v6757_v55 = vld [vmem:[#allocation7 + $0x160] sm:$0xff]  }
  0x56   :  { %544 = vmatprep.subr.bf16.mxu1 %v6650_v26  ;;  %v6720_v26 = vld [vmem:[#allocation5 + $0x188] ss:$16 sps:$4 sm:$0xff]  }
  0x58   :  { %518 = vmatpush1.bf16.msra.mxu0 %v6687_v57  ;;  %v6759_v57 = vld [vmem:[#allocation7 + $0x120] sm:$0xff]  }
  0x59   :  { %873 = vmatprep.subr.bf16.mxu0 %v6695_v59  ;;  %v6761_v59 = vld [vmem:[#allocation7 + $0x168] sm:$0xff]  }
 0x10d   :  { %v149_v12 = vpop.f32.mrb[0].mxu0 }
 0x10e   :  { %v150_v13 = vadd.f32 %v5660_v11, %v149_v12  ;;  %v6586_v14 = vpop.f32.mrb[1].mxu0  ;;  %v6701_v11 = vld [vmem:[#allocation5 + $0x124] ss:$16 sps:$4 sm:$0xff]   ;;  %v6704_v12 = vld [vmem:[#allocation5 + $0x12c] ss:$16 sps:$4 sm:$0xff]  }
 0x10f   :  { %v6702_v14 = vld [vmem:[#allocation5 + $0x128] ss:$16 sps:$4 sm:$0xff]  }
 0x110   :  { %v153_v15 = vpack.c.bf16 %v150_v13, %v150_v13 }
 0x112   :  { %6604 = vmatmul.mubr.bf16.vlgmr.msra.gmra.mrb[0].mxu1 %v153_v15  ;;  %v6707_v15 = vld [vmem:[#allocation5 + $0x144] ss:$16 sps:$4 sm:$0xff]  }
 0x113   :  { %545 = vmatpush1.bf16.msra.mxu1 %v6648_v25  ;;  %576 = vmatprep.mubr.bf16.mxu1 %v7382_v61  ;;  %v6717_v25 = vld [vmem:[#allocation5 + $0x180] ss:$16 sps:$4 sm:$0xff]  }
 0x114   :  { %546 = vmatprep.subr.bf16.mxu1 %v6656_v28  ;;  %v6728_v28 = vld [vmem:[#allocation5 + $0x1ac] ss:$16 sps:$4 sm:$0xff]  }
 0x117   :  { %547 = vmatpush1.bf16.msra.mxu1 %v6654_v30  ;;  %v6726_v30 = vld [vmem:[#allocation5 + $0x1a8] ss:$16 sps:$4 sm:$0xff]  }
 0x118   :  { %548 = vmatprep.subr.bf16.mxu1 %v6662_v32  ;;  %v6734_v32 = vld [vmem:[#allocation5 + $0x1cc] ss:$16 sps:$4 sm:$0xff]  }
 0x11b   :  { %549 = vmatpush1.bf16.msra.mxu1 %v6660_v34  ;;  %v6732_v34 = vld [vmem:[#allocation5 + $0x1c8] ss:$16 sps:$4 sm:$0xff]  }
 0x11c   :  { %550 = vmatprep.subr.bf16.mxu1 %v6668_v40  ;;  %v6742_v40 = vld [vmem:[#allocation7 + $0x1c0] sm:$0xff]  }
 0x11f   :  { %551 = vmatpush1.bf16.msra.mxu1 %v6666_v42  ;;  %v6744_v42 = vld [vmem:[#allocation7 + $0x180] sm:$0xff]  }
 0x120   :  { %552 = vmatprep.subr.bf16.mxu1 %v6674_v44  ;;  %v6746_v44 = vld [vmem:[#allocation7 + $0x1c8] sm:$0xff]  }
 0x123   :  { %553 = vmatpush1.bf16.msra.mxu1 %v6672_v46  ;;  %v6748_v46 = vld [vmem:[#allocation7 + $0x188] sm:$0xff]  }
 0x124   :  { %554 = vmatprep.subr.bf16.mxu1 %v6680_v48  ;;  %v6750_v48 = vld [vmem:[#allocation7 + $0x1d0] sm:$0xff]  }
 0x127   :  { %555 = vmatpush1.bf16.msra.mxu1 %v6678_v50  ;;  %v6752_v50 = vld [vmem:[#allocation7 + $0x190] sm:$0xff]  }
 0x128   :  { %556 = vmatprep.subr.bf16.mxu1 %v6686_v52  ;;  %v6754_v52 = vld [vmem:[#allocation7 + $0x1d8] sm:$0xff]  }
 0x12b   :  { %557 = vmatpush1.bf16.msra.mxu1 %v6684_v54  ;;  %v6756_v54 = vld [vmem:[#allocation7 + $0x198] sm:$0xff]  }
 0x12c   :  { %558 = vmatprep.subr.bf16.mxu1 %v6692_v56  ;;  %v6758_v56 = vld [vmem:[#allocation7 + $0x1e0] sm:$0xff]  }
 0x12f   :  { %559 = vmatpush1.bf16.msra.mxu1 %v6690_v58  ;;  %v6760_v58 = vld [vmem:[#allocation7 + $0x1a0] sm:$0xff]  }
 0x130   :  { %914 = vmatprep.subr.bf16.mxu1 %v6698_v60  ;;  %v6762_v60 = vld [vmem:[#allocation7 + $0x1e8] sm:$0xff]  }
 0x1e5   :  { %v257_v17 = vpop.f32.mrb[0].mxu1 }
 0x1e6   :  { %v258_v18 = vadd.f32 %v5662_v16, %v257_v17  ;;  %v6605_v19 = vpop.f32.mrb[1].mxu1  ;;  %v6710_v16 = vld [vmem:[#allocation5 + $0x14c] ss:$16 sps:$4 sm:$0xff]   ;;  %v6705_v17 = vld [vmem:[#allocation5 + $0x140] ss:$16 sps:$4 sm:$0xff]  }
 0x1e7   :  { %v260_v20 = vpop.f32.mrb[2].mxu1  ;;  %v6713_v19 = vld [vmem:[#allocation5 + $0x164] ss:$16 sps:$4 sm:$0xff]  }
 0x1e8   :  { %v6606_v21 = vpop.f32.mrb[3].mxu1  ;;  %v263_v22 = vadd.f32 %v258_v18, %v150_v13  ;;  %v6699_v13 = vld [vmem:[#allocation5 + $0x120] ss:$16 sps:$4 sm:$0xff]   ;;  %v6708_v18 = vld [vmem:[#allocation5 + $0x148] ss:$16 sps:$4 sm:$0xff]  }
 0x1e9   :  { %v6716_v20 = vld [vmem:[#allocation5 + $0x16c] ss:$16 sps:$4 sm:$0xff]   ;;  %v6711_v21 = vld [vmem:[#allocation5 + $0x160] ss:$16 sps:$4 sm:$0xff]  }
 0x1ea   :  { %266 = vadd.xlane.f32.xlu0 %v263_v22 }
 0x277   :  { %v267_v35 = vpop.xlane.xlu0 %266 }
 0x278   :  { %v269_v36 = vmul.f32 0.0078125, %v267_v35  ;;  %v6737_v35 = vld [vmem:[#allocation5 + $0x1e4] ss:$16 sps:$4 sm:$0xff]  }
 0x27a   :  { %v270_v37 = vsub.f32 %v263_v22, %v269_v36  ;;  %v6714_v22 = vld [vmem:[#allocation5 + $0x168] ss:$16 sps:$4 sm:$0xff]   ;;  %v6740_v36 = vld [vmem:[#allocation5 + $0x1ec] ss:$16 sps:$4 sm:$0xff]  }
 0x27c   :  { %v271_v38 = vmul.f32 %v270_v37, %v270_v37 }
 0x27e   :  { %272 = vadd.xlane.f32.xlu0 %v271_v38  ;;  %v6738_v38 = vld [vmem:[#allocation5 + $0x1e8] ss:$16 sps:$4 sm:$0xff]  }
 0x30b   :  { %v273_v62 = vpop.xlane.xlu0 %272 }
 0x30c   :  { %v274_v63 = vmul.f32 0.0078125, %v273_v62  ;;  %v6763_v62 = vld [vmem:[#allocation7 + $0x128] sm:$0xff]  }
 0x30e   :  { %v275_v1 = vadd.f32 1e-05, %v274_v63  ;;  %v6764_v63 = vld [vmem:[#allocation7 + $0x1a8] sm:$0xff]  }
 0x310   :  { %7293 = vrsqrt.f32 %v275_v1  ;;  %v6765_v1 = vld [vmem:[#allocation7 + $0x170] sm:$0xff]  }
 0x31a   :  { %v7294_v2 = vpop.eup %7293 }
 0x31b   :  { %v277_v4 = vmul.f32 %v7294_v2, %v270_v37  ;;  %v6735_v37 = vld [vmem:[#allocation5 + $0x1e0] ss:$16 sps:$4 sm:$0xff]  }
 0x31c   :  { %v6766_v2 = vld [vmem:[#allocation7 + $0x1f0] sm:$0xff]  }
 0x31d   :  { %v282_v6 = vmul.f32 %v5671_v3, %v277_v4  ;;  %v6767_v3 = vld [vmem:[#allocation7 + $0x130] sm:$0xff]  }
 0x31e   :  { %v6768_v4 = vld [vmem:[#allocation7 + $0x1b0] sm:$0xff]  }
 0x31f   :  { %v7497_v7 = vadd.f32 %v5672_v5, %v282_v6  ;;  %v6769_v5 = vld [vmem:[#allocation7 + $0x178] sm:$0xff]  }
 0x320   :  { %v6770_v6 = vld [vmem:[#allocation7 + $0x1f8] sm:$0xff]  }
 0x321   :  { %v7501_v10 = vpack.c.bf16 %v7497_v7, %v7497_v7 }
 0x323   :  { %536 = vmatmul.mubr.bf16.vlgmr.msra.gmra.mrb[4].mxu0 %v7501_v10  ;;  %577 = vmatmul.mubr.bf16.vlgmr.msra.gmra.mrb[4].mxu1 %v7501_v10 }
 0x324   :  { %874 = vmatpush1.bf16.msra.mxu0 %v6693_v8  ;;  %915 = vmatpush1.bf16.msra.mxu1 %v6696_v9  ;;  %v6771_v8 = vld [vmem:[#allocation7 + $0x138] sm:$0xff]  }
 0x325   :  { %875 = vmatprep.subr.bf16.mxu0 %v6701_v11  ;;  %916 = vmatprep.subr.bf16.mxu1 %v6704_v12  ;;  %v6772_v9 = vld [vmem:[#allocation7 + $0x1b8] sm:$0xff]   ;;  %v6773_v11 = vld [vmem:[#allocation7 + $0x40] sm:$0xff]  }
 0x326   :  { %905 = vmatprep.mubr.bf16.mxu0 %v7382_v61  ;;  %946 = vmatprep.mubr.bf16.mxu1 %v7382_v61  ;;  %v6774_v12 = vld [vmem:[#allocation7 + $0xc0] sm:$0xff]  }
 0x328   :  { %876 = vmatpush1.bf16.msra.mxu0 %v6699_v13  ;;  %917 = vmatpush1.bf16.msra.mxu1 %v6702_v14 }
 0x329   :  { %877 = vmatprep.subr.bf16.mxu0 %v6707_v15  ;;  %918 = vmatprep.subr.bf16.mxu1 %v6710_v16 }
 0x32c   :  { %878 = vmatpush1.bf16.msra.mxu0 %v6705_v17  ;;  %919 = vmatpush1.bf16.msra.mxu1 %v6708_v18 }
 0x32d   :  { %879 = vmatprep.subr.bf16.mxu0 %v6713_v19  ;;  %920 = vmatprep.subr.bf16.mxu1 %v6716_v20 }
 0x330   :  { %880 = vmatpush1.bf16.msra.mxu0 %v6711_v21  ;;  %921 = vmatpush1.bf16.msra.mxu1 %v6714_v22  ;;  %v323_v21 = vlaneseq }
 0x331   :  { %881 = vmatprep.subr.bf16.mxu0 %v6719_v23  ;;  %922 = vmatprep.subr.bf16.mxu1 %v6722_v24 }
 0x332   :  { %v324_v22 = vshrl.u32 %v323_v21, 7  ;;  %v6793_v21 = vld [vmem:[#allocation7 + $0x68] sm:$0xff]  }
 0x334   :  { %882 = vmatpush1.bf16.msra.mxu0 %v6717_v25  ;;  %923 = vmatpush1.bf16.msra.mxu1 %v6720_v26  ;;  %v7513_v23 = vsub.s32 1, %v324_v22  ;;  %v7515_v24 = vsub.s32 3, %v324_v22  ;;  %v7520_v25 = vld [vmem:[%s7686_s5] sm:$0xf]  ;;  %v5705_v26 = vld [vmem:[%s7686_s5 + $0x4] sm:$0xf] }
 0x335   :  { %883 = vmatprep.subr.bf16.mxu0 %v6725_v27  ;;  %924 = vmatprep.subr.bf16.mxu1 %v6728_v28  ;;  %v7525_v27 = vsub.s32 0, %v324_v22  ;;  %v7527_v28 = vsub.s32 2, %v324_v22  ;;  %v6794_v22 = vld [vmem:[#allocation7 + $0xe8] sm:$0xff]  }
 0x338   :  { %884 = vmatpush1.bf16.msra.mxu0 %v6723_v29  ;;  %925 = vmatpush1.bf16.msra.mxu1 %v6726_v30  ;;  %v330_v29 = vrot.slane %v7520_v25, %v7513_v23  ;;  %v338_v30 = vrot.slane %v7520_v25, %v7515_v24 }
 0x339   :  { %885 = vmatprep.subr.bf16.mxu0 %v6731_v31  ;;  %926 = vmatprep.subr.bf16.mxu1 %v6734_v32  ;;  %v696_v31 = vrot.slane %v5705_v26, %v7525_v27  ;;  %v704_v32 = vrot.slane %v5705_v26, %v7527_v28 }
 0x33c   :  { %886 = vmatpush1.bf16.msra.mxu0 %v6729_v33  ;;  %927 = vmatpush1.bf16.msra.mxu1 %v6732_v34  ;;  %v700_v33 = vrot.slane %v5705_v26, %v7513_v23  ;;  %v708_v34 = vrot.slane %v5705_v26, %v7515_v24  ;;  %v6795_v26 = vld [vmem:[#allocation7 + $0x28] sm:$0xff]  }
 0x33d   :  { %887 = vmatprep.subr.bf16.mxu0 %v6737_v35  ;;  %928 = vmatprep.subr.bf16.mxu1 %v6740_v36 }
 0x340   :  { %888 = vmatpush1.bf16.msra.mxu0 %v6735_v37  ;;  %929 = vmatpush1.bf16.msra.mxu1 %v6738_v38 }
 0x341   :  { %6221 = vmatprep.subr.bf16.mxu0 %v6741_v39  ;;  %6243 = vmatprep.subr.bf16.mxu1 %v6742_v40 }
 0x343   :  { %906 = vmatmul.mubr.bf16.vlgmr.msra.gmra.mrb[8].mxu0 %v7501_v10  ;;  %947 = vmatmul.mubr.bf16.vlgmr.msra.gmra.mrb[8].mxu1 %v7501_v10 }
 0x344   :  { %6222 = vmatpush3.bf16.msra.mxu0 %v6743_v41  ;;  %6244 = vmatpush3.bf16.msra.mxu1 %v6744_v42 }
 0x345   :  { %6223 = vmatprep.subr.bf16.mxu0 %v6745_v43  ;;  %6245 = vmatprep.subr.bf16.mxu1 %v6746_v44 }
 0x348   :  { %6224 = vmatpush3.bf16.msra.mxu0 %v6747_v45  ;;  %6246 = vmatpush3.bf16.msra.mxu1 %v6748_v46 }
 0x349   :  { %6225 = vmatprep.subr.bf16.mxu0 %v6749_v47  ;;  %6247 = vmatprep.subr.bf16.mxu1 %v6750_v48 }
 0x34c   :  { %6226 = vmatpush3.bf16.msra.mxu0 %v6751_v49  ;;  %6248 = vmatpush3.bf16.msra.mxu1 %v6752_v50 }
 0x34d   :  { %6227 = vmatprep.subr.bf16.mxu0 %v6753_v51  ;;  %6249 = vmatprep.subr.bf16.mxu1 %v6754_v52 }
 0x350   :  { %6228 = vmatpush3.bf16.msra.mxu0 %v6755_v53  ;;  %6250 = vmatpush3.bf16.msra.mxu1 %v6756_v54 }
 0x351   :  { %6229 = vmatprep.subr.bf16.mxu0 %v6757_v55  ;;  %6251 = vmatprep.subr.bf16.mxu1 %v6758_v56 }
 0x354   :  { %6230 = vmatpush3.bf16.msra.mxu0 %v6759_v57  ;;  %6252 = vmatpush3.bf16.msra.mxu1 %v6760_v58  ;;  %v6775_v57 = vld [vmem:[#allocation7] sm:$0xff]  }
 0x355   :  { %6231 = vmatprep.subr.bf16.mxu0 %v6761_v59  ;;  %6253 = vmatprep.subr.bf16.mxu1 %v6762_v60  ;;  %v6776_v58 = vld [vmem:[#allocation7 + $0x80] sm:$0xff]  }
 0x358   :  { %6232 = vmatpush3.bf16.msra.mxu0 %v6763_v62  ;;  %6254 = vmatpush3.bf16.msra.mxu1 %v6764_v63  ;;  %v6777_v62 = vld [vmem:[#allocation7 + $0x48] sm:$0xff]  }
 0x359   :  { %6233 = vmatprep.subr.bf16.mxu0 %v6765_v1  ;;  %6255 = vmatprep.subr.bf16.mxu1 %v6766_v2  ;;  %v6778_v63 = vld [vmem:[#allocation7 + $0xc8] sm:$0xff]  }
 0x35c   :  { %6234 = vmatpush3.bf16.msra.mxu0 %v6767_v3  ;;  %6256 = vmatpush3.bf16.msra.mxu1 %v6768_v4  ;;  %v6779_v3 = vld [vmem:[#allocation7 + $0x8] sm:$0xff]  }
 0x35d   :  { %6235 = vmatprep.subr.bf16.mxu0 %v6769_v5  ;;  %6257 = vmatprep.subr.bf16.mxu1 %v6770_v6  ;;  %v6780_v4 = vld [vmem:[#allocation7 + $0x88] sm:$0xff]   ;;  %v6781_v5 = vld [vmem:[#allocation7 + $0x50] sm:$0xff]  }
 0x35e   :  { %v6782_v6 = vld [vmem:[#allocation7 + $0xd0] sm:$0xff]  }
 0x360   :  { %6236 = vmatpush3.bf16.msra.mxu0 %v6771_v8  ;;  %6258 = vmatpush3.bf16.msra.mxu1 %v6772_v9  ;;  %v6783_v8 = vld [vmem:[#allocation7 + $0x10] sm:$0xff]  }
 0x361   :  { %6265 = vmatprep.subr.bf16.mxu0 %v6773_v11  ;;  %6287 = vmatprep.subr.bf16.mxu1 %v6774_v12  ;;  %v6784_v9 = vld [vmem:[#allocation7 + $0x90] sm:$0xff]   ;;  %v6785_v11 = vld [vmem:[#allocation7 + $0x58] sm:$0xff]  }
 0x362   :  { %v6786_v12 = vld [vmem:[#allocation7 + $0xd8] sm:$0xff]  }
 0x3f6   :  { %v7509_v13 = vpop.f32.mrb[4].mxu0  ;;  %v7511_v14 = vpop.f32.mrb[4].mxu1 }
 0x3f7   :  { %v539_v15 = vpop.f32.mrb[5].mxu0  ;;  %v580_v16 = vpop.f32.mrb[5].mxu1 }
 0x3f8   :  { %v541_v17 = vpop.f32.mrb[6].mxu0  ;;  %v582_v18 = vpop.f32.mrb[6].mxu1  ;;  %v540_v37 = vadd.f32 %v539_v15, %v330_v29  ;;  %v581_v38 = vadd.f32 %v580_v16, %v338_v30  ;;  %v6787_v15 = vld [vmem:[#allocation7 + $0x18] sm:$0xff]   ;;  %v6796_v29 = vld [vmem:[#allocation7 + $0xa8] sm:$0xff]   ;;  %v326_v30 = vrot.slane %v7520_v25, %v7525_v27 }
 0x3f9   :  { %v542_v19 = vpop.f32.mrb[7].mxu0  ;;  %v583_v20 = vpop.f32.mrb[7].mxu1  ;;  %v6788_v16 = vld [vmem:[#allocation7 + $0x98] sm:$0xff]   ;;  %v6789_v17 = vld [vmem:[#allocation7 + $0x60] sm:$0xff]  }
 0x3fa   :  { %v586_v53 = vmax.f32 %v540_v37, 0.0  ;;  %v588_v54 = vmax.f32 %v581_v38, 0.0  ;;  %v6790_v18 = vld [vmem:[#allocation7 + $0xe0] sm:$0xff]   ;;  %v6801_v38 = vld [vmem:[#allocation7 + $0x78] sm:$0xff]  }
 0x3fb   :  { %v6791_v19 = vld [vmem:[#allocation7 + $0x20] sm:$0xff]  }
 0x3fc   :  { %v590_v1 = vpack.c.bf16 %v586_v53, %v586_v53  ;;  %v592_v2 = vpack.c.bf16 %v588_v54, %v588_v54  ;;  %v6792_v20 = vld [vmem:[#allocation7 + $0xa0] sm:$0xff]   ;;  %v6820_v54 = vld [vmem:[#allocation5 + $0x248] ss:$16 sps:$4 sm:$0xff]  }
 0x3fd   :  { %v6817_v53 = vld [vmem:[#allocation5 + $0x240] ss:$16 sps:$4 sm:$0xff]  }
 0x416   :  { %v907_v35 = vpop.f32.mrb[8].mxu0  ;;  %v948_v36 = vpop.f32.mrb[8].mxu1 }
 0x417   :  { %v908_v39 = vadd.f32 %v907_v35, %v696_v31  ;;  %v949_v40 = vadd.f32 %v948_v36, %v704_v32  ;;  %v909_v41 = vpop.f32.mrb[9].mxu0  ;;  %v950_v42 = vpop.f32.mrb[9].mxu1  ;;  %v334_v31 = vrot.slane %v7520_v25, %v7527_v28  ;;  %v6797_v32 = vld [vmem:[#allocation7 + $0x70] sm:$0xff]   ;;  %v538_v36 = vadd.f32 %v7509_v13, %v326_v30  ;;  %v6804_v25 = vld [vmem:[#allocation7 + $0xb8] sm:$0xff]  }
 0x418   :  { %v910_v43 = vadd.f32 %v909_v41, %v700_v33  ;;  %v951_v44 = vadd.f32 %v950_v42, %v708_v34  ;;  %v911_v45 = vpop.f32.mrb[10].mxu0  ;;  %v952_v46 = vpop.f32.mrb[10].mxu1  ;;  %v6798_v33 = vld [vmem:[#allocation7 + $0xf0] sm:$0xff]   ;;  %v6808_v13 = vld [vmem:[#allocation5 + $0x208] ss:$16 sps:$4 sm:$0xff]  }
 0x419   :  { %v955_v47 = vmax.f32 %v908_v39, 0.0  ;;  %v957_v48 = vmax.f32 %v949_v40, 0.0  ;;  %v912_v49 = vpop.f32.mrb[11].mxu0  ;;  %v953_v50 = vpop.f32.mrb[11].mxu1  ;;  %v6799_v34 = vld [vmem:[#allocation7 + $0x30] sm:$0xff]   ;;  %v579_v37 = vadd.f32 %v7511_v14, %v334_v31  ;;  %v6802_v39 = vld [vmem:[#allocation7 + $0xf8] sm:$0xff]  }
 0x41a   :  { %v956_v51 = vmax.f32 %v910_v43, 0.0  ;;  %v958_v52 = vmax.f32 %v951_v44, 0.0  ;;  %v6800_v35 = vld [vmem:[#allocation7 + $0xb0] sm:$0xff]   ;;  %v6803_v40 = vld [vmem:[#allocation7 + $0x38] sm:$0xff]   ;;  %v585_v41 = vmax.f32 %v538_v36, 0.0 }
 0x41b   :  { %v959_v59 = vpack.c.bf16 %v955_v47, %v955_v47  ;;  %v961_v60 = vpack.c.bf16 %v957_v48, %v957_v48  ;;  %v587_v42 = vmax.f32 %v579_v37, 0.0  ;;  %v6807_v43 = vld [vmem:[#allocation5 + $0x204] ss:$16 sps:$4 sm:$0xff]   ;;  %v6810_v44 = vld [vmem:[#allocation5 + $0x20c] ss:$16 sps:$4 sm:$0xff]  }
 0x41c   :  { %v960_v55 = vpack.c.bf16 %v956_v51, %v956_v51  ;;  %v962_v56 = vpack.c.bf16 %v958_v52, %v958_v52  ;;  %v6805_v45 = vld [vmem:[#allocation5 + $0x200] ss:$16 sps:$4 sm:$0xff]   ;;  %v589_v46 = vpack.c.bf16 %v585_v41, %v585_v41  ;;  %v6813_v47 = vld [vmem:[#allocation5 + $0x224] ss:$16 sps:$4 sm:$0xff]   ;;  %v6816_v48 = vld [vmem:[#allocation5 + $0x22c] ss:$16 sps:$4 sm:$0xff]  }
 0x41d   :  { %v591_v14 = vpack.c.bf16 %v587_v42, %v587_v42  ;;  %v6811_v49 = vld [vmem:[#allocation5 + $0x220] ss:$16 sps:$4 sm:$0xff]   ;;  %v6814_v50 = vld [vmem:[#allocation5 + $0x228] ss:$16 sps:$4 sm:$0xff]   ;;  %v6819_v51 = vld [vmem:[#allocation5 + $0x244] ss:$16 sps:$4 sm:$0xff]  }
 0x41e   :  { %1252 = vmatprep.mubr.bf16.mxu0 %v960_v55  ;;  %1292 = vmatprep.mubr.bf16.mxu1 %v962_v56  ;;  %v6822_v52 = vld [vmem:[#allocation5 + $0x24c] ss:$16 sps:$4 sm:$0xff]   ;;  %v6825_v55 = vld [vmem:[#allocation5 + $0x264] ss:$16 sps:$4 sm:$0xff]  }
 0x41f   :  { %1253 = vmatmul.mubr.bf16.vlgmr.msra.gmra.mrb[12].mxu0 %v959_v59  ;;  %1293 = vmatmul.mubr.bf16.vlgmr.msra.gmra.mrb[12].mxu1 %v961_v60  ;;  %v6828_v56 = vld [vmem:[#allocation5 + $0x26c] ss:$16 sps:$4 sm:$0xff]   ;;  %v6831_v59 = vld [vmem:[#allocation5 + $0x284] ss:$16 sps:$4 sm:$0xff]  }
 0x420   :  { %6266 = vmatpush3.bf16.msra.mxu0 %v6775_v57  ;;  %6288 = vmatpush3.bf16.msra.mxu1 %v6776_v58  ;;  %v6823_v57 = vld [vmem:[#allocation5 + $0x260] ss:$16 sps:$4 sm:$0xff]   ;;  %v6826_v58 = vld [vmem:[#allocation5 + $0x268] ss:$16 sps:$4 sm:$0xff]   ;;  %v6834_v60 = vld [vmem:[#allocation5 + $0x28c] ss:$16 sps:$4 sm:$0xff]  }
 0x421   :  { %1524 = vmatprep.mubr.bf16.mxu0 %v590_v1  ;;  %1564 = vmatprep.mubr.bf16.mxu1 %v592_v2  ;;  %v6837_v1 = vld [vmem:[#allocation5 + $0x2a4] ss:$16 sps:$4 sm:$0xff]   ;;  %v6840_v2 = vld [vmem:[#allocation5 + $0x2ac] ss:$16 sps:$4 sm:$0xff]  }
 0x422   :  { %6267 = vmatprep.subr.bf16.mxu0 %v6777_v62  ;;  %6289 = vmatprep.subr.bf16.mxu1 %v6778_v63  ;;  %v6829_v62 = vld [vmem:[#allocation5 + $0x280] ss:$16 sps:$4 sm:$0xff]   ;;  %v6832_v63 = vld [vmem:[#allocation5 + $0x288] ss:$16 sps:$4 sm:$0xff]  }
 0x423   :  { %v6861_v30 = vld [vmem:[#allocation7 + $0x250] sm:$0xff]   ;;  %v6867_v36 = vld [vmem:[#allocation7 + $0x218] sm:$0xff]   ;;  %v6873_v41 = vld [vmem:[#allocation7 + $0x268] sm:$0xff]  }
 0x424   :  { %6268 = vmatpush3.bf16.msra.mxu0 %v6779_v3  ;;  %6290 = vmatpush3.bf16.msra.mxu1 %v6780_v4  ;;  %v6835_v3 = vld [vmem:[#allocation5 + $0x2a0] ss:$16 sps:$4 sm:$0xff]   ;;  %v6838_v4 = vld [vmem:[#allocation5 + $0x2a8] ss:$16 sps:$4 sm:$0xff]  }
 0x425   :  { %6269 = vmatprep.subr.bf16.mxu0 %v6781_v5  ;;  %6291 = vmatprep.subr.bf16.mxu1 %v6782_v6  ;;  %v6843_v5 = vld [vmem:[#allocation5 + $0x2c4] ss:$16 sps:$4 sm:$0xff]   ;;  %v6846_v6 = vld [vmem:[#allocation5 + $0x2cc] ss:$16 sps:$4 sm:$0xff]  }
 0x426   :  { %v6862_v31 = vld [vmem:[#allocation7 + $0x2d0] sm:$0xff]   ;;  %v6868_v37 = vld [vmem:[#allocation7 + $0x298] sm:$0xff]   ;;  %v6874_v42 = vld [vmem:[#allocation7 + $0x2e8] sm:$0xff]  }
 0x428   :  { %6270 = vmatpush3.bf16.msra.mxu0 %v6783_v8  ;;  %6292 = vmatpush3.bf16.msra.mxu1 %v6784_v9  ;;  %v6841_v8 = vld [vmem:[#allocation5 + $0x2c0] ss:$16 sps:$4 sm:$0xff]   ;;  %v6844_v9 = vld [vmem:[#allocation5 + $0x2c8] ss:$16 sps:$4 sm:$0xff]  }
 0x429   :  { %6271 = vmatprep.subr.bf16.mxu0 %v6785_v11  ;;  %6293 = vmatprep.subr.bf16.mxu1 %v6786_v12  ;;  %v6849_v11 = vld [vmem:[#allocation5 + $0x2e4] ss:$16 sps:$4 sm:$0xff]   ;;  %v6852_v12 = vld [vmem:[#allocation5 + $0x2ec] ss:$16 sps:$4 sm:$0xff]  }
 0x42c   :  { %6272 = vmatpush3.bf16.msra.mxu0 %v6787_v15  ;;  %6294 = vmatpush3.bf16.msra.mxu1 %v6788_v16  ;;  %v6847_v15 = vld [vmem:[#allocation5 + $0x2e0] ss:$16 sps:$4 sm:$0xff]   ;;  %v6850_v16 = vld [vmem:[#allocation5 + $0x2e8] ss:$16 sps:$4 sm:$0xff]  }
 0x42d   :  { %6273 = vmatprep.subr.bf16.mxu0 %v6789_v17  ;;  %6295 = vmatprep.subr.bf16.mxu1 %v6790_v18  ;;  %v6853_v17 = vld [vmem:[#allocation7 + $0x240] sm:$0xff]  }
 0x42e   :  { %v6854_v18 = vld [vmem:[#allocation7 + $0x2c0] sm:$0xff]  }
 0x430   :  { %6274 = vmatpush3.bf16.msra.mxu0 %v6791_v19  ;;  %6296 = vmatpush3.bf16.msra.mxu1 %v6792_v20  ;;  %v6855_v19 = vld [vmem:[#allocation7 + $0x200] sm:$0xff]  }
 0x431   :  { %6275 = vmatprep.subr.bf16.mxu0 %v6793_v21  ;;  %6297 = vmatprep.subr.bf16.mxu1 %v6794_v22  ;;  %v6856_v20 = vld [vmem:[#allocation7 + $0x280] sm:$0xff]   ;;  %v6857_v21 = vld [vmem:[#allocation7 + $0x248] sm:$0xff]  }
 0x432   :  { %v6858_v22 = vld [vmem:[#allocation7 + $0x2c8] sm:$0xff]  }
 0x434   :  { %6276 = vmatpush3.bf16.msra.mxu0 %v6795_v26  ;;  %6298 = vmatpush3.bf16.msra.mxu1 %v6796_v29  ;;  %v6859_v26 = vld [vmem:[#allocation7 + $0x208] sm:$0xff]  }
 0x435   :  { %6277 = vmatprep.subr.bf16.mxu0 %v6797_v32  ;;  %6299 = vmatprep.subr.bf16.mxu1 %v6798_v33  ;;  %v6860_v29 = vld [vmem:[#allocation7 + $0x288] sm:$0xff]   ;;  %v6863_v32 = vld [vmem:[#allocation7 + $0x210] sm:$0xff]  }
 0x436   :  { %v6864_v33 = vld [vmem:[#allocation7 + $0x290] sm:$0xff]  }
 0x438   :  { %6278 = vmatpush3.bf16.msra.mxu0 %v6799_v34  ;;  %6300 = vmatpush3.bf16.msra.mxu1 %v6800_v35  ;;  %v6865_v34 = vld [vmem:[#allocation7 + $0x258] sm:$0xff]  }
 0x439   :  { %6279 = vmatprep.subr.bf16.mxu0 %v6801_v38  ;;  %6301 = vmatprep.subr.bf16.mxu1 %v6802_v39  ;;  %v6866_v35 = vld [vmem:[#allocation7 + $0x2d8] sm:$0xff]   ;;  %v6869_v38 = vld [vmem:[#allocation7 + $0x260] sm:$0xff]  }
 0x43a   :  { %v6870_v39 = vld [vmem:[#allocation7 + $0x2e0] sm:$0xff]  }
 0x43c   :  { %6280 = vmatpush3.bf16.msra.mxu0 %v6803_v40  ;;  %6302 = vmatpush3.bf16.msra.mxu1 %v6804_v25  ;;  %v6871_v40 = vld [vmem:[#allocation7 + $0x220] sm:$0xff]  }
 0x43d   :  { %1788 = vmatprep.subr.bf16.mxu0 %v6807_v43  ;;  %1829 = vmatprep.subr.bf16.mxu1 %v6810_v44  ;;  %v6872_v25 = vld [vmem:[#allocation7 + $0x2a0] sm:$0xff]   ;;  %v6875_v43 = vld [vmem:[#allocation7 + $0x228] sm:$0xff]  }
 0x43e   :  { %v6876_v44 = vld [vmem:[#allocation7 + $0x2a8] sm:$0xff]  }
 0x43f   :  { %1525 = vmatmul.mubr.bf16.vlgmr.msra.gmra.mrb[16].mxu0 %v589_v46  ;;  %1565 = vmatmul.mubr.bf16.vlgmr.msra.gmra.mrb[16].mxu1 %v591_v14  ;;  %v6879_v46 = vld [vmem:[#allocation7 + $0x230] sm:$0xff]  }
 0x440   :  { %1789 = vmatpush1.bf16.msra.mxu0 %v6805_v45  ;;  %1830 = vmatpush1.bf16.msra.mxu1 %v6808_v13  ;;  %v6877_v45 = vld [vmem:[#allocation7 + $0x270] sm:$0xff]  }
 0x441   :  { %1790 = vmatprep.subr.bf16.mxu0 %v6813_v47  ;;  %1831 = vmatprep.subr.bf16.mxu1 %v6816_v48  ;;  %v6878_v13 = vld [vmem:[#allocation7 + $0x2f0] sm:$0xff]   ;;  %v6881_v47 = vld [vmem:[#allocation7 + $0x278] sm:$0xff]  }
 0x442   :  { %1820 = vmatprep.mubr.bf16.mxu0 %v7382_v61  ;;  %1861 = vmatprep.mubr.bf16.mxu1 %v7382_v61  ;;  %v6880_v14 = vld [vmem:[#allocation7 + $0x2b0] sm:$0xff]   ;;  %v6882_v48 = vld [vmem:[#allocation7 + $0x2f8] sm:$0xff]  }
 0x444   :  { %1791 = vmatpush1.bf16.msra.mxu0 %v6811_v49  ;;  %1832 = vmatpush1.bf16.msra.mxu1 %v6814_v50  ;;  %v6883_v49 = vld [vmem:[#allocation7 + $0x238] sm:$0xff]  }
 0x445   :  { %1792 = vmatprep.subr.bf16.mxu0 %v6819_v51  ;;  %1833 = vmatprep.subr.bf16.mxu1 %v6822_v52  ;;  %v6884_v50 = vld [vmem:[#allocation7 + $0x2b8] sm:$0xff]   ;;  %v6887_v51 = vld [vmem:[#allocation5 + $0x304] ss:$16 sps:$4 sm:$0xff]  }
 0x446   :  { %v6890_v52 = vld [vmem:[#allocation5 + $0x30c] ss:$16 sps:$4 sm:$0xff]  }
 0x448   :  { %1793 = vmatpush1.bf16.msra.mxu0 %v6817_v53  ;;  %1834 = vmatpush1.bf16.msra.mxu1 %v6820_v54 }
 0x449   :  { %1794 = vmatprep.subr.bf16.mxu0 %v6825_v55  ;;  %1835 = vmatprep.subr.bf16.mxu1 %v6828_v56 }
 0x44c   :  { %1795 = vmatpush1.bf16.msra.mxu0 %v6823_v57  ;;  %1836 = vmatpush1.bf16.msra.mxu1 %v6826_v58 }
 0x44d   :  { %1796 = vmatprep.subr.bf16.mxu0 %v6831_v59  ;;  %1837 = vmatprep.subr.bf16.mxu1 %v6834_v60 }
 0x450   :  { %1797 = vmatpush1.bf16.msra.mxu0 %v6829_v62  ;;  %1838 = vmatpush1.bf16.msra.mxu1 %v6832_v63 }
 0x451   :  { %1798 = vmatprep.subr.bf16.mxu0 %v6837_v1  ;;  %1839 = vmatprep.subr.bf16.mxu1 %v6840_v2 }
 0x454   :  { %1799 = vmatpush1.bf16.msra.mxu0 %v6835_v3  ;;  %1840 = vmatpush1.bf16.msra.mxu1 %v6838_v4 }
 0x455   :  { %1800 = vmatprep.subr.bf16.mxu0 %v6843_v5  ;;  %1841 = vmatprep.subr.bf16.mxu1 %v6846_v6 }
 0x458   :  { %1801 = vmatpush1.bf16.msra.mxu0 %v6841_v8  ;;  %1842 = vmatpush1.bf16.msra.mxu1 %v6844_v9 }
 0x459   :  { %1802 = vmatprep.subr.bf16.mxu0 %v6849_v11  ;;  %1843 = vmatprep.subr.bf16.mxu1 %v6852_v12 }
 0x45c   :  { %1803 = vmatpush1.bf16.msra.mxu0 %v6847_v15  ;;  %1844 = vmatpush1.bf16.msra.mxu1 %v6850_v16 }
 0x45d   :  { %6309 = vmatprep.subr.bf16.mxu0 %v6853_v17  ;;  %6331 = vmatprep.subr.bf16.mxu1 %v6854_v18  ;;  %v5802_v18 = vld [vmem:[%s7686_s5 + $0x8] sm:$0xf] }
 0x45f   :  { %1821 = vmatmul.mubr.bf16.vlgmr.msra.gmra.mrb[20].mxu0 %v7501_v10  ;;  %1862 = vmatmul.mubr.bf16.vlgmr.msra.gmra.mrb[20].mxu1 %v7501_v10 }
 0x460   :  { %6310 = vmatpush3.bf16.msra.mxu0 %v6855_v19  ;;  %6332 = vmatpush3.bf16.msra.mxu1 %v6856_v20  ;;  %v1611_v19 = vrot.slane %v5802_v18, %v7525_v27  ;;  %v1619_v20 = vrot.slane %v5802_v18, %v7527_v28 }
 0x461   :  { %6311 = vmatprep.subr.bf16.mxu0 %v6857_v21  ;;  %6333 = vmatprep.subr.bf16.mxu1 %v6858_v22  ;;  %v1615_v21 = vrot.slane %v5802_v18, %v7513_v23  ;;  %v1623_v22 = vrot.slane %v5802_v18, %v7515_v24  ;;  %v6933_v18 = vld [vmem:[#allocation7 + $0x340] sm:$0xff]  }
 0x464   :  { %6312 = vmatpush3.bf16.msra.mxu0 %v6859_v26  ;;  %6334 = vmatpush3.bf16.msra.mxu1 %v6860_v29 }
 0x465   :  { %6313 = vmatprep.subr.bf16.mxu0 %v6861_v30  ;;  %6335 = vmatprep.subr.bf16.mxu1 %v6862_v31 }
 0x468   :  { %6314 = vmatpush3.bf16.msra.mxu0 %v6863_v32  ;;  %6336 = vmatpush3.bf16.msra.mxu1 %v6864_v33 }
 0x469   :  { %6315 = vmatprep.subr.bf16.mxu0 %v6865_v34  ;;  %6337 = vmatprep.subr.bf16.mxu1 %v6866_v35 }
 0x46c   :  { %6316 = vmatpush3.bf16.msra.mxu0 %v6867_v36  ;;  %6338 = vmatpush3.bf16.msra.mxu1 %v6868_v37 }
 0x46d   :  { %6317 = vmatprep.subr.bf16.mxu0 %v6869_v38  ;;  %6339 = vmatprep.subr.bf16.mxu1 %v6870_v39 }
 0x470   :  { %6318 = vmatpush3.bf16.msra.mxu0 %v6871_v40  ;;  %6340 = vmatpush3.bf16.msra.mxu1 %v6872_v25 }
 0x471   :  { %6319 = vmatprep.subr.bf16.mxu0 %v6873_v41  ;;  %6341 = vmatprep.subr.bf16.mxu1 %v6874_v42 }
 0x474   :  { %6320 = vmatpush3.bf16.msra.mxu0 %v6875_v43  ;;  %6342 = vmatpush3.bf16.msra.mxu1 %v6876_v44 }
 0x475   :  { %6321 = vmatprep.subr.bf16.mxu0 %v6877_v45  ;;  %6343 = vmatprep.subr.bf16.mxu1 %v6878_v13  ;;  %v6885_v45 = vld [vmem:[#allocation5 + $0x300] ss:$16 sps:$4 sm:$0xff]   ;;  %v6888_v13 = vld [vmem:[#allocation5 + $0x308] ss:$16 sps:$4 sm:$0xff]  }
 0x478   :  { %6322 = vmatpush3.bf16.msra.mxu0 %v6879_v46  ;;  %6344 = vmatpush3.bf16.msra.mxu1 %v6880_v14 }
 0x479   :  { %6323 = vmatprep.subr.bf16.mxu0 %v6881_v47  ;;  %6345 = vmatprep.subr.bf16.mxu1 %v6882_v48  ;;  %v6893_v47 = vld [vmem:[#allocation5 + $0x324] ss:$16 sps:$4 sm:$0xff]   ;;  %v6896_v48 = vld [vmem:[#allocation5 + $0x32c] ss:$16 sps:$4 sm:$0xff]  }
 0x47c   :  { %6324 = vmatpush3.bf16.msra.mxu0 %v6883_v49  ;;  %6346 = vmatpush3.bf16.msra.mxu1 %v6884_v50  ;;  %v6891_v49 = vld [vmem:[#allocation5 + $0x320] ss:$16 sps:$4 sm:$0xff]   ;;  %v6894_v50 = vld [vmem:[#allocation5 + $0x328] ss:$16 sps:$4 sm:$0xff]  }
 0x47d   :  { %2432 = vmatprep.subr.bf16.mxu0 %v6887_v51  ;;  %2473 = vmatprep.subr.bf16.mxu1 %v6890_v52  ;;  %v6899_v51 = vld [vmem:[#allocation5 + $0x344] ss:$16 sps:$4 sm:$0xff]   ;;  %v6902_v52 = vld [vmem:[#allocation5 + $0x34c] ss:$16 sps:$4 sm:$0xff]  }
 0x4f2   :  { %v6237_v53 = vpop.f32.mrb[12].mxu0  ;;  %v6259_v54 = vpop.f32.mrb[12].mxu1 }
 0x4f3   :  { %v6238_v55 = vpop.f32.mrb[13].mxu0  ;;  %v6260_v56 = vpop.f32.mrb[13].mxu1 }
 0x4f4   :  { %v6239_v57 = vadd.f32 %v6238_v55, %v6237_v53  ;;  %v6261_v58 = vadd.f32 %v6260_v56, %v6259_v54  ;;  %v6240_v59 = vpop.f32.mrb[14].mxu0  ;;  %v6262_v60 = vpop.f32.mrb[14].mxu1  ;;  %v6897_v53 = vld [vmem:[#allocation5 + $0x340] ss:$16 sps:$4 sm:$0xff]   ;;  %v6900_v54 = vld [vmem:[#allocation5 + $0x348] ss:$16 sps:$4 sm:$0xff]  }
 0x4f5   :  { %v6241_v62 = vpop.f32.mrb[15].mxu0  ;;  %v6263_v63 = vpop.f32.mrb[15].mxu1  ;;  %v6905_v55 = vld [vmem:[#allocation5 + $0x364] ss:$16 sps:$4 sm:$0xff]   ;;  %v6908_v56 = vld [vmem:[#allocation5 + $0x36c] ss:$16 sps:$4 sm:$0xff]  }
 0x4f6   :  { %v1295_v1 = vadd.f32 %v6261_v58, %v6239_v57  ;;  %v6903_v57 = vld [vmem:[#allocation5 + $0x360] ss:$16 sps:$4 sm:$0xff]   ;;  %v6906_v58 = vld [vmem:[#allocation5 + $0x368] ss:$16 sps:$4 sm:$0xff]   ;;  %v6911_v59 = vld [vmem:[#allocation5 + $0x384] ss:$16 sps:$4 sm:$0xff]  }
 0x4f7   :  { %v6914_v60 = vld [vmem:[#allocation5 + $0x38c] ss:$16 sps:$4 sm:$0xff]   ;;  %v6909_v62 = vld [vmem:[#allocation5 + $0x380] ss:$16 sps:$4 sm:$0xff]   ;;  %v6912_v63 = vld [vmem:[#allocation5 + $0x388] ss:$16 sps:$4 sm:$0xff]  }
 0x512   :  { %v6281_v2 = vpop.f32.mrb[16].mxu0  ;;  %v6303_v3 = vpop.f32.mrb[16].mxu1 }
 0x513   :  { %v6282_v4 = vpop.f32.mrb[17].mxu0  ;;  %v6304_v5 = vpop.f32.mrb[17].mxu1 }
 0x514   :  { %v6283_v6 = vadd.f32 %v6282_v4, %v6281_v2  ;;  %v6305_v8 = vadd.f32 %v6304_v5, %v6303_v3  ;;  %v6284_v9 = vpop.f32.mrb[18].mxu0  ;;  %v6306_v11 = vpop.f32.mrb[18].mxu1  ;;  %v6920_v2 = vld [vmem:[#allocation5 + $0x3ac] ss:$16 sps:$4 sm:$0xff]   ;;  %v6915_v3 = vld [vmem:[#allocation5 + $0x3a0] ss:$16 sps:$4 sm:$0xff]  }
 0x515   :  { %v6285_v12 = vpop.f32.mrb[19].mxu0  ;;  %v6307_v15 = vpop.f32.mrb[19].mxu1  ;;  %v6918_v4 = vld [vmem:[#allocation5 + $0x3a8] ss:$16 sps:$4 sm:$0xff]   ;;  %v6923_v5 = vld [vmem:[#allocation5 + $0x3c4] ss:$16 sps:$4 sm:$0xff]  }
 0x516   :  { %v1527_v16 = vadd.f32 %v6283_v6, %v1295_v1  ;;  %v6917_v1 = vld [vmem:[#allocation5 + $0x3a4] ss:$16 sps:$4 sm:$0xff]   ;;  %v6926_v6 = vld [vmem:[#allocation5 + $0x3cc] ss:$16 sps:$4 sm:$0xff]   ;;  %v6924_v9 = vld [vmem:[#allocation5 + $0x3c8] ss:$16 sps:$4 sm:$0xff]  }
 0x517   :  { %v6929_v11 = vld [vmem:[#allocation5 + $0x3e4] ss:$16 sps:$4 sm:$0xff]   ;;  %v6932_v12 = vld [vmem:[#allocation5 + $0x3ec] ss:$16 sps:$4 sm:$0xff]   ;;  %v6927_v15 = vld [vmem:[#allocation5 + $0x3e0] ss:$16 sps:$4 sm:$0xff]  }
 0x518   :  { %v7547_v17 = vadd.f32 %v6305_v8, %v1527_v16  ;;  %v6921_v8 = vld [vmem:[#allocation5 + $0x3c0] ss:$16 sps:$4 sm:$0xff]   ;;  %v6930_v16 = vld [vmem:[#allocation5 + $0x3e8] ss:$16 sps:$4 sm:$0xff]  }
 0x532   :  { %v1822_v26 = vpop.f32.mrb[20].mxu0  ;;  %v1863_v29 = vpop.f32.mrb[20].mxu1 }
 0x533   :  { %v1823_v30 = vadd.f32 %v1822_v26, %v1611_v19  ;;  %v1864_v31 = vadd.f32 %v1863_v29, %v1619_v20  ;;  %v1824_v32 = vpop.f32.mrb[21].mxu0  ;;  %v1865_v33 = vpop.f32.mrb[21].mxu1  ;;  %v6934_v19 = vld [vmem:[#allocation7 + $0x3c0] sm:$0xff]   ;;  %v6938_v26 = vld [vmem:[#allocation7 + $0x3c8] sm:$0xff]  }
 0x534   :  { %v1825_v34 = vadd.f32 %v1824_v32, %v1615_v21  ;;  %v1866_v35 = vadd.f32 %v1865_v33, %v1623_v22  ;;  %v1826_v36 = vpop.f32.mrb[22].mxu0  ;;  %v1867_v37 = vpop.f32.mrb[22].mxu1  ;;  %v6935_v20 = vld [vmem:[#allocation7 + $0x300] sm:$0xff]   ;;  %v6937_v22 = vld [vmem:[#allocation7 + $0x348] sm:$0xff]   ;;  %v6942_v32 = vld [vmem:[#allocation7 + $0x3d0] sm:$0xff]  }
 0x535   :  { %v1870_v38 = vmax.f32 %v1823_v30, 0.0  ;;  %v1872_v39 = vmax.f32 %v1864_v31, 0.0  ;;  %v1827_v40 = vpop.f32.mrb[23].mxu0  ;;  %v1868_v25 = vpop.f32.mrb[23].mxu1  ;;  %v6936_v21 = vld [vmem:[#allocation7 + $0x380] sm:$0xff]   ;;  %v6939_v29 = vld [vmem:[#allocation7 + $0x308] sm:$0xff]  }
 0x536   :  { %v1871_v41 = vmax.f32 %v1825_v34, 0.0  ;;  %v1873_v42 = vmax.f32 %v1866_v35, 0.0  ;;  %v6940_v30 = vld [vmem:[#allocation7 + $0x388] sm:$0xff]   ;;  %v6941_v31 = vld [vmem:[#allocation7 + $0x350] sm:$0xff]   ;;  %v6945_v34 = vld [vmem:[#allocation7 + $0x358] sm:$0xff]  }
 0x537   :  { %v1874_v46 = vpack.c.bf16 %v1870_v38, %v1870_v38  ;;  %v1876_v14 = vpack.c.bf16 %v1872_v39, %v1872_v39  ;;  %v6943_v33 = vld [vmem:[#allocation7 + $0x310] sm:$0xff]   ;;  %v6946_v35 = vld [vmem:[#allocation7 + $0x3d8] sm:$0xff]   ;;  %v6949_v38 = vld [vmem:[#allocation7 + $0x360] sm:$0xff]  }
 0x538   :  { %v1875_v43 = vpack.c.bf16 %v1871_v41, %v1871_v41  ;;  %v1877_v44 = vpack.c.bf16 %v1873_v42, %v1873_v42  ;;  %v6947_v36 = vld [vmem:[#allocation7 + $0x318] sm:$0xff]   ;;  %v6950_v39 = vld [vmem:[#allocation7 + $0x3e0] sm:$0xff]   ;;  %v6953_v41 = vld [vmem:[#allocation7 + $0x368] sm:$0xff]  }
 0x539   :  { %v6948_v37 = vld [vmem:[#allocation7 + $0x398] sm:$0xff]   ;;  %v6951_v40 = vld [vmem:[#allocation7 + $0x320] sm:$0xff]   ;;  %v6954_v42 = vld [vmem:[#allocation7 + $0x3e8] sm:$0xff]  }
 0x53a   :  { %2167 = vmatprep.mubr.bf16.mxu0 %v1875_v43  ;;  %2207 = vmatprep.mubr.bf16.mxu1 %v1877_v44  ;;  %v6952_v25 = vld [vmem:[#allocation7 + $0x3a0] sm:$0xff]   ;;  %v6955_v43 = vld [vmem:[#allocation7 + $0x328] sm:$0xff]  }
 0x53b   :  { %2168 = vmatmul.mubr.bf16.vlgmr.msra.gmra.mrb[24].mxu0 %v1874_v46  ;;  %2208 = vmatmul.mubr.bf16.vlgmr.msra.gmra.mrb[24].mxu1 %v1876_v14  ;;  %v6956_v44 = vld [vmem:[#allocation7 + $0x3a8] sm:$0xff]   ;;  %v6959_v46 = vld [vmem:[#allocation7 + $0x330] sm:$0xff]  }
 0x53c   :  { %2433 = vmatpush1.bf16.msra.mxu0 %v6885_v45  ;;  %2474 = vmatpush1.bf16.msra.mxu1 %v6888_v13  ;;  %v6957_v45 = vld [vmem:[#allocation7 + $0x370] sm:$0xff]  }
 0x53d   :  { %2434 = vmatprep.subr.bf16.mxu0 %v6893_v47  ;;  %2475 = vmatprep.subr.bf16.mxu1 %v6896_v48  ;;  %v6958_v13 = vld [vmem:[#allocation7 + $0x3f0] sm:$0xff]   ;;  %v6961_v47 = vld [vmem:[#allocation7 + $0x378] sm:$0xff]  }
 0x53e   :  { %2464 = vmatprep.mubr.bf16.mxu0 %v7382_v61  ;;  %2505 = vmatprep.mubr.bf16.mxu1 %v7382_v61  ;;  %v6960_v14 = vld [vmem:[#allocation7 + $0x3b0] sm:$0xff]   ;;  %v6962_v48 = vld [vmem:[#allocation7 + $0x3f8] sm:$0xff]  }
 0x540   :  { %2435 = vmatpush1.bf16.msra.mxu0 %v6891_v49  ;;  %2476 = vmatpush1.bf16.msra.mxu1 %v6894_v50  ;;  %v6963_v49 = vld [vmem:[#allocation7 + $0x338] sm:$0xff]  }
 0x541   :  { %2436 = vmatprep.subr.bf16.mxu0 %v6899_v51  ;;  %2477 = vmatprep.subr.bf16.mxu1 %v6902_v52  ;;  %v6964_v50 = vld [vmem:[#allocation7 + $0x3b8] sm:$0xff]  }
 0x544   :  { %2437 = vmatpush1.bf16.msra.mxu0 %v6897_v53  ;;  %2478 = vmatpush1.bf16.msra.mxu1 %v6900_v54 }
 0x545   :  { %2438 = vmatprep.subr.bf16.mxu0 %v6905_v55  ;;  %2479 = vmatprep.subr.bf16.mxu1 %v6908_v56 }
 0x548   :  { %2439 = vmatpush1.bf16.msra.mxu0 %v6903_v57  ;;  %2480 = vmatpush1.bf16.msra.mxu1 %v6906_v58 }
 0x549   :  { %2440 = vmatprep.subr.bf16.mxu0 %v6911_v59  ;;  %2481 = vmatprep.subr.bf16.mxu1 %v6914_v60 }
 0x54c   :  { %2441 = vmatpush1.bf16.msra.mxu0 %v6909_v62  ;;  %2482 = vmatpush1.bf16.msra.mxu1 %v6912_v63 }
 0x54d   :  { %2442 = vmatprep.subr.bf16.mxu0 %v6917_v1  ;;  %2483 = vmatprep.subr.bf16.mxu1 %v6920_v2  ;;  %v5867_v1 = vld [vmem:[%s7686_s5 + $0xc] sm:$0xf] }
 0x54e   :  { %v2255_v2 = vrot.slane %v5867_v1, %v7525_v27 }
 0x550   :  { %2443 = vmatpush1.bf16.msra.mxu0 %v6915_v3  ;;  %2484 = vmatpush1.bf16.msra.mxu1 %v6918_v4  ;;  %v2263_v3 = vrot.slane %v5867_v1, %v7527_v28  ;;  %v2259_v4 = vrot.slane %v5867_v1, %v7513_v23 }
 0x551   :  { %2444 = vmatprep.subr.bf16.mxu0 %v6923_v5  ;;  %2485 = vmatprep.subr.bf16.mxu1 %v6926_v6  ;;  %v2267_v5 = vrot.slane %v5867_v1, %v7515_v24  ;;  %v5934_v1 = vld [vmem:[%s7683_s2 + $0x7] ss:$0 sm:$0xff] }
 0x554   :  { %2445 = vmatpush1.bf16.msra.mxu0 %v6921_v8  ;;  %2486 = vmatpush1.bf16.msra.mxu1 %v6924_v9 }
 0x555   :  { %2446 = vmatprep.subr.bf16.mxu0 %v6929_v11  ;;  %2487 = vmatprep.subr.bf16.mxu1 %v6932_v12 }
 0x558   :  { %2447 = vmatpush1.bf16.msra.mxu0 %v6927_v15  ;;  %2488 = vmatpush1.bf16.msra.mxu1 %v6930_v16 }
 0x559   :  { %6353 = vmatprep.subr.bf16.mxu0 %v6933_v18  ;;  %6375 = vmatprep.subr.bf16.mxu1 %v6934_v19 }
 0x55b   :  { %2465 = vmatmul.mubr.bf16.vlgmr.msra.gmra.mrb[28].mxu0 %v7501_v10  ;;  %2506 = vmatmul.mubr.bf16.vlgmr.msra.gmra.mrb[28].mxu1 %v7501_v10  ;;  %v6944_v10 = vld [vmem:[#allocation7 + $0x390] sm:$0xff]  }
 0x55c   :  { %6354 = vmatpush3.bf16.msra.mxu0 %v6935_v20  ;;  %6376 = vmatpush3.bf16.msra.mxu1 %v6936_v21 }
 0x55d   :  { %6355 = vmatprep.subr.bf16.mxu0 %v6937_v22  ;;  %6377 = vmatprep.subr.bf16.mxu1 %v6938_v26 }
 0x560   :  { %6356 = vmatpush3.bf16.msra.mxu0 %v6939_v29  ;;  %6378 = vmatpush3.bf16.msra.mxu1 %v6940_v30 }
 0x561   :  { %6357 = vmatprep.subr.bf16.mxu0 %v6941_v31  ;;  %6379 = vmatprep.subr.bf16.mxu1 %v6942_v32 }
 0x564   :  { %6358 = vmatpush3.bf16.msra.mxu0 %v6943_v33  ;;  %6380 = vmatpush3.bf16.msra.mxu1 %v6944_v10 }
 0x565   :  { %6359 = vmatprep.subr.bf16.mxu0 %v6945_v34  ;;  %6381 = vmatprep.subr.bf16.mxu1 %v6946_v35 }
 0x568   :  { %6360 = vmatpush3.bf16.msra.mxu0 %v6947_v36  ;;  %6382 = vmatpush3.bf16.msra.mxu1 %v6948_v37 }
 0x569   :  { %6361 = vmatprep.subr.bf16.mxu0 %v6949_v38  ;;  %6383 = vmatprep.subr.bf16.mxu1 %v6950_v39 }
 0x56c   :  { %6362 = vmatpush3.bf16.msra.mxu0 %v6951_v40  ;;  %6384 = vmatpush3.bf16.msra.mxu1 %v6952_v25 }
 0x56d   :  { %6363 = vmatprep.subr.bf16.mxu0 %v6953_v41  ;;  %6385 = vmatprep.subr.bf16.mxu1 %v6954_v42 }
 0x570   :  { %6364 = vmatpush3.bf16.msra.mxu0 %v6955_v43  ;;  %6386 = vmatpush3.bf16.msra.mxu1 %v6956_v44 }
 0x571   :  { %6365 = vmatprep.subr.bf16.mxu0 %v6957_v45  ;;  %6387 = vmatprep.subr.bf16.mxu1 %v6958_v13  ;;  %v5932_v45 = vld [vmem:[%s7683_s2 + $0x5] ss:$0 sm:$0xff] }
 0x574   :  { %6366 = vmatpush3.bf16.msra.mxu0 %v6959_v46  ;;  %6388 = vmatpush3.bf16.msra.mxu1 %v6960_v14  ;;  %v6965_v14 = vld [vmem:[#allocation3 + $0x40] sm:$0xff]  }
 0x575   :  { %6367 = vmatprep.subr.bf16.mxu0 %v6961_v47  ;;  %6389 = vmatprep.subr.bf16.mxu1 %v6962_v48  ;;  %v6966_v47 = vld [vmem:[#allocation3 + $0x48] sm:$0xff]  }
 0x578   :  { %6368 = vmatpush3.bf16.msra.mxu0 %v6963_v49  ;;  %6390 = vmatpush3.bf16.msra.mxu1 %v6964_v50 }
 0x579   :  { %6607 = vmatprep.subr.bf16.mxu0 %v7380_v0 }
 0x60e   :  { %v6325_v51 = vpop.f32.mrb[24].mxu0  ;;  %v6347_v52 = vpop.f32.mrb[24].mxu1 }
 0x60f   :  { %v6326_v53 = vpop.f32.mrb[25].mxu0  ;;  %v6348_v54 = vpop.f32.mrb[25].mxu1 }
 0x610   :  { %v6327_v55 = vadd.f32 %v6326_v53, %v6325_v51  ;;  %v6349_v56 = vadd.f32 %v6348_v54, %v6347_v52  ;;  %v6328_v57 = vpop.f32.mrb[26].mxu0  ;;  %v6350_v58 = vpop.f32.mrb[26].mxu1  ;;  %v6967_v52 = vld [vmem:[#allocation3 + $0x50] sm:$0xff]   ;;  %v6969_v53 = vld [vmem:[#allocation3 + $0x60] sm:$0xff]   ;;  %v6970_v54 = vld [vmem:[#allocation3 + $0x68] sm:$0xff]  }
 0x611   :  { %v6329_v59 = vpop.f32.mrb[27].mxu0  ;;  %v6351_v60 = vpop.f32.mrb[27].mxu1 }
 0x612   :  { %v2210_v62 = vadd.f32 %v6349_v56, %v6327_v55  ;;  %v6971_v55 = vld [vmem:[#allocation3 + $0x70] sm:$0xff]   ;;  %v6972_v56 = vld [vmem:[#allocation3 + $0x78] sm:$0xff]  }
 0x614   :  { %v2215_v63 = vadd.f32 %v2210_v62, %v7547_v17  ;;  %v5933_v62 = vld [vmem:[%s7683_s2 + $0x6] ss:$0 sm:$0xff] }
 0x62e   :  { %v2466_v6 = vpop.f32.mrb[28].mxu0  ;;  %v2507_v8 = vpop.f32.mrb[28].mxu1 }
 0x62f   :  { %v2467_v9 = vadd.f32 %v2466_v6, %v2255_v2  ;;  %v2508_v11 = vadd.f32 %v2507_v8, %v2263_v3  ;;  %v2468_v12 = vpop.f32.mrb[29].mxu0  ;;  %v2509_v15 = vpop.f32.mrb[29].mxu1 }
 0x630   :  { %v2469_v16 = vadd.f32 %v2468_v12, %v2259_v4  ;;  %v2510_v17 = vadd.f32 %v2509_v15, %v2267_v5  ;;  %v2470_v18 = vpop.f32.mrb[30].mxu0  ;;  %v2511_v19 = vpop.f32.mrb[30].mxu1  ;;  %v6973_v15 = vld [vmem:[#allocation5 + $0x400] ss:$16 sps:$4 sm:$0xff]  }
 0x631   :  { %v2514_v20 = vmax.f32 %v2467_v9, 0.0  ;;  %v2516_v21 = vmax.f32 %v2508_v11, 0.0  ;;  %v2471_v22 = vpop.f32.mrb[31].mxu0  ;;  %v2512_v26 = vpop.f32.mrb[31].mxu1  ;;  %v6978_v18 = vld [vmem:[#allocation5 + $0x40c] ss:$16 sps:$4 sm:$0xff]  }
 0x632   :  { %v2515_v29 = vmax.f32 %v2469_v16, 0.0  ;;  %v2517_v30 = vmax.f32 %v2510_v17, 0.0  ;;  %v6975_v16 = vld [vmem:[#allocation5 + $0x404] ss:$16 sps:$4 sm:$0xff]   ;;  %v6976_v17 = vld [vmem:[#allocation5 + $0x408] ss:$16 sps:$4 sm:$0xff]  }
 0x633   :  { %v2518_v33 = vpack.c.bf16 %v2514_v20, %v2514_v20  ;;  %v2520_v10 = vpack.c.bf16 %v2516_v21, %v2516_v21  ;;  %v6981_v19 = vld [vmem:[#allocation5 + $0x424] ss:$16 sps:$4 sm:$0xff]   ;;  %3242 = vmatprep.subr.bf16.mxu1 %v6975_v16  ;;  %v6984_v20 = vld [vmem:[#allocation5 + $0x42c] ss:$16 sps:$4 sm:$0xff]   ;;  %v6979_v21 = vld [vmem:[#allocation5 + $0x420] ss:$16 sps:$4 sm:$0xff]  }
 0x634   :  { %v2519_v31 = vpack.c.bf16 %v2515_v29, %v2515_v29  ;;  %v2521_v32 = vpack.c.bf16 %v2517_v30, %v2517_v30  ;;  %v6982_v22 = vld [vmem:[#allocation5 + $0x428] ss:$16 sps:$4 sm:$0xff]   ;;  %v6987_v26 = vld [vmem:[#allocation5 + $0x444] ss:$16 sps:$4 sm:$0xff]   ;;  %v6990_v29 = vld [vmem:[#allocation5 + $0x44c] ss:$16 sps:$4 sm:$0xff]  }
 0x635   :  { %v6985_v30 = vld [vmem:[#allocation5 + $0x440] ss:$16 sps:$4 sm:$0xff]  }
 0x636   :  { %2811 = vmatprep.mubr.bf16.mxu0 %v2519_v31  ;;  %2851 = vmatprep.mubr.bf16.mxu1 %v2521_v32  ;;  %v6988_v31 = vld [vmem:[#allocation5 + $0x448] ss:$16 sps:$4 sm:$0xff]   ;;  %v7039_v16 = vld [vmem:[#allocation5 + $0x560] ss:$16 sps:$4 sm:$0xff]  }
 0x637   :  { %2812 = vmatmul.mubr.bf16.vlgmr.msra.gmra.mrb[32].mxu0 %v2518_v33  ;;  %2852 = vmatmul.mubr.bf16.vlgmr.msra.gmra.mrb[32].mxu1 %v2520_v10 }
 0x638   :  { %6623 = vmatprep.mubr.msk.bf16.mxu0 %vm7381_vm0, %v7380_v0  ;;  %3274 = vmatprep.mubr.bf16.mxu1 %v7382_v61 }
 0x639   :  { %6608 = vmatpush3.bf16.msra.mxu0 %v6965_v14  ;;  %3243 = vmatpush1.bf16.msra.mxu1 %v6973_v15  ;;  %v7009_v14 = vld [vmem:[#allocation5 + $0x4c0] ss:$16 sps:$4 sm:$0xff]   ;;  %v7044_v15 = vld [vmem:[#allocation5 + $0x56c] ss:$16 sps:$4 sm:$0xff]  }
 0x63a   :  { %6609 = vmatprep.subr.bf16.mxu0 %v7380_v0  ;;  %3244 = vmatprep.subr.bf16.mxu1 %v6981_v19  ;;  %v7050_v19 = vld [vmem:[#allocation5 + $0x58c] ss:$16 sps:$4 sm:$0xff]  }
 0x63d   :  { %6610 = vmatpush3.bf16.msra.mxu0 %v6966_v47  ;;  %3245 = vmatpush1.bf16.msra.mxu1 %v6979_v21  ;;  %v7012_v47 = vld [vmem:[#allocation5 + $0x4c8] ss:$16 sps:$4 sm:$0xff]  }
 0x63e   :  { %6611 = vmatprep.subr.bf16.mxu0 %v7380_v0  ;;  %3246 = vmatprep.subr.bf16.mxu1 %v6987_v26  ;;  %v7048_v21 = vld [vmem:[#allocation5 + $0x588] ss:$16 sps:$4 sm:$0xff]   ;;  %v7056_v26 = vld [vmem:[#allocation5 + $0x5ac] ss:$16 sps:$4 sm:$0xff]  }
 0x641   :  { %6612 = vmatpush3.bf16.msra.mxu0 %v6967_v52  ;;  %3247 = vmatpush1.bf16.msra.mxu1 %v6985_v30  ;;  %v7023_v52 = vld [vmem:[#allocation5 + $0x504] ss:$16 sps:$4 sm:$0xff]   ;;  %v7054_v30 = vld [vmem:[#allocation5 + $0x5a8] ss:$16 sps:$4 sm:$0xff]  }
 0x642   :  { %6613 = vmatprep.subr.bf16.mxu0 %v7380_v0 }
 0x70a   :  { %v6369_v34 = vpop.f32.mrb[32].mxu0  ;;  %v6391_v35 = vpop.f32.mrb[32].mxu1 }
 0x70b   :  { %v6370_v36 = vpop.f32.mrb[33].mxu0  ;;  %v6392_v37 = vpop.f32.mrb[33].mxu1 }
 0x70c   :  { %v6371_v38 = vadd.f32 %v6370_v36, %v6369_v34  ;;  %v6393_v39 = vadd.f32 %v6392_v37, %v6391_v35  ;;  %v6372_v40 = vpop.f32.mrb[34].mxu0  ;;  %v6394_v25 = vpop.f32.mrb[34].mxu1  ;;  %v6993_v35 = vld [vmem:[#allocation5 + $0x464] ss:$16 sps:$4 sm:$0xff]   ;;  %v6996_v36 = vld [vmem:[#allocation5 + $0x46c] ss:$16 sps:$4 sm:$0xff]  }
 0x70d   :  { %v6373_v41 = vpop.f32.mrb[35].mxu0  ;;  %v6395_v42 = vpop.f32.mrb[35].mxu1  ;;  %v6991_v37 = vld [vmem:[#allocation5 + $0x460] ss:$16 sps:$4 sm:$0xff]   ;;  %3248 = vmatprep.subr.bf16.mxu1 %v6993_v35  ;;  %v7002_v40 = vld [vmem:[#allocation5 + $0x48c] ss:$16 sps:$4 sm:$0xff]  }
 0x70e   :  { %v2854_v43 = vadd.f32 %v6393_v39, %v6371_v38  ;;  %v6994_v38 = vld [vmem:[#allocation5 + $0x468] ss:$16 sps:$4 sm:$0xff]   ;;  %3249 = vmatpush1.bf16.msra.mxu1 %v6991_v37  ;;  %v6999_v39 = vld [vmem:[#allocation5 + $0x484] ss:$16 sps:$4 sm:$0xff]   ;;  %v6997_v25 = vld [vmem:[#allocation5 + $0x480] ss:$16 sps:$4 sm:$0xff]  }
 0x70f   :  { %v7000_v41 = vld [vmem:[#allocation5 + $0x488] ss:$16 sps:$4 sm:$0xff]   ;;  %3250 = vmatprep.subr.bf16.mxu1 %v6999_v39  ;;  %v7005_v42 = vld [vmem:[#allocation5 + $0x4a4] ss:$16 sps:$4 sm:$0xff]   ;;  %v7068_v35 = vld [vmem:[#allocation5 + $0x5ec] ss:$16 sps:$4 sm:$0xff]  }
 0x710   :  { %v2859_v44 = vadd.f32 %v2854_v43, %v2215_v63  ;;  %v7008_v43 = vld [vmem:[#allocation5 + $0x4ac] ss:$16 sps:$4 sm:$0xff]   ;;  %v7066_v37 = vld [vmem:[#allocation5 + $0x5e8] ss:$16 sps:$4 sm:$0xff]   ;;  %v7070_v39 = vld [vmem:[#allocation7 + $0x5c0] sm:$0xff]  }
 0x712   :  { %v2860_v13 = vadd.f32 %v2859_v44, %v7497_v7  ;;  %v6968_v7 = vld [vmem:[#allocation3 + $0x58] sm:$0xff]   ;;  %3251 = vmatpush1.bf16.msra.mxu1 %v6997_v25  ;;  %v7003_v44 = vld [vmem:[#allocation5 + $0x4a0] ss:$16 sps:$4 sm:$0xff]  }
 0x713   :  { %6614 = vmatpush3.bf16.msra.mxu0 %v6968_v7  ;;  %3252 = vmatprep.subr.bf16.mxu1 %v7005_v42  ;;  %v7026_v7 = vld [vmem:[#allocation5 + $0x50c] ss:$16 sps:$4 sm:$0xff]   ;;  %v7072_v25 = vld [vmem:[#allocation7 + $0x580] sm:$0xff]  }
 0x714   :  { %v2866_v46 = vadd.f32 %v5932_v45, %v2860_v13  ;;  %6615 = vmatprep.subr.bf16.mxu0 %v7380_v0  ;;  %v7006_v45 = vld [vmem:[#allocation5 + $0x4a8] ss:$16 sps:$4 sm:$0xff]   ;;  %v7011_v13 = vld [vmem:[#allocation5 + $0x4c4] ss:$16 sps:$4 sm:$0xff]  }
 0x715   :  { %v7074_v42 = vld [vmem:[#allocation7 + $0x5c8] sm:$0xff]  }
 0x716   :  { %2869 = vadd.xlane.f32.xlu1 %v2866_v46  ;;  %3253 = vmatpush1.bf16.msra.mxu1 %v7003_v44  ;;  %v7076_v44 = vld [vmem:[#allocation7 + $0x588] sm:$0xff]  }
 0x717   :  { %6616 = vmatpush3.bf16.msra.mxu0 %v6969_v53  ;;  %3254 = vmatprep.subr.bf16.mxu1 %v7011_v13  ;;  %v7078_v13 = vld [vmem:[#allocation7 + $0x5d0] sm:$0xff]  }
 0x718   :  { %6617 = vmatprep.subr.bf16.mxu0 %v7380_v0 }
 0x71a   :  { %3255 = vmatpush1.bf16.msra.mxu1 %v7009_v14  ;;  %v7080_v14 = vld [vmem:[#allocation7 + $0x590] sm:$0xff]  }
 0x71b   :  { %6618 = vmatpush3.bf16.msra.mxu0 %v6970_v54 }
 0x71c   :  { %6619 = vmatprep.subr.bf16.mxu0 %v7380_v0 }
 0x71f   :  { %6620 = vmatpush3.bf16.msra.mxu0 %v6971_v55 }
 0x720   :  { %6621 = vmatprep.subr.bf16.mxu0 %v7380_v0  ;;  %v5935_v0 = vld [vmem:[%s7683_s2 + $0x8] ss:$0 sm:$0xff] }
 0x723   :  { %6622 = vmatpush3.bf16.msra.mxu0 %v6972_v56 }
 0x724   :  { %3283 = vmatprep.subr.bf16.mxu0 %v6978_v18  ;;  %v7047_v18 = vld [vmem:[#allocation5 + $0x584] ss:$16 sps:$4 sm:$0xff]  }
 0x7a3   :  { %v2870_v48 = vpop.xlane.xlu1 %2869 }
 0x7a4   :  { %v2871_v49 = vmul.f32 0.0078125, %v2870_v48  ;;  %v7017_v48 = vld [vmem:[#allocation5 + $0x4e4] ss:$16 sps:$4 sm:$0xff]  }
 0x7a5   :  { %3256 = vmatprep.subr.bf16.mxu1 %v7017_v48  ;;  %v7082_v48 = vld [vmem:[#allocation7 + $0x5d8] sm:$0xff]  }
 0x7a6   :  { %v2872_v50 = vsub.f32 %v2866_v46, %v2871_v49  ;;  %v7014_v46 = vld [vmem:[#allocation5 + $0x4cc] ss:$16 sps:$4 sm:$0xff]  }
 0x7a7   :  { %v7020_v49 = vld [vmem:[#allocation5 + $0x4ec] ss:$16 sps:$4 sm:$0xff]  }
 0x7a8   :  { %v2873_v51 = vmul.f32 %v2872_v50, %v2872_v50 }
 0x7aa   :  { %2874 = vadd.xlane.f32.xlu1 %v2873_v51  ;;  %v7018_v51 = vld [vmem:[#allocation5 + $0x4e8] ss:$16 sps:$4 sm:$0xff]  }
 0x837   :  { %v2875_v57 = vpop.xlane.xlu1 %2874 }
 0x838   :  { %v2876_v58 = vmul.f32 0.0078125, %v2875_v57  ;;  %v5944_v57 = vld [vmem:[%s7683_s2 + $0x9] ss:$0 sm:$0xff] }
 0x83a   :  { %v2877_v59 = vadd.f32 1e-05, %v2876_v58 }
 0x83c   :  { %7295 = vrsqrt.f32 %v2877_v59  ;;  %v5945_v59 = vld [vmem:[%s7683_s2 + $0xa] ss:$0 sm:$0xff] }
 0x846   :  { %v7296_v60 = vpop.eup %7295 }
 0x847   :  { %v2879_v63 = vmul.f32 %v7296_v60, %v2872_v50  ;;  %v7015_v50 = vld [vmem:[#allocation5 + $0x4e0] ss:$16 sps:$4 sm:$0xff]  }
 0x848   :  { %3257 = vmatpush1.bf16.msra.mxu1 %v7015_v50  ;;  %v7084_v50 = vld [vmem:[#allocation7 + $0x598] sm:$0xff]  }
 0x849   :  { %v2884_v2 = vmul.f32 %v5933_v62, %v2879_v63  ;;  %3613 = vmatprep.subr.bf16.mxu1 %v7023_v52  ;;  %v7021_v63 = vld [vmem:[#allocation5 + $0x500] ss:$16 sps:$4 sm:$0xff]  }
 0x84a   :  { %v7086_v52 = vld [vmem:[#allocation7 + $0x5e0] sm:$0xff]  }
 0x84b   :  { %v2889_v3 = vadd.f32 %v5934_v1, %v2884_v2  ;;  %v7024_v1 = vld [vmem:[#allocation5 + $0x508] ss:$16 sps:$4 sm:$0xff]  }
 0x84d   :  { %v2890_v4 = vpack.c.bf16 %v2889_v3, %v2889_v3 }
 0x84f   :  { %6624 = vmatmul.mubr.bf16.vlgmr.msra.gmra.mrb[36].mxu0 %v2890_v4  ;;  %v7032_v4 = vld [vmem:[#allocation5 + $0x52c] ss:$16 sps:$4 sm:$0xff]  }
 0x850   :  { %3315 = vmatprep.mubr.bf16.mxu0 %v7382_v61  ;;  %3284 = vmatpush1.bf16.msra.mxu0 %v6976_v17  ;;  %v7042_v17 = vld [vmem:[#allocation5 + $0x568] ss:$16 sps:$4 sm:$0xff]  }
 0x851   :  { %3285 = vmatprep.subr.bf16.mxu0 %v6984_v20  ;;  %v7045_v20 = vld [vmem:[#allocation5 + $0x580] ss:$16 sps:$4 sm:$0xff]  }
 0x854   :  { %3286 = vmatpush1.bf16.msra.mxu0 %v6982_v22  ;;  %v7053_v22 = vld [vmem:[#allocation5 + $0x5a4] ss:$16 sps:$4 sm:$0xff]  }
 0x855   :  { %3287 = vmatprep.subr.bf16.mxu0 %v6990_v29  ;;  %v7051_v29 = vld [vmem:[#allocation5 + $0x5a0] ss:$16 sps:$4 sm:$0xff]  }
 0x858   :  { %3288 = vmatpush1.bf16.msra.mxu0 %v6988_v31  ;;  %v7059_v31 = vld [vmem:[#allocation5 + $0x5c4] ss:$16 sps:$4 sm:$0xff]  }
 0x859   :  { %3289 = vmatprep.subr.bf16.mxu0 %v6996_v36  ;;  %v7063_v36 = vld [vmem:[#allocation5 + $0x5e0] ss:$16 sps:$4 sm:$0xff]  }
 0x85c   :  { %3290 = vmatpush1.bf16.msra.mxu0 %v6994_v38  ;;  %v7069_v38 = vld [vmem:[#allocation7 + $0x540] sm:$0xff]  }
 0x85d   :  { %3291 = vmatprep.subr.bf16.mxu0 %v7002_v40  ;;  %v7071_v40 = vld [vmem:[#allocation7 + $0x500] sm:$0xff]  }
 0x860   :  { %3292 = vmatpush1.bf16.msra.mxu0 %v7000_v41  ;;  %v7073_v41 = vld [vmem:[#allocation7 + $0x548] sm:$0xff]  }
 0x861   :  { %3293 = vmatprep.subr.bf16.mxu0 %v7008_v43  ;;  %v7075_v43 = vld [vmem:[#allocation7 + $0x508] sm:$0xff]  }
 0x864   :  { %3294 = vmatpush1.bf16.msra.mxu0 %v7006_v45  ;;  %v7077_v45 = vld [vmem:[#allocation7 + $0x550] sm:$0xff]  }
 0x865   :  { %3295 = vmatprep.subr.bf16.mxu0 %v7014_v46  ;;  %v7079_v46 = vld [vmem:[#allocation7 + $0x510] sm:$0xff]  }
 0x868   :  { %3296 = vmatpush1.bf16.msra.mxu0 %v7012_v47  ;;  %v7081_v47 = vld [vmem:[#allocation7 + $0x558] sm:$0xff]  }
 0x869   :  { %3297 = vmatprep.subr.bf16.mxu0 %v7020_v49  ;;  %v7083_v49 = vld [vmem:[#allocation7 + $0x518] sm:$0xff]  }
 0x86c   :  { %3298 = vmatpush1.bf16.msra.mxu0 %v7018_v51  ;;  %v7085_v51 = vld [vmem:[#allocation7 + $0x560] sm:$0xff]  }
 0x86d   :  { %3654 = vmatprep.subr.bf16.mxu0 %v7026_v7  ;;  %v7087_v7 = vld [vmem:[#allocation7 + $0x520] sm:$0xff]  }
 0x922   :  { %v2995_v5 = vpop.f32.mrb[36].mxu0 }
 0x923   :  { %v2996_v6 = vadd.f32 %v5935_v0, %v2995_v5  ;;  %v6625_v8 = vpop.f32.mrb[37].mxu0  ;;  %v7027_v0 = vld [vmem:[#allocation5 + $0x520] ss:$16 sps:$4 sm:$0xff]   ;;  %v7030_v5 = vld [vmem:[#allocation5 + $0x528] ss:$16 sps:$4 sm:$0xff]  }
 0x924   :  { %v2998_v9 = vpop.f32.mrb[38].mxu0  ;;  %v7038_v8 = vld [vmem:[#allocation5 + $0x54c] ss:$16 sps:$4 sm:$0xff]  }
 0x925   :  { %v6626_v11 = vpop.f32.mrb[39].mxu0  ;;  %v3001_v12 = vadd.f32 %v2996_v6, %v2889_v3  ;;  %v7029_v3 = vld [vmem:[#allocation5 + $0x524] ss:$16 sps:$4 sm:$0xff]   ;;  %v7033_v9 = vld [vmem:[#allocation5 + $0x540] ss:$16 sps:$4 sm:$0xff]  }
 0x926   :  { %v7035_v6 = vld [vmem:[#allocation5 + $0x544] ss:$16 sps:$4 sm:$0xff]   ;;  %v7036_v11 = vld [vmem:[#allocation5 + $0x548] ss:$16 sps:$4 sm:$0xff]  }
 0x927   :  { %3004 = vadd.xlane.f32.xlu0 %v3001_v12 }
 0x9b4   :  { %v3005_v32 = vpop.xlane.xlu0 %3004 }
 0x9b5   :  { %v3006_v33 = vmul.f32 0.0078125, %v3005_v32  ;;  %v7062_v32 = vld [vmem:[#allocation5 + $0x5cc] ss:$16 sps:$4 sm:$0xff]  }
 0x9b7   :  { %v3007_v10 = vsub.f32 %v3001_v12, %v3006_v33  ;;  %v7041_v12 = vld [vmem:[#allocation5 + $0x564] ss:$16 sps:$4 sm:$0xff]   ;;  %v7057_v33 = vld [vmem:[#allocation5 + $0x5c0] ss:$16 sps:$4 sm:$0xff]  }
 0x9b9   :  { %v3008_v34 = vmul.f32 %v3007_v10, %v3007_v10 }
 0x9bb   :  { %3009 = vadd.xlane.f32.xlu1 %v3008_v34  ;;  %v7065_v34 = vld [vmem:[#allocation5 + $0x5e4] ss:$16 sps:$4 sm:$0xff]  }
 0xa48   :  { %v3010_v53 = vpop.xlane.xlu1 %3009 }
 0xa49   :  { %v3011_v54 = vmul.f32 0.0078125, %v3010_v53  ;;  %v7088_v53 = vld [vmem:[#allocation7 + $0x5a0] sm:$0xff]  }
 0xa4b   :  { %v3012_v55 = vadd.f32 1e-05, %v3011_v54  ;;  %v7089_v54 = vld [vmem:[#allocation7 + $0x568] sm:$0xff]  }
 0xa4d   :  { %7297 = vrsqrt.f32 %v3012_v55  ;;  %v7090_v55 = vld [vmem:[#allocation7 + $0x5e8] sm:$0xff]  }
 0xa57   :  { %v7298_v56 = vpop.eup %7297 }
 0xa58   :  { %v3014_v58 = vmul.f32 %v7298_v56, %v3007_v10  ;;  %v7060_v10 = vld [vmem:[#allocation5 + $0x5c8] ss:$16 sps:$4 sm:$0xff]  }
 0xa59   :  { %v7091_v56 = vld [vmem:[#allocation7 + $0x528] sm:$0xff]  }
 0xa5a   :  { %v3019_v60 = vmul.f32 %v5944_v57, %v3014_v58  ;;  %v7092_v57 = vld [vmem:[#allocation7 + $0x5a8] sm:$0xff]   ;;  %v7093_v58 = vld [vmem:[#allocation7 + $0x570] sm:$0xff]  }
 0xa5c   :  { %v7599_v62 = vadd.f32 %v5945_v59, %v3019_v60  ;;  %v7094_v59 = vld [vmem:[#allocation7 + $0x5f0] sm:$0xff]  }
 0xa5d   :  { %v7095_v60 = vld [vmem:[#allocation7 + $0x530] sm:$0xff]  }
 0xa5e   :  { %v7603_v2 = vpack.c.bf16 %v7599_v62, %v7599_v62 }
 0xa60   :  { %3275 = vmatmul.mubr.bf16.vlgmr.msra.gmra.mrb[36].mxu1 %v7603_v2  ;;  %3316 = vmatmul.mubr.bf16.vlgmr.msra.gmra.mrb[40].mxu0 %v7603_v2 }
 0xa61   :  { %3614 = vmatpush1.bf16.msra.mxu1 %v7021_v63  ;;  %3655 = vmatpush1.bf16.msra.mxu0 %v7024_v1  ;;  %v7096_v63 = vld [vmem:[#allocation7 + $0x5b0] sm:$0xff]   ;;  %v7097_v1 = vld [vmem:[#allocation7 + $0x578] sm:$0xff]  }
 0xa62   :  { %3615 = vmatprep.subr.bf16.mxu1 %v7029_v3  ;;  %3656 = vmatprep.subr.bf16.mxu0 %v7032_v4  ;;  %v7098_v3 = vld [vmem:[#allocation7 + $0x5f8] sm:$0xff]  }
 0xa63   :  { %3645 = vmatprep.mubr.bf16.mxu1 %v7382_v61  ;;  %3686 = vmatprep.mubr.bf16.mxu0 %v7382_v61  ;;  %v7099_v4 = vld [vmem:[#allocation7 + $0x538] sm:$0xff]  }
 0xa65   :  { %3616 = vmatpush1.bf16.msra.mxu1 %v7027_v0  ;;  %3657 = vmatpush1.bf16.msra.mxu0 %v7030_v5  ;;  %v7100_v0 = vld [vmem:[#allocation7 + $0x5b8] sm:$0xff]   ;;  %v7101_v5 = vld [vmem:[#allocation7 + $0x440] sm:$0xff]  }
 0xa66   :  { %3617 = vmatprep.subr.bf16.mxu1 %v7035_v6  ;;  %3658 = vmatprep.subr.bf16.mxu0 %v7038_v8  ;;  %v7102_v6 = vld [vmem:[#allocation7 + $0x4c0] sm:$0xff]  }
 0xa69   :  { %3618 = vmatpush1.bf16.msra.mxu1 %v7033_v9  ;;  %3659 = vmatpush1.bf16.msra.mxu0 %v7036_v11 }
 0xa6a   :  { %3619 = vmatprep.subr.bf16.mxu1 %v7041_v12  ;;  %3660 = vmatprep.subr.bf16.mxu0 %v7044_v15 }
 0xa6d   :  { %3620 = vmatpush1.bf16.msra.mxu1 %v7039_v16  ;;  %3661 = vmatpush1.bf16.msra.mxu0 %v7042_v17 }
 0xa6e   :  { %3621 = vmatprep.subr.bf16.mxu1 %v7047_v18  ;;  %3662 = vmatprep.subr.bf16.mxu0 %v7050_v19  ;;  %v7618_v19 = vld [vmem:[%s7686_s5 + $0x10] sm:$0xf] }
 0xa71   :  { %3622 = vmatpush1.bf16.msra.mxu1 %v7045_v20  ;;  %3663 = vmatpush1.bf16.msra.mxu0 %v7048_v21  ;;  %v5979_v20 = vld [vmem:[%s7686_s5 + $0x14] sm:$0xf]  ;;  %v3069_v21 = vrot.slane %v7618_v19, %v7513_v23 }
 0xa72   :  { %3623 = vmatprep.subr.bf16.mxu1 %v7053_v22  ;;  %3664 = vmatprep.subr.bf16.mxu0 %v7056_v26  ;;  %v3077_v22 = vrot.slane %v7618_v19, %v7515_v24  ;;  %v3436_v26 = vrot.slane %v5979_v20, %v7525_v27 }
 0xa75   :  { %3624 = vmatpush1.bf16.msra.mxu1 %v7051_v29  ;;  %3665 = vmatpush1.bf16.msra.mxu0 %v7054_v30  ;;  %v3444_v29 = vrot.slane %v5979_v20, %v7527_v28  ;;  %v3440_v30 = vrot.slane %v5979_v20, %v7513_v23 }
 0xa76   :  { %3625 = vmatprep.subr.bf16.mxu1 %v7059_v31  ;;  %3666 = vmatprep.subr.bf16.mxu0 %v7062_v32  ;;  %v3448_v31 = vrot.slane %v5979_v20, %v7515_v24  ;;  %v7124_v20 = vld [vmem:[#allocation7 + $0x4a8] sm:$0xff]  }
 0xa79   :  { %3626 = vmatpush1.bf16.msra.mxu1 %v7057_v33  ;;  %3667 = vmatpush1.bf16.msra.mxu0 %v7060_v10 }
 0xa7a   :  { %3627 = vmatprep.subr.bf16.mxu1 %v7065_v34  ;;  %3668 = vmatprep.subr.bf16.mxu0 %v7068_v35 }
 0xa7d   :  { %3628 = vmatpush1.bf16.msra.mxu1 %v7063_v36  ;;  %3669 = vmatpush1.bf16.msra.mxu0 %v7066_v37 }
 0xa7e   :  { %6406 = vmatprep.subr.bf16.mxu1 %v7069_v38  ;;  %6428 = vmatprep.subr.bf16.mxu0 %v7070_v39 }
 0xa80   :  { %3646 = vmatmul.mubr.bf16.vlgmr.msra.gmra.mrb[40].mxu1 %v7603_v2  ;;  %3687 = vmatmul.mubr.bf16.vlgmr.msra.gmra.mrb[44].mxu0 %v7603_v2 }
 0xa81   :  { %6407 = vmatpush3.bf16.msra.mxu1 %v7071_v40  ;;  %6429 = vmatpush3.bf16.msra.mxu0 %v7072_v25 }
 0xa82   :  { %6408 = vmatprep.subr.bf16.mxu1 %v7073_v41  ;;  %6430 = vmatprep.subr.bf16.mxu0 %v7074_v42 }
 0xa85   :  { %6409 = vmatpush3.bf16.msra.mxu1 %v7075_v43  ;;  %6431 = vmatpush3.bf16.msra.mxu0 %v7076_v44 }
 0xa86   :  { %6410 = vmatprep.subr.bf16.mxu1 %v7077_v45  ;;  %6432 = vmatprep.subr.bf16.mxu0 %v7078_v13 }
 0xa89   :  { %6411 = vmatpush3.bf16.msra.mxu1 %v7079_v46  ;;  %6433 = vmatpush3.bf16.msra.mxu0 %v7080_v14 }
 0xa8a   :  { %6412 = vmatprep.subr.bf16.mxu1 %v7081_v47  ;;  %6434 = vmatprep.subr.bf16.mxu0 %v7082_v48 }
 0xa8d   :  { %6413 = vmatpush3.bf16.msra.mxu1 %v7083_v49  ;;  %6435 = vmatpush3.bf16.msra.mxu0 %v7084_v50  ;;  %v7103_v50 = vld [vmem:[#allocation7 + $0x400] sm:$0xff]  }
 0xa8e   :  { %6414 = vmatprep.subr.bf16.mxu1 %v7085_v51  ;;  %6436 = vmatprep.subr.bf16.mxu0 %v7086_v52  ;;  %v7104_v51 = vld [vmem:[#allocation7 + $0x480] sm:$0xff]  }
 0xa91   :  { %6415 = vmatpush3.bf16.msra.mxu1 %v7087_v7  ;;  %6437 = vmatpush3.bf16.msra.mxu0 %v7088_v53  ;;  %v7105_v53 = vld [vmem:[#allocation7 + $0x448] sm:$0xff]  }
 0xa92   :  { %6416 = vmatprep.subr.bf16.mxu1 %v7089_v54  ;;  %6438 = vmatprep.subr.bf16.mxu0 %v7090_v55  ;;  %v7106_v54 = vld [vmem:[#allocation7 + $0x4c8] sm:$0xff]  }
 0xa95   :  { %6417 = vmatpush3.bf16.msra.mxu1 %v7091_v56  ;;  %6439 = vmatpush3.bf16.msra.mxu0 %v7092_v57  ;;  %v7107_v57 = vld [vmem:[#allocation7 + $0x408] sm:$0xff]  }
 0xa96   :  { %6418 = vmatprep.subr.bf16.mxu1 %v7093_v58  ;;  %6440 = vmatprep.subr.bf16.mxu0 %v7094_v59  ;;  %v7108_v58 = vld [vmem:[#allocation7 + $0x488] sm:$0xff]   ;;  %v7109_v59 = vld [vmem:[#allocation7 + $0x450] sm:$0xff]  }
 0xa99   :  { %6419 = vmatpush3.bf16.msra.mxu1 %v7095_v60  ;;  %6441 = vmatpush3.bf16.msra.mxu0 %v7096_v63  ;;  %v7110_v60 = vld [vmem:[#allocation7 + $0x4d0] sm:$0xff]  }
 0xa9a   :  { %6420 = vmatprep.subr.bf16.mxu1 %v7097_v1  ;;  %6442 = vmatprep.subr.bf16.mxu0 %v7098_v3  ;;  %v7111_v63 = vld [vmem:[#allocation7 + $0x410] sm:$0xff]   ;;  %v7113_v3 = vld [vmem:[#allocation7 + $0x458] sm:$0xff]  }
 0xa9b   :  { %v7112_v1 = vld [vmem:[#allocation7 + $0x490] sm:$0xff]  }
 0xa9d   :  { %6421 = vmatpush3.bf16.msra.mxu1 %v7099_v4  ;;  %6443 = vmatpush3.bf16.msra.mxu0 %v7100_v0  ;;  %v7114_v4 = vld [vmem:[#allocation7 + $0x4d8] sm:$0xff]  }
 0xa9e   :  { %6450 = vmatprep.subr.bf16.mxu1 %v7101_v5  ;;  %6472 = vmatprep.subr.bf16.mxu0 %v7102_v6  ;;  %v7115_v0 = vld [vmem:[#allocation7 + $0x418] sm:$0xff]   ;;  %v7117_v6 = vld [vmem:[#allocation7 + $0x460] sm:$0xff]  }
 0xa9f   :  { %v7116_v5 = vld [vmem:[#allocation7 + $0x498] sm:$0xff]  }
 0xb33   :  { %v7611_v8 = vpop.f32.mrb[36].mxu1  ;;  %v7613_v9 = vpop.f32.mrb[40].mxu0 }
 0xb34   :  { %v3278_v11 = vpop.f32.mrb[37].mxu1  ;;  %v3319_v12 = vpop.f32.mrb[41].mxu0 }
 0xb35   :  { %v3280_v15 = vpop.f32.mrb[38].mxu1  ;;  %v3321_v16 = vpop.f32.mrb[42].mxu0  ;;  %v3279_v10 = vadd.f32 %v3278_v11, %v3069_v21  ;;  %v3320_v34 = vadd.f32 %v3319_v12, %v3077_v22  ;;  %v7118_v11 = vld [vmem:[#allocation7 + $0x4e0] sm:$0xff]   ;;  %v3065_v21 = vrot.slane %v7618_v19, %v7525_v27  ;;  %v3073_v22 = vrot.slane %v7618_v19, %v7527_v28  ;;  %v7132_v19 = vld [vmem:[#allocation7 + $0x4b8] sm:$0xff]  }
 0xb36   :  { %v3281_v17 = vpop.f32.mrb[39].mxu1  ;;  %v3322_v18 = vpop.f32.mrb[43].mxu0  ;;  %v7119_v12 = vld [vmem:[#allocation7 + $0x420] sm:$0xff]   ;;  %v7121_v16 = vld [vmem:[#allocation7 + $0x468] sm:$0xff]  }
 0xb37   :  { %v3325_v14 = vmax.f32 %v3279_v10, 0.0  ;;  %v3327_v47 = vmax.f32 %v3320_v34, 0.0  ;;  %v7120_v15 = vld [vmem:[#allocation7 + $0x4a0] sm:$0xff]   ;;  %v7122_v17 = vld [vmem:[#allocation7 + $0x4e8] sm:$0xff]   ;;  %v7129_v10 = vld [vmem:[#allocation7 + $0x478] sm:$0xff]  }
 0xb38   :  { %v7123_v18 = vld [vmem:[#allocation7 + $0x428] sm:$0xff]   ;;  %v7130_v34 = vld [vmem:[#allocation7 + $0x4f8] sm:$0xff]  }
 0xb39   :  { %v3329_v55 = vpack.c.bf16 %v3325_v14, %v3325_v14  ;;  %v3331_v56 = vpack.c.bf16 %v3327_v47, %v3327_v47  ;;  %v7148_v14 = vld [vmem:[#allocation5 + $0x648] ss:$16 sps:$4 sm:$0xff]   ;;  %v7153_v47 = vld [vmem:[#allocation5 + $0x664] ss:$16 sps:$4 sm:$0xff]  }
 0xb53   :  { %v3647_v32 = vpop.f32.mrb[40].mxu1  ;;  %v3688_v33 = vpop.f32.mrb[44].mxu0 }
 0xb54   :  { %v3648_v35 = vadd.f32 %v3647_v32, %v3436_v26  ;;  %v3689_v36 = vadd.f32 %v3688_v33, %v3444_v29  ;;  %v3649_v37 = vpop.f32.mrb[41].mxu1  ;;  %v3690_v38 = vpop.f32.mrb[45].mxu0  ;;  %v7125_v26 = vld [vmem:[#allocation7 + $0x470] sm:$0xff]   ;;  %v3277_v32 = vadd.f32 %v7611_v8, %v3065_v21  ;;  %v3318_v33 = vadd.f32 %v7613_v9, %v3073_v22  ;;  %v7136_v8 = vld [vmem:[#allocation5 + $0x608] ss:$16 sps:$4 sm:$0xff]  }
 0xb55   :  { %v3650_v39 = vadd.f32 %v3649_v37, %v3440_v30  ;;  %v3691_v40 = vadd.f32 %v3690_v38, %v3448_v31  ;;  %v3651_v25 = vpop.f32.mrb[42].mxu1  ;;  %v3692_v41 = vpop.f32.mrb[46].mxu0  ;;  %v7126_v29 = vld [vmem:[#allocation7 + $0x4f0] sm:$0xff]  }
 0xb56   :  { %v3695_v42 = vmax.f32 %v3648_v35, 0.0  ;;  %v3697_v43 = vmax.f32 %v3689_v36, 0.0  ;;  %v3652_v44 = vpop.f32.mrb[43].mxu1  ;;  %v3693_v45 = vpop.f32.mrb[47].mxu0  ;;  %v7127_v30 = vld [vmem:[#allocation7 + $0x430] sm:$0xff]   ;;  %v7131_v35 = vld [vmem:[#allocation7 + $0x438] sm:$0xff]  }
 0xb57   :  { %v3696_v13 = vmax.f32 %v3650_v39, 0.0  ;;  %v3698_v46 = vmax.f32 %v3691_v40, 0.0  ;;  %v7128_v31 = vld [vmem:[#allocation7 + $0x4b0] sm:$0xff]   ;;  %v3324_v36 = vmax.f32 %v3277_v32, 0.0  ;;  %v3326_v37 = vmax.f32 %v3318_v33, 0.0  ;;  %v7196_v32 = vld [vmem:[#allocation7 + $0x698] sm:$0xff]  }
 0xb58   :  { %v3699_v52 = vpack.c.bf16 %v3695_v42, %v3695_v42  ;;  %v3701_v7 = vpack.c.bf16 %v3697_v43, %v3697_v43  ;;  %v7135_v38 = vld [vmem:[#allocation5 + $0x604] ss:$16 sps:$4 sm:$0xff]   ;;  %v7138_v39 = vld [vmem:[#allocation5 + $0x60c] ss:$16 sps:$4 sm:$0xff]   ;;  %v7133_v40 = vld [vmem:[#allocation5 + $0x600] ss:$16 sps:$4 sm:$0xff]  }
 0xb59   :  { %v3700_v48 = vpack.c.bf16 %v3696_v13, %v3696_v13  ;;  %v3702_v49 = vpack.c.bf16 %v3698_v46, %v3698_v46  ;;  %v3328_v25 = vpack.c.bf16 %v3324_v36, %v3324_v36  ;;  %v3330_v9 = vpack.c.bf16 %v3326_v37, %v3326_v37  ;;  %v7141_v41 = vld [vmem:[#allocation5 + $0x624] ss:$16 sps:$4 sm:$0xff]   ;;  %v7144_v42 = vld [vmem:[#allocation5 + $0x62c] ss:$16 sps:$4 sm:$0xff]   ;;  %v7139_v43 = vld [vmem:[#allocation5 + $0x620] ss:$16 sps:$4 sm:$0xff]  }
 0xb5a   :  { %v7142_v44 = vld [vmem:[#allocation5 + $0x628] ss:$16 sps:$4 sm:$0xff]   ;;  %v7147_v45 = vld [vmem:[#allocation5 + $0x644] ss:$16 sps:$4 sm:$0xff]   ;;  %v7150_v13 = vld [vmem:[#allocation5 + $0x64c] ss:$16 sps:$4 sm:$0xff]  }
 0xb5b   :  { %3992 = vmatprep.mubr.bf16.mxu1 %v3700_v48  ;;  %4032 = vmatprep.mubr.bf16.mxu0 %v3702_v49  ;;  %v7145_v46 = vld [vmem:[#allocation5 + $0x640] ss:$16 sps:$4 sm:$0xff]   ;;  %v7156_v48 = vld [vmem:[#allocation5 + $0x66c] ss:$16 sps:$4 sm:$0xff]  }
 0xb5c   :  { %3993 = vmatmul.mubr.bf16.vlgmr.msra.gmra.mrb[44].mxu1 %v3699_v52  ;;  %4033 = vmatmul.mubr.bf16.vlgmr.msra.gmra.mrb[48].mxu0 %v3701_v7  ;;  %v7151_v49 = vld [vmem:[#allocation5 + $0x660] ss:$16 sps:$4 sm:$0xff]   ;;  %v7162_v52 = vld [vmem:[#allocation5 + $0x68c] ss:$16 sps:$4 sm:$0xff]  }
 0xb5d   :  { %6451 = vmatpush3.bf16.msra.mxu1 %v7103_v50  ;;  %6473 = vmatpush3.bf16.msra.mxu0 %v7104_v51  ;;  %v7154_v50 = vld [vmem:[#allocation5 + $0x668] ss:$16 sps:$4 sm:$0xff]   ;;  %v7159_v51 = vld [vmem:[#allocation5 + $0x684] ss:$16 sps:$4 sm:$0xff]   ;;  %v7157_v7 = vld [vmem:[#allocation5 + $0x680] ss:$16 sps:$4 sm:$0xff]  }
 0xb5e   :  { %4264 = vmatprep.mubr.bf16.mxu1 %v3329_v55  ;;  %4304 = vmatprep.mubr.bf16.mxu0 %v3331_v56  ;;  %v7168_v55 = vld [vmem:[#allocation5 + $0x6ac] ss:$16 sps:$4 sm:$0xff]   ;;  %v7163_v56 = vld [vmem:[#allocation5 + $0x6a0] ss:$16 sps:$4 sm:$0xff]  }
 0xb5f   :  { %6452 = vmatprep.subr.bf16.mxu1 %v7105_v53  ;;  %6474 = vmatprep.subr.bf16.mxu0 %v7106_v54  ;;  %v7160_v53 = vld [vmem:[#allocation5 + $0x688] ss:$16 sps:$4 sm:$0xff]   ;;  %v7165_v54 = vld [vmem:[#allocation5 + $0x6a4] ss:$16 sps:$4 sm:$0xff]  }
 0xb60   :  { %v7190_v21 = vld [vmem:[#allocation7 + $0x6d0] sm:$0xff]   ;;  %v7197_v33 = vld [vmem:[#allocation7 + $0x660] sm:$0xff]   ;;  %v7202_v36 = vld [vmem:[#allocation7 + $0x6e8] sm:$0xff]  }
 0xb61   :  { %6453 = vmatpush3.bf16.msra.mxu1 %v7107_v57  ;;  %6475 = vmatpush3.bf16.msra.mxu0 %v7108_v58  ;;  %v7166_v57 = vld [vmem:[#allocation5 + $0x6a8] ss:$16 sps:$4 sm:$0xff]   ;;  %v7171_v58 = vld [vmem:[#allocation5 + $0x6c4] ss:$16 sps:$4 sm:$0xff]  }
 0xb62   :  { %6454 = vmatprep.subr.bf16.mxu1 %v7109_v59  ;;  %6476 = vmatprep.subr.bf16.mxu0 %v7110_v60  ;;  %v7174_v59 = vld [vmem:[#allocation5 + $0x6cc] ss:$16 sps:$4 sm:$0xff]   ;;  %v7169_v60 = vld [vmem:[#allocation5 + $0x6c0] ss:$16 sps:$4 sm:$0xff]  }
 0xb63   :  { %v7191_v22 = vld [vmem:[#allocation7 + $0x610] sm:$0xff]   ;;  %v7203_v37 = vld [vmem:[#allocation7 + $0x628] sm:$0xff]  }
 0xb65   :  { %6455 = vmatpush3.bf16.msra.mxu1 %v7111_v63  ;;  %6477 = vmatpush3.bf16.msra.mxu0 %v7112_v1  ;;  %v7172_v63 = vld [vmem:[#allocation5 + $0x6c8] ss:$16 sps:$4 sm:$0xff]   ;;  %v7177_v1 = vld [vmem:[#allocation5 + $0x6e4] ss:$16 sps:$4 sm:$0xff]  }
 0xb66   :  { %6456 = vmatprep.subr.bf16.mxu1 %v7113_v3  ;;  %6478 = vmatprep.subr.bf16.mxu0 %v7114_v4  ;;  %v7180_v3 = vld [vmem:[#allocation5 + $0x6ec] ss:$16 sps:$4 sm:$0xff]   ;;  %v7175_v4 = vld [vmem:[#allocation5 + $0x6e0] ss:$16 sps:$4 sm:$0xff]  }
 0xb69   :  { %6457 = vmatpush3.bf16.msra.mxu1 %v7115_v0  ;;  %6479 = vmatpush3.bf16.msra.mxu0 %v7116_v5  ;;  %v7178_v0 = vld [vmem:[#allocation5 + $0x6e8] ss:$16 sps:$4 sm:$0xff]   ;;  %v7181_v5 = vld [vmem:[#allocation7 + $0x640] sm:$0xff]  }
 0xb6a   :  { %6458 = vmatprep.subr.bf16.mxu1 %v7117_v6  ;;  %6480 = vmatprep.subr.bf16.mxu0 %v7118_v11  ;;  %v7182_v6 = vld [vmem:[#allocation7 + $0x6c0] sm:$0xff]  }
 0xb6b   :  { %v7183_v11 = vld [vmem:[#allocation7 + $0x600] sm:$0xff]  }
 0xb6d   :  { %6459 = vmatpush3.bf16.msra.mxu1 %v7119_v12  ;;  %6481 = vmatpush3.bf16.msra.mxu0 %v7120_v15  ;;  %v7184_v12 = vld [vmem:[#allocation7 + $0x680] sm:$0xff]   ;;  %v7185_v15 = vld [vmem:[#allocation7 + $0x648] sm:$0xff]  }
 0xb6e   :  { %6460 = vmatprep.subr.bf16.mxu1 %v7121_v16  ;;  %6482 = vmatprep.subr.bf16.mxu0 %v7122_v17  ;;  %v7186_v16 = vld [vmem:[#allocation7 + $0x6c8] sm:$0xff]  }
 0xb6f   :  { %v7187_v17 = vld [vmem:[#allocation7 + $0x608] sm:$0xff]  }
 0xb71   :  { %6461 = vmatpush3.bf16.msra.mxu1 %v7123_v18  ;;  %6483 = vmatpush3.bf16.msra.mxu0 %v7124_v20  ;;  %v7188_v18 = vld [vmem:[#allocation7 + $0x688] sm:$0xff]   ;;  %v7189_v20 = vld [vmem:[#allocation7 + $0x650] sm:$0xff]  }
 0xb72   :  { %6462 = vmatprep.subr.bf16.mxu1 %v7125_v26  ;;  %6484 = vmatprep.subr.bf16.mxu0 %v7126_v29  ;;  %v7192_v26 = vld [vmem:[#allocation7 + $0x690] sm:$0xff]   ;;  %v7193_v29 = vld [vmem:[#allocation7 + $0x658] sm:$0xff]  }
 0xb75   :  { %6463 = vmatpush3.bf16.msra.mxu1 %v7127_v30  ;;  %6485 = vmatpush3.bf16.msra.mxu0 %v7128_v31  ;;  %v7194_v30 = vld [vmem:[#allocation7 + $0x6d8] sm:$0xff]  }
 0xb76   :  { %6464 = vmatprep.subr.bf16.mxu1 %v7129_v10  ;;  %6486 = vmatprep.subr.bf16.mxu0 %v7130_v34  ;;  %v7195_v31 = vld [vmem:[#allocation7 + $0x618] sm:$0xff]   ;;  %v7198_v10 = vld [vmem:[#allocation7 + $0x6e0] sm:$0xff]  }
 0xb77   :  { %v7199_v34 = vld [vmem:[#allocation7 + $0x620] sm:$0xff]  }
 0xb79   :  { %6465 = vmatpush3.bf16.msra.mxu1 %v7131_v35  ;;  %6487 = vmatpush3.bf16.msra.mxu0 %v7132_v19  ;;  %v7200_v35 = vld [vmem:[#allocation7 + $0x6a0] sm:$0xff]   ;;  %v7201_v19 = vld [vmem:[#allocation7 + $0x668] sm:$0xff]  }
 0xb7a   :  { %4528 = vmatprep.subr.bf16.mxu1 %v7135_v38  ;;  %4569 = vmatprep.subr.bf16.mxu0 %v7138_v39  ;;  %v7204_v38 = vld [vmem:[#allocation7 + $0x6a8] sm:$0xff]   ;;  %v7205_v39 = vld [vmem:[#allocation7 + $0x670] sm:$0xff]  }
 0xb7c   :  { %4265 = vmatmul.mubr.bf16.vlgmr.msra.gmra.mrb[48].mxu1 %v3328_v25  ;;  %4305 = vmatmul.mubr.bf16.vlgmr.msra.gmra.mrb[52].mxu0 %v3330_v9  ;;  %v7208_v25 = vld [vmem:[#allocation7 + $0x6b0] sm:$0xff]   ;;  %v7209_v9 = vld [vmem:[#allocation7 + $0x678] sm:$0xff]  }
 0xb7d   :  { %4529 = vmatpush1.bf16.msra.mxu1 %v7133_v40  ;;  %4570 = vmatpush1.bf16.msra.mxu0 %v7136_v8  ;;  %v7206_v40 = vld [vmem:[#allocation7 + $0x6f0] sm:$0xff]  }
 0xb7e   :  { %4530 = vmatprep.subr.bf16.mxu1 %v7141_v41  ;;  %4571 = vmatprep.subr.bf16.mxu0 %v7144_v42  ;;  %v7207_v8 = vld [vmem:[#allocation7 + $0x630] sm:$0xff]   ;;  %v7210_v41 = vld [vmem:[#allocation7 + $0x6f8] sm:$0xff]  }
 0xb7f   :  { %4560 = vmatprep.mubr.bf16.mxu1 %v7382_v61  ;;  %4601 = vmatprep.mubr.bf16.mxu0 %v7382_v61  ;;  %v7211_v42 = vld [vmem:[#allocation7 + $0x638] sm:$0xff]  }
 0xb81   :  { %4531 = vmatpush1.bf16.msra.mxu1 %v7139_v43  ;;  %4572 = vmatpush1.bf16.msra.mxu0 %v7142_v44  ;;  %v7212_v43 = vld [vmem:[#allocation7 + $0x6b8] sm:$0xff]   ;;  %v7215_v44 = vld [vmem:[#allocation5 + $0x704] ss:$16 sps:$4 sm:$0xff]  }
 0xb82   :  { %4532 = vmatprep.subr.bf16.mxu1 %v7147_v45  ;;  %4573 = vmatprep.subr.bf16.mxu0 %v7150_v13  ;;  %v7218_v45 = vld [vmem:[#allocation5 + $0x70c] ss:$16 sps:$4 sm:$0xff]  }
 0xb85   :  { %4533 = vmatpush1.bf16.msra.mxu1 %v7145_v46  ;;  %4574 = vmatpush1.bf16.msra.mxu0 %v7148_v14 }
 0xb86   :  { %4534 = vmatprep.subr.bf16.mxu1 %v7153_v47  ;;  %4575 = vmatprep.subr.bf16.mxu0 %v7156_v48 }
 0xb89   :  { %4535 = vmatpush1.bf16.msra.mxu1 %v7151_v49  ;;  %4576 = vmatpush1.bf16.msra.mxu0 %v7154_v50 }
 0xb8a   :  { %4536 = vmatprep.subr.bf16.mxu1 %v7159_v51  ;;  %4577 = vmatprep.subr.bf16.mxu0 %v7162_v52 }
 0xb8d   :  { %4537 = vmatpush1.bf16.msra.mxu1 %v7157_v7  ;;  %4578 = vmatpush1.bf16.msra.mxu0 %v7160_v53 }
 0xb8e   :  { %4538 = vmatprep.subr.bf16.mxu1 %v7165_v54  ;;  %4579 = vmatprep.subr.bf16.mxu0 %v7168_v55 }
 0xb91   :  { %4539 = vmatpush1.bf16.msra.mxu1 %v7163_v56  ;;  %4580 = vmatpush1.bf16.msra.mxu0 %v7166_v57 }
 0xb92   :  { %4540 = vmatprep.subr.bf16.mxu1 %v7171_v58  ;;  %4581 = vmatprep.subr.bf16.mxu0 %v7174_v59 }
 0xb95   :  { %4541 = vmatpush1.bf16.msra.mxu1 %v7169_v60  ;;  %4582 = vmatpush1.bf16.msra.mxu0 %v7172_v63 }
 0xb96   :  { %4542 = vmatprep.subr.bf16.mxu1 %v7177_v1  ;;  %4583 = vmatprep.subr.bf16.mxu0 %v7180_v3 }
 0xb99   :  { %4543 = vmatpush1.bf16.msra.mxu1 %v7175_v4  ;;  %4584 = vmatpush1.bf16.msra.mxu0 %v7178_v0 }
 0xb9a   :  { %6494 = vmatprep.subr.bf16.mxu1 %v7181_v5  ;;  %6516 = vmatprep.subr.bf16.mxu0 %v7182_v6  ;;  %v6076_v5 = vld [vmem:[%s7686_s5 + $0x18] sm:$0xf] }
 0xb9b   :  { %v4351_v6 = vrot.slane %v6076_v5, %v7525_v27 }
 0xb9c   :  { %4561 = vmatmul.mubr.bf16.vlgmr.msra.gmra.mrb[52].mxu1 %v7603_v2  ;;  %4602 = vmatmul.mubr.bf16.vlgmr.msra.gmra.mrb[56].mxu0 %v7603_v2 }
 0xb9d   :  { %6495 = vmatpush3.bf16.msra.mxu1 %v7183_v11  ;;  %6517 = vmatpush3.bf16.msra.mxu0 %v7184_v12  ;;  %v4359_v11 = vrot.slane %v6076_v5, %v7527_v28  ;;  %v4355_v12 = vrot.slane %v6076_v5, %v7513_v23 }
 0xb9e   :  { %6496 = vmatprep.subr.bf16.mxu1 %v7185_v15  ;;  %6518 = vmatprep.subr.bf16.mxu0 %v7186_v16  ;;  %v4363_v15 = vrot.slane %v6076_v5, %v7515_v24  ;;  %v7263_v5 = vld [vmem:[#allocation7 + $0x700] sm:$0xff]  }
 0xba1   :  { %6497 = vmatpush3.bf16.msra.mxu1 %v7187_v17  ;;  %6519 = vmatpush3.bf16.msra.mxu0 %v7188_v18 }
 0xba2   :  { %6498 = vmatprep.subr.bf16.mxu1 %v7189_v20  ;;  %6520 = vmatprep.subr.bf16.mxu0 %v7190_v21 }
 0xba5   :  { %6499 = vmatpush3.bf16.msra.mxu1 %v7191_v22  ;;  %6521 = vmatpush3.bf16.msra.mxu0 %v7192_v26 }
 0xba6   :  { %6500 = vmatprep.subr.bf16.mxu1 %v7193_v29  ;;  %6522 = vmatprep.subr.bf16.mxu0 %v7194_v30 }
 0xba9   :  { %6501 = vmatpush3.bf16.msra.mxu1 %v7195_v31  ;;  %6523 = vmatpush3.bf16.msra.mxu0 %v7196_v32 }
 0xbaa   :  { %6502 = vmatprep.subr.bf16.mxu1 %v7197_v33  ;;  %6524 = vmatprep.subr.bf16.mxu0 %v7198_v10 }
 0xbad   :  { %6503 = vmatpush3.bf16.msra.mxu1 %v7199_v34  ;;  %6525 = vmatpush3.bf16.msra.mxu0 %v7200_v35 }
 0xbae   :  { %6504 = vmatprep.subr.bf16.mxu1 %v7201_v19  ;;  %6526 = vmatprep.subr.bf16.mxu0 %v7202_v36 }
 0xbb1   :  { %6505 = vmatpush3.bf16.msra.mxu1 %v7203_v37  ;;  %6527 = vmatpush3.bf16.msra.mxu0 %v7204_v38  ;;  %v7213_v38 = vld [vmem:[#allocation5 + $0x700] ss:$16 sps:$4 sm:$0xff]  }
 0xbb2   :  { %6506 = vmatprep.subr.bf16.mxu1 %v7205_v39  ;;  %6528 = vmatprep.subr.bf16.mxu0 %v7206_v40  ;;  %v7216_v39 = vld [vmem:[#allocation5 + $0x708] ss:$16 sps:$4 sm:$0xff]  }
 0xbb5   :  { %6507 = vmatpush3.bf16.msra.mxu1 %v7207_v8  ;;  %6529 = vmatpush3.bf16.msra.mxu0 %v7208_v25  ;;  %v7221_v25 = vld [vmem:[#allocation5 + $0x724] ss:$16 sps:$4 sm:$0xff]  }
 0xbb6   :  { %6508 = vmatprep.subr.bf16.mxu1 %v7209_v9  ;;  %6530 = vmatprep.subr.bf16.mxu0 %v7210_v41  ;;  %v7224_v9 = vld [vmem:[#allocation5 + $0x72c] ss:$16 sps:$4 sm:$0xff]   ;;  %v7219_v41 = vld [vmem:[#allocation5 + $0x720] ss:$16 sps:$4 sm:$0xff]  }
 0xbb9   :  { %6509 = vmatpush3.bf16.msra.mxu1 %v7211_v42  ;;  %6531 = vmatpush3.bf16.msra.mxu0 %v7212_v43  ;;  %v7222_v42 = vld [vmem:[#allocation5 + $0x728] ss:$16 sps:$4 sm:$0xff]   ;;  %v7227_v43 = vld [vmem:[#allocation5 + $0x744] ss:$16 sps:$4 sm:$0xff]  }
 0xbba   :  { %5172 = vmatprep.subr.bf16.mxu1 %v7215_v44  ;;  %5213 = vmatprep.subr.bf16.mxu0 %v7218_v45  ;;  %v7230_v44 = vld [vmem:[#allocation5 + $0x74c] ss:$16 sps:$4 sm:$0xff]   ;;  %v7225_v45 = vld [vmem:[#allocation5 + $0x740] ss:$16 sps:$4 sm:$0xff]  }
 0xc2f   :  { %v6422_v13 = vpop.f32.mrb[44].mxu1  ;;  %v6444_v46 = vpop.f32.mrb[48].mxu0 }
 0xc30   :  { %v6423_v14 = vpop.f32.mrb[45].mxu1  ;;  %v6445_v47 = vpop.f32.mrb[49].mxu0 }
 0xc31   :  { %v6424_v48 = vadd.f32 %v6423_v14, %v6422_v13  ;;  %v6446_v49 = vadd.f32 %v6445_v47, %v6444_v46  ;;  %v6425_v50 = vpop.f32.mrb[46].mxu1  ;;  %v6447_v51 = vpop.f32.mrb[50].mxu0  ;;  %v7228_v13 = vld [vmem:[#allocation5 + $0x748] ss:$16 sps:$4 sm:$0xff]   ;;  %v7233_v46 = vld [vmem:[#allocation5 + $0x764] ss:$16 sps:$4 sm:$0xff]  }
 0xc32   :  { %v6426_v52 = vpop.f32.mrb[47].mxu1  ;;  %v6448_v7 = vpop.f32.mrb[51].mxu0  ;;  %v7236_v14 = vld [vmem:[#allocation5 + $0x76c] ss:$16 sps:$4 sm:$0xff]   ;;  %v7231_v47 = vld [vmem:[#allocation5 + $0x760] ss:$16 sps:$4 sm:$0xff]  }
 0xc33   :  { %v4035_v53 = vadd.f32 %v6446_v49, %v6424_v48  ;;  %v7234_v48 = vld [vmem:[#allocation5 + $0x768] ss:$16 sps:$4 sm:$0xff]   ;;  %v7239_v49 = vld [vmem:[#allocation5 + $0x784] ss:$16 sps:$4 sm:$0xff]   ;;  %v7242_v50 = vld [vmem:[#allocation5 + $0x78c] ss:$16 sps:$4 sm:$0xff]  }
 0xc34   :  { %v7237_v51 = vld [vmem:[#allocation5 + $0x780] ss:$16 sps:$4 sm:$0xff]   ;;  %v7245_v52 = vld [vmem:[#allocation5 + $0x7a4] ss:$16 sps:$4 sm:$0xff]   ;;  %v7248_v7 = vld [vmem:[#allocation5 + $0x7ac] ss:$16 sps:$4 sm:$0xff]  }
 0xc4f   :  { %v6466_v54 = vpop.f32.mrb[48].mxu1  ;;  %v6488_v55 = vpop.f32.mrb[52].mxu0 }
 0xc50   :  { %v6467_v56 = vpop.f32.mrb[49].mxu1  ;;  %v6489_v57 = vpop.f32.mrb[53].mxu0 }
 0xc51   :  { %v6468_v58 = vadd.f32 %v6467_v56, %v6466_v54  ;;  %v6490_v59 = vadd.f32 %v6489_v57, %v6488_v55  ;;  %v6469_v60 = vpop.f32.mrb[50].mxu1  ;;  %v6491_v63 = vpop.f32.mrb[54].mxu0  ;;  %v7246_v54 = vld [vmem:[#allocation5 + $0x7a8] ss:$16 sps:$4 sm:$0xff]   ;;  %v7251_v55 = vld [vmem:[#allocation5 + $0x7c4] ss:$16 sps:$4 sm:$0xff]  }
 0xc52   :  { %v6470_v1 = vpop.f32.mrb[51].mxu1  ;;  %v6492_v3 = vpop.f32.mrb[55].mxu0  ;;  %v7254_v56 = vld [vmem:[#allocation5 + $0x7cc] ss:$16 sps:$4 sm:$0xff]   ;;  %v7249_v57 = vld [vmem:[#allocation5 + $0x7c0] ss:$16 sps:$4 sm:$0xff]  }
 0xc53   :  { %v4267_v4 = vadd.f32 %v6468_v58, %v4035_v53  ;;  %v7243_v53 = vld [vmem:[#allocation5 + $0x7a0] ss:$16 sps:$4 sm:$0xff]   ;;  %v7252_v58 = vld [vmem:[#allocation5 + $0x7c8] ss:$16 sps:$4 sm:$0xff]   ;;  %v7260_v60 = vld [vmem:[#allocation5 + $0x7ec] ss:$16 sps:$4 sm:$0xff]  }
 0xc54   :  { %v7255_v63 = vld [vmem:[#allocation5 + $0x7e0] ss:$16 sps:$4 sm:$0xff]   ;;  %v7258_v1 = vld [vmem:[#allocation5 + $0x7e8] ss:$16 sps:$4 sm:$0xff]  }
 0xc55   :  { %v7641_v0 = vadd.f32 %v6490_v59, %v4267_v4  ;;  %v7257_v59 = vld [vmem:[#allocation5 + $0x7e4] ss:$16 sps:$4 sm:$0xff]  }
 0xc56   :  { %v7261_v3 = vld [vmem:[#allocation7 + $0x740] sm:$0xff]  }
 0xc57   :  { %v7262_v4 = vld [vmem:[#allocation7 + $0x7c0] sm:$0xff]  }
 0xc6f   :  { %v4562_v16 = vpop.f32.mrb[52].mxu1  ;;  %v4603_v17 = vpop.f32.mrb[56].mxu0 }
 0xc70   :  { %v4563_v18 = vadd.f32 %v4562_v16, %v4351_v6  ;;  %v4604_v20 = vadd.f32 %v4603_v17, %v4359_v11  ;;  %v4564_v21 = vpop.f32.mrb[53].mxu1  ;;  %v4605_v22 = vpop.f32.mrb[57].mxu0  ;;  %v7264_v6 = vld [vmem:[#allocation7 + $0x780] sm:$0xff]   ;;  %v7265_v11 = vld [vmem:[#allocation7 + $0x748] sm:$0xff]   ;;  %v7269_v17 = vld [vmem:[#allocation7 + $0x750] sm:$0xff]  }
 0xc71   :  { %v4565_v26 = vadd.f32 %v4564_v21, %v4355_v12  ;;  %v4606_v29 = vadd.f32 %v4605_v22, %v4363_v15  ;;  %v4566_v30 = vpop.f32.mrb[54].mxu1  ;;  %v4607_v31 = vpop.f32.mrb[58].mxu0  ;;  %v7266_v12 = vld [vmem:[#allocation7 + $0x7c8] sm:$0xff]   ;;  %v7273_v21 = vld [vmem:[#allocation7 + $0x758] sm:$0xff]  }
 0xc72   :  { %v4610_v32 = vmax.f32 %v4563_v18, 0.0  ;;  %v4612_v33 = vmax.f32 %v4604_v20, 0.0  ;;  %v4567_v10 = vpop.f32.mrb[55].mxu1  ;;  %v4608_v34 = vpop.f32.mrb[59].mxu0  ;;  %v7267_v15 = vld [vmem:[#allocation7 + $0x708] sm:$0xff]   ;;  %v7270_v18 = vld [vmem:[#allocation7 + $0x7d0] sm:$0xff]  }
 0xc73   :  { %v4611_v35 = vmax.f32 %v4565_v26, 0.0  ;;  %v4613_v19 = vmax.f32 %v4606_v29, 0.0  ;;  %v7268_v16 = vld [vmem:[#allocation7 + $0x788] sm:$0xff]   ;;  %v7271_v20 = vld [vmem:[#allocation7 + $0x710] sm:$0xff]   ;;  %v7274_v22 = vld [vmem:[#allocation7 + $0x7d8] sm:$0xff]  }
 0xc74   :  { %v4614_v40 = vpack.c.bf16 %v4610_v32, %v4610_v32  ;;  %v4616_v8 = vpack.c.bf16 %v4612_v33, %v4612_v33  ;;  %v7275_v26 = vld [vmem:[#allocation7 + $0x718] sm:$0xff]   ;;  %v7277_v30 = vld [vmem:[#allocation7 + $0x760] sm:$0xff]   ;;  %v7281_v10 = vld [vmem:[#allocation7 + $0x768] sm:$0xff]  }
 0xc75   :  { %v4615_v36 = vpack.c.bf16 %v4611_v35, %v4611_v35  ;;  %v4617_v37 = vpack.c.bf16 %v4613_v19, %v4613_v19  ;;  %v7276_v29 = vld [vmem:[#allocation7 + $0x798] sm:$0xff]   ;;  %v7278_v31 = vld [vmem:[#allocation7 + $0x7e0] sm:$0xff]   ;;  %v7282_v34 = vld [vmem:[#allocation7 + $0x7e8] sm:$0xff]  }
 0xc76   :  { %v7279_v32 = vld [vmem:[#allocation7 + $0x720] sm:$0xff]   ;;  %v7283_v35 = vld [vmem:[#allocation7 + $0x728] sm:$0xff]  }
 0xc77   :  { %4907 = vmatprep.mubr.bf16.mxu1 %v4615_v36  ;;  %4947 = vmatprep.mubr.bf16.mxu0 %v4617_v37  ;;  %v7280_v33 = vld [vmem:[#allocation7 + $0x7a0] sm:$0xff]   ;;  %v7284_v19 = vld [vmem:[#allocation7 + $0x7a8] sm:$0xff]   ;;  %v7285_v36 = vld [vmem:[#allocation7 + $0x770] sm:$0xff]  }
 0xc78   :  { %4908 = vmatmul.mubr.bf16.vlgmr.msra.gmra.mrb[56].mxu1 %v4614_v40  ;;  %4948 = vmatmul.mubr.bf16.vlgmr.msra.gmra.mrb[60].mxu0 %v4616_v8  ;;  %v7286_v37 = vld [vmem:[#allocation7 + $0x7f0] sm:$0xff]   ;;  %v7289_v40 = vld [vmem:[#allocation7 + $0x778] sm:$0xff]  }
 0xc79   :  { %5173 = vmatpush1.bf16.msra.mxu1 %v7213_v38  ;;  %5214 = vmatpush1.bf16.msra.mxu0 %v7216_v39  ;;  %v7287_v38 = vld [vmem:[#allocation7 + $0x730] sm:$0xff]   ;;  %v7290_v8 = vld [vmem:[#allocation7 + $0x7f8] sm:$0xff]  }
 0xc7a   :  { %5174 = vmatprep.subr.bf16.mxu1 %v7221_v25  ;;  %5215 = vmatprep.subr.bf16.mxu0 %v7224_v9  ;;  %v7288_v39 = vld [vmem:[#allocation7 + $0x7b0] sm:$0xff]   ;;  %v7291_v25 = vld [vmem:[#allocation7 + $0x738] sm:$0xff]  }
 0xc7b   :  { %5204 = vmatprep.mubr.bf16.mxu1 %v7382_v61  ;;  %5245 = vmatprep.mubr.bf16.mxu0 %v7382_v61  ;;  %v7240_v61 = vld [vmem:[#allocation5 + $0x788] ss:$16 sps:$4 sm:$0xff]  }
 0xc7c   :  { %v7292_v9 = vld [vmem:[#allocation7 + $0x7b8] sm:$0xff]  }
 0xc7d   :  { %5175 = vmatpush1.bf16.msra.mxu1 %v7219_v41  ;;  %5216 = vmatpush1.bf16.msra.mxu0 %v7222_v42 }
 0xc7e   :  { %5176 = vmatprep.subr.bf16.mxu1 %v7227_v43  ;;  %5217 = vmatprep.subr.bf16.mxu0 %v7230_v44 }
 0xc81   :  { %5177 = vmatpush1.bf16.msra.mxu1 %v7225_v45  ;;  %5218 = vmatpush1.bf16.msra.mxu0 %v7228_v13 }
 0xc82   :  { %5178 = vmatprep.subr.bf16.mxu1 %v7233_v46  ;;  %5219 = vmatprep.subr.bf16.mxu0 %v7236_v14 }
 0xc85   :  { %5179 = vmatpush1.bf16.msra.mxu1 %v7231_v47  ;;  %5220 = vmatpush1.bf16.msra.mxu0 %v7234_v48 }
 0xc86   :  { %5180 = vmatprep.subr.bf16.mxu1 %v7239_v49  ;;  %5221 = vmatprep.subr.bf16.mxu0 %v7242_v50 }
 0xc89   :  { %5181 = vmatpush1.bf16.msra.mxu1 %v7237_v51  ;;  %5222 = vmatpush1.bf16.msra.mxu0 %v7240_v61  ;;  %v6141_v51 = vld [vmem:[%s7686_s5 + $0x1c] sm:$0xf] }
 0xc8a   :  { %5182 = vmatprep.subr.bf16.mxu1 %v7245_v52  ;;  %5223 = vmatprep.subr.bf16.mxu0 %v7248_v7  ;;  %v4995_v61 = vrot.slane %v6141_v51, %v7525_v27  ;;  %v5003_v52 = vrot.slane %v6141_v51, %v7527_v28  ;;  %v4999_v7 = vrot.slane %v6141_v51, %v7513_v23 }
 0xc8d   :  { %5183 = vmatpush1.bf16.msra.mxu1 %v7243_v53  ;;  %5224 = vmatpush1.bf16.msra.mxu0 %v7246_v54  ;;  %v5007_v53 = vrot.slane %v6141_v51, %v7515_v24  ;;  %v5650_v51 = vstv %s7688_s7 }
 0xc8e   :  { %5184 = vmatprep.subr.bf16.mxu1 %v7251_v55  ;;  %5225 = vmatprep.subr.bf16.mxu0 %v7254_v56 }
 0xc91   :  { %5185 = vmatpush1.bf16.msra.mxu1 %v7249_v57  ;;  %5226 = vmatpush1.bf16.msra.mxu0 %v7252_v58 }
 0xc92   :  { %5186 = vmatprep.subr.bf16.mxu1 %v7257_v59  ;;  %5227 = vmatprep.subr.bf16.mxu0 %v7260_v60 }
 0xc95   :  { %5187 = vmatpush1.bf16.msra.mxu1 %v7255_v63  ;;  %5228 = vmatpush1.bf16.msra.mxu0 %v7258_v1 }
 0xc96   :  { %6538 = vmatprep.subr.bf16.mxu1 %v7261_v3  ;;  %6560 = vmatprep.subr.bf16.mxu0 %v7262_v4 }
 0xc98   :  { %5205 = vmatmul.mubr.bf16.vlgmr.msra.gmra.mrb[60].mxu1 %v7603_v2  ;;  %5246 = vmatmul.mubr.bf16.vlgmr.msra.gmra.mrb[64].mxu0 %v7603_v2  ;;  %v7272_v2 = vld [vmem:[#allocation7 + $0x790] sm:$0xff]  }
 0xc99   :  { %6539 = vmatpush3.bf16.msra.mxu1 %v7263_v5  ;;  %6561 = vmatpush3.bf16.msra.mxu0 %v7264_v6 }
 0xc9a   :  { %6540 = vmatprep.subr.bf16.mxu1 %v7265_v11  ;;  %6562 = vmatprep.subr.bf16.mxu0 %v7266_v12 }
 0xc9d   :  { %6541 = vmatpush3.bf16.msra.mxu1 %v7267_v15  ;;  %6563 = vmatpush3.bf16.msra.mxu0 %v7268_v16 }
 0xc9e   :  { %6542 = vmatprep.subr.bf16.mxu1 %v7269_v17  ;;  %6564 = vmatprep.subr.bf16.mxu0 %v7270_v18 }
 0xca1   :  { %6543 = vmatpush3.bf16.msra.mxu1 %v7271_v20  ;;  %6565 = vmatpush3.bf16.msra.mxu0 %v7272_v2 }
 0xca2   :  { %6544 = vmatprep.subr.bf16.mxu1 %v7273_v21  ;;  %6566 = vmatprep.subr.bf16.mxu0 %v7274_v22 }
 0xca5   :  { %6545 = vmatpush3.bf16.msra.mxu1 %v7275_v26  ;;  %6567 = vmatpush3.bf16.msra.mxu0 %v7276_v29 }
 0xca6   :  { %6546 = vmatprep.subr.bf16.mxu1 %v7277_v30  ;;  %6568 = vmatprep.subr.bf16.mxu0 %v7278_v31 }
 0xca9   :  { %6547 = vmatpush3.bf16.msra.mxu1 %v7279_v32  ;;  %6569 = vmatpush3.bf16.msra.mxu0 %v7280_v33  ;;  %v6206_v32 = vld [vmem:[%s7683_s2 + $0xb] ss:$0 sm:$0xff] }
 0xcaa   :  { %6548 = vmatprep.subr.bf16.mxu1 %v7281_v10  ;;  %6570 = vmatprep.subr.bf16.mxu0 %v7282_v34 }
 0xcad   :  { %6549 = vmatpush3.bf16.msra.mxu1 %v7283_v35  ;;  %6571 = vmatpush3.bf16.msra.mxu0 %v7284_v19 }
 0xcae   :  { %6550 = vmatprep.subr.bf16.mxu1 %v7285_v36  ;;  %6572 = vmatprep.subr.bf16.mxu0 %v7286_v37 }
 0xcb1   :  { %6551 = vmatpush3.bf16.msra.mxu1 %v7287_v38  ;;  %6573 = vmatpush3.bf16.msra.mxu0 %v7288_v39 }
 0xcb2   :  { %6552 = vmatprep.subr.bf16.mxu1 %v7289_v40  ;;  %6574 = vmatprep.subr.bf16.mxu0 %v7290_v8  ;;  %v6207_v8 = vld [vmem:[%s7683_s2 + $0xc] ss:$0 sm:$0xff] }
 0xcb5   :  { %6553 = vmatpush3.bf16.msra.mxu1 %v7291_v25  ;;  %6575 = vmatpush3.bf16.msra.mxu0 %v7292_v9 }
 0xd4b   :  { %v6510_v41 = vpop.f32.mrb[56].mxu1  ;;  %v6532_v42 = vpop.f32.mrb[60].mxu0 }
 0xd4c   :  { %v6511_v43 = vpop.f32.mrb[57].mxu1  ;;  %v6533_v44 = vpop.f32.mrb[61].mxu0 }
 0xd4d   :  { %v6512_v45 = vadd.f32 %v6511_v43, %v6510_v41  ;;  %v6534_v13 = vadd.f32 %v6533_v44, %v6532_v42  ;;  %v6513_v46 = vpop.f32.mrb[58].mxu1  ;;  %v6535_v14 = vpop.f32.mrb[62].mxu0 }
 0xd4e   :  { %v6514_v47 = vpop.f32.mrb[59].mxu1  ;;  %v6536_v48 = vpop.f32.mrb[63].mxu0 }
 0xd4f   :  { %v4950_v49 = vadd.f32 %v6534_v13, %v6512_v45  ;;  %v6209_v48 = vld [vmem:[%s7683_s2 + $0x1] ss:$0 sm:$0xff] }
 0xd51   :  { %v4955_v50 = vadd.f32 %v4950_v49, %v7641_v0 }
 0xd6b   :  { %v5206_v54 = vpop.f32.mrb[60].mxu1  ;;  %v5247_v55 = vpop.f32.mrb[64].mxu0 }
 0xd6c   :  { %v5207_v56 = vadd.f32 %v5206_v54, %v4995_v61  ;;  %v5248_v57 = vadd.f32 %v5247_v55, %v5003_v52  ;;  %v5208_v58 = vpop.f32.mrb[61].mxu1  ;;  %v5249_v59 = vpop.f32.mrb[65].mxu0 }
 0xd6d   :  { %v5209_v60 = vadd.f32 %v5208_v58, %v4999_v7  ;;  %v5250_v0 = vadd.f32 %v5249_v59, %v5007_v53  ;;  %v5210_v63 = vpop.f32.mrb[62].mxu1  ;;  %v5251_v1 = vpop.f32.mrb[66].mxu0 }
 0xd6e   :  { %v5254_v3 = vmax.f32 %v5207_v56, 0.0  ;;  %v5256_v4 = vmax.f32 %v5248_v57, 0.0  ;;  %v5211_v5 = vpop.f32.mrb[63].mxu1  ;;  %v5252_v27 = vpop.f32.mrb[67].mxu0 }
 0xd6f   :  { %v5255_v6 = vmax.f32 %v5209_v60, 0.0  ;;  %v5257_v28 = vmax.f32 %v5250_v0, 0.0 }
 0xd70   :  { %v5258_v12 = vpack.c.bf16 %v5254_v3, %v5254_v3  ;;  %v5260_v24 = vpack.c.bf16 %v5256_v4, %v5256_v4 }
 0xd71   :  { %v5259_v11 = vpack.c.bf16 %v5255_v6, %v5255_v6  ;;  %v5261_v23 = vpack.c.bf16 %v5257_v28, %v5257_v28 }
 0xd73   :  { %5551 = vmatprep.mubr.bf16.mxu1 %v5259_v11  ;;  %5591 = vmatprep.mubr.bf16.mxu0 %v5261_v23 }
 0xd74   :  { %5552 = vmatmul.mubr.bf16.vlgmr.msra.gmra.mrb[64].mxu1 %v5258_v12  ;;  %5592 = vmatmul.mubr.bf16.vlgmr.msra.gmra.mrb[68].mxu0 %v5260_v24 }
 0xe47   :  { %v6554_v15 = vpop.f32.mrb[64].mxu1  ;;  %v6576_v16 = vpop.f32.mrb[68].mxu0 }
 0xe48   :  { %v6555_v17 = vpop.f32.mrb[65].mxu1  ;;  %v6577_v18 = vpop.f32.mrb[69].mxu0 }
 0xe49   :  { %v6556_v20 = vadd.f32 %v6555_v17, %v6554_v15  ;;  %v6578_v2 = vadd.f32 %v6577_v18, %v6576_v16  ;;  %v6557_v21 = vpop.f32.mrb[66].mxu1  ;;  %v6579_v22 = vpop.f32.mrb[70].mxu0 }
 0xe4a   :  { %v6558_v26 = vpop.f32.mrb[67].mxu1  ;;  %v6580_v29 = vpop.f32.mrb[71].mxu0 }
 0xe4b   :  { %v5594_v30 = vadd.f32 %v6578_v2, %v6556_v20 }
 0xe4d   :  { %v5599_v31 = vadd.f32 %v5594_v30, %v4955_v50 }
 0xe4f   :  { %v5600_v33 = vadd.f32 %v5599_v31, %v7599_v62  ;;  %v6208_v62 = vld [vmem:[%s7683_s2 + $0xd] ss:$0 sm:$0xff] }
 0xe51   :  { %v5606_v10 = vadd.f32 %v6206_v32, %v5600_v33 }
 0xe53   :  { %5609 = vadd.xlane.f32.xlu0 %v5606_v10 }
 0xee0   :  { %v5610_v34 = vpop.xlane.xlu0 %5609 }
 0xee1   :  { %v5611_v35 = vmul.f32 0.0078125, %v5610_v34 }
 0xee3   :  { %v5612_v19 = vsub.f32 %v5606_v10, %v5611_v35 }
 0xee5   :  { %v5613_v36 = vmul.f32 %v5612_v19, %v5612_v19 }
 0xee7   :  { %5614 = vadd.xlane.f32.xlu1 %v5613_v36 }
 0xf74   :  { %v5615_v37 = vpop.xlane.xlu1 %5614 }
 0xf75   :  { %v5616_v38 = vmul.f32 0.0078125, %v5615_v37 }
 0xf77   :  { %v5617_v39 = vadd.f32 1e-05, %v5616_v38 }
 0xf79   :  { %7299 = vrsqrt.f32 %v5617_v39 }
 0xf83   :  { %v7300_v40 = vpop.eup %7299 }
 0xf84   :  { %v5619_v25 = vmul.f32 %v7300_v40, %v5612_v19 }
 0xf86   :  { %v5624_v9 = vmul.f32 %v6207_v8, %v5619_v25 }
 0xf88   :  { %v5629_v41 = vadd.f32 %v6208_v62, %v5624_v9 }
 0xf8a   :  { %5630 = vadd.xlane.f32.xlu0 %v5629_v41 }
0x1017   :  { %v5631_v42 = vpop.xlane.xlu0 %5630 }
0x1018   :  { %v5632_v43 = vmul.f32 0.0078125, %v5631_v42 }
0x101a   :  { %v5633_v44 = vsub.f32 %v5629_v41, %v5632_v43 }
0x101c   :  { %v5634_v45 = vmul.f32 %v5633_v44, %v5633_v44 }
0x101e   :  { %5635 = vadd.xlane.f32.xlu1 %v5634_v45 }
0x10ab   :  { %v5636_v13 = vpop.xlane.xlu1 %5635 }
0x10ac   :  { %v5637_v46 = vmul.f32 0.0078125, %v5636_v13 }
0x10ae   :  { %v5638_v14 = vadd.f32 1e-05, %v5637_v46 }
0x10b0   :  { %7301 = vrsqrt.f32 %v5638_v14 }
0x10ba   :  { %v7302_v47 = vpop.eup %7301 }
0x10bb   :  { %v5640_v49 = vmul.f32 %v7302_v47, %v5633_v44 }
0x10bd   :  { %v5646_v50 = vmul.f32 %v6209_v48, %v5640_v49 }
0x10bf   :  { %5647 = vadd.xlane.f32.xlu0 %v5646_v50 }
0x114c   :  { %v5648_v61 = vpop.xlane.xlu0 %5647 }
0x114d   :  { %v5651_v52 = vadd.f32 %v5650_v51, %v5648_v61 }
0x114f   :  { %5653 = vst.msk [vmem:[%s7689_s8] sm:$0xff] %vm5652_vm2, %v5651_v52 }
0x1150   :  { %5658 = vsyncpa [#allocation4], 1 }
0x1151   :  { %5659 = vsyncpa [#allocation6], 1 }

</bundles_post_ra>
